<compile_context>
chip_gen: v6e
topology: v6e:2x2x1
jax: 0.10.0
libtpu: 0.0.40
codegen_flags: <defaults>
</compile_context>

<pallas_src>
import functools

import jax
import jax.numpy as jnp
from jax.experimental import pallas as pl
from jax.experimental.pallas import tpu as pltpu

BN_EPS = 1e-5
LANE = 128
TM_MAX = 1024                        # fewer grid steps / weight re-fetches
TN_MAX = 512
TK_MAX = 512
SMALL_W_BYTES = 4 * 1024 * 1024      # weights below this stay whole in VMEM
VMEM_TILE_BUDGET = 24 * 1024 * 1024  # per-kernel working-set budget (fits v7x)
VMEM_LIMIT_BYTES = 48 * 1024 * 1024


def _round_up(v, m):
    return (v + m - 1) // m * m


# --------------------------------------------------------------------------- #
# Matmul kernels: (B, M, K) @ (K, N) with fused BN / act / SE-scale / residual
# --------------------------------------------------------------------------- #
def _make_mm_kernel_single(act, has_in_scale, has_res):
    """Collapsed-K kernel: whole K and N per step, no accumulator scratch."""

    def kernel(*refs):
        i = 0
        x_ref = refs[i]; i += 1          # (1, TM, K)  bf16
        w_ref = refs[i]; i += 1          # (K, N)      bf16
        sc_ref = refs[i]; i += 1         # (1, N)      f32
        bi_ref = refs[i]; i += 1         # (1, N)      f32
        xs_ref = None
        res_ref = None
        if has_in_scale:
            xs_ref = refs[i]; i += 1     # (1, 1, K)   f32
        if has_res:
            res_ref = refs[i]; i += 1    # (1, TM, N)  bf16
        o_ref = refs[i]                  # (1, TM, N)  bf16

        x = x_ref[0]
        if has_in_scale:
            # SE gate multiplies the hidden activation channels (K axis); do the
            # multiply in f32, round once to bf16 for the MXU.
            x = (x.astype(jnp.float32) * xs_ref[0]).astype(jnp.bfloat16)
        y = jnp.dot(x, w_ref[...], preferred_element_type=jnp.float32)
        y = y * sc_ref[...] + bi_ref[...]
        if act == "silu":
            y = y * jax.nn.sigmoid(y)
        elif act == "sigmoid":
            y = jax.nn.sigmoid(y)
        if has_res:
            y = y + res_ref[0].astype(jnp.float32)
        o_ref[0] = y.astype(o_ref.dtype)

    return kernel


def _make_mm_kernel_tiled(act, has_in_scale, has_res):
    """Tiled-K fallback with an f32 VMEM accumulator.

    Correctness relies on the K grid axis being LAST and marked "arbitrary":
    the output index_map is independent of k, so the same output block (and the
    acc scratch) is revisited across consecutive k steps only.
    """

    def kernel(*refs):
        i = 0
        x_ref = refs[i]; i += 1          # (1, TM, TK) bf16
        w_ref = refs[i]; i += 1          # (TK, TN)    bf16
        sc_ref = refs[i]; i += 1         # (1, TN)     f32
        bi_ref = refs[i]; i += 1         # (1, TN)     f32
        xs_ref = None
        res_ref = None
        if has_in_scale:
            xs_ref = refs[i]; i += 1     # (1, 1, TK)  f32
        if has_res:
            res_ref = refs[i]; i += 1    # (1, TM, TN) bf16
        o_ref = refs[i]                  # (1, TM, TN) bf16
        acc_ref = refs[i + 1]            # (TM, TN)    f32 scratch

        k = pl.program_id(3)

        @pl.when(k == 0)
        def _init():
            acc_ref[...] = jnp.zeros_like(acc_ref)

        x = x_ref[0]
        if has_in_scale:
            x = (x.astype(jnp.float32) * xs_ref[0]).astype(jnp.bfloat16)
        acc_ref[...] += jnp.dot(x, w_ref[...], preferred_element_type=jnp.float32)

        @pl.when(k == pl.num_programs(3) - 1)
        def _finalize():
            y = acc_ref[...] * sc_ref[...] + bi_ref[...]
            if act == "silu":
                y = y * jax.nn.sigmoid(y)
            elif act == "sigmoid":
                y = jax.nn.sigmoid(y)
            if has_res:
                y = y + res_ref[0].astype(jnp.float32)
            o_ref[0] = y.astype(o_ref.dtype)

    return kernel


def _pick_tm(M, K, N, has_res):
    """Largest M tile whose (double-buffered) working set fits the VMEM budget."""
    tm = min(TM_MAX, _round_up(M, 8))

    def est(t):
        x_b = t * K * 2
        o_b = t * N * 2
        r_b = t * N * 2 if has_res else 0
        w_b = K * N * 2
        return 2 * (x_b + o_b + r_b) + w_b

    while tm > 8 and est(tm) > VMEM_TILE_BUDGET:
        tm = _round_up(tm // 2, 8)
    return tm


def fused_matmul(x, w, scale, bias, *, act="none", in_scale=None, residual=None,
                 out_dtype=jnp.bfloat16):
    """x: (M,K) or (B,M,K); w: (K,N); scale,bias: (N,).

    Optional in_scale (B,K): per-channel SE gate multiplied into the LHS rows.
    Optional residual: same logical shape as output (bf16 ok), added post-BN.
    Returns out_dtype output with the same leading layout as x.
    """
    squeeze = x.ndim == 2
    if squeeze:
        x = x[None]
        if residual is not None:
            residual = residual[None]
        if in_scale is not None:
            in_scale = in_scale[None]

    B, M, K = x.shape
    Kw, N = w.shape
    assert Kw == K

    xb = x.astype(jnp.bfloat16)                       # no-op when already bf16
    wb = w.astype(jnp.bfloat16)                       # constant-folded (params)
    sc = scale.astype(jnp.float32).reshape(1, N)
    bi = bias.astype(jnp.float32).reshape(1, N)

    has_in_scale = in_scale is not None
    has_res = residual is not None

    small_weight = (K * N * 2 <= SMALL_W_BYTES) and (K <= 4096) and (N <= 8192)

    if small_weight:
        # ---------- collapsed-K path: no K grid axis, no accumulator ----------
        TM = _pick_tm(M, K, N, has_res)
        Mp = _round_up(M, TM)
        if Mp != M:
            xb = jnp.pad(xb, ((0, 0), (0, Mp - M), (0, 0)))
            if has_res:
                residual = jnp.pad(residual.astype(jnp.bfloat16),
                                   ((0, 0), (0, Mp - M), (0, 0)))

        inputs = [xb, wb, sc, bi]
        in_specs = [
            pl.BlockSpec((1, TM, K), lambda b, i: (b, i, 0)),
            pl.BlockSpec((K, N), lambda b, i: (0, 0)),
            pl.BlockSpec((1, N), lambda b, i: (0, 0)),
            pl.BlockSpec((1, N), lambda b, i: (0, 0)),
        ]
        if has_in_scale:
            inputs.append(in_scale.astype(jnp.float32).reshape(B, 1, K))
            in_specs.append(pl.BlockSpec((1, 1, K), lambda b, i: (b, 0, 0)))
        if has_res:
            inputs.append(residual.astype(jnp.bfloat16))
            in_specs.append(pl.BlockSpec((1, TM, N), lambda b, i: (b, i, 0)))

        out = pl.pallas_call(
            _make_mm_kernel_single(act, has_in_scale, has_res),
            out_shape=jax.ShapeDtypeStruct((B, Mp, N), out_dtype),
            grid=(B, Mp // TM),
            in_specs=in_specs,
            out_specs=pl.BlockSpec((1, TM, N), lambda b, i: (b, i, 0)),
            compiler_params=pltpu.CompilerParams(
                dimension_semantics=("parallel", "parallel"),
                vmem_limit_bytes=VMEM_LIMIT_BYTES),
        )(*inputs)
        out = out[:, :M, :]
    else:
        # ---------- tiled-K fallback (big weights) ----------
        TM = min(TM_MAX, _round_up(M, 8))
        TN = min(TN_MAX, _round_up(N, LANE))
        TK = min(TK_MAX, _round_up(K, LANE))
        Mp, Np, Kp = _round_up(M, TM), _round_up(N, TN), _round_up(K, TK)

        xb = jnp.pad(xb, ((0, 0), (0, Mp - M), (0, Kp - K)))
        wb = jnp.pad(wb, ((0, Kp - K), (0, Np - N)))
        sc = jnp.pad(sc, ((0, 0), (0, Np - N)))
        bi = jnp.pad(bi, ((0, 0), (0, Np - N)))

        inputs = [xb, wb, sc, bi]
        in_specs = [
            pl.BlockSpec((1, TM, TK), lambda b, i, j, k: (b, i, k)),
            pl.BlockSpec((TK, TN), lambda b, i, j, k: (k, j)),
            pl.BlockSpec((1, TN), lambda b, i, j, k: (0, j)),
            pl.BlockSpec((1, TN), lambda b, i, j, k: (0, j)),
        ]
        if has_in_scale:
            isb = jnp.pad(in_scale.astype(jnp.float32), ((0, 0), (0, Kp - K)))
            inputs.append(isb.reshape(B, 1, Kp))
            in_specs.append(pl.BlockSpec((1, 1, TK), lambda b, i, j, k: (b, 0, k)))
        if has_res:
            rp = jnp.pad(residual.astype(jnp.bfloat16),
                         ((0, 0), (0, Mp - M), (0, Np - N)))
            inputs.append(rp)
            in_specs.append(pl.BlockSpec((1, TM, TN), lambda b, i, j, k: (b, i, j)))

        # K (reduction) axis MUST stay last and "arbitrary" for the acc scratch.
        out = pl.pallas_call(
            _make_mm_kernel_tiled(act, has_in_scale, has_res),
            out_shape=jax.ShapeDtypeStruct((B, Mp, Np), out_dtype),
            grid=(B, Mp // TM, Np // TN, Kp // TK),
            in_specs=in_specs,
            out_specs=pl.BlockSpec((1, TM, TN), lambda b, i, j, k: (b, i, j)),
            scratch_shapes=[pltpu.VMEM((TM, TN), jnp.float32)],
            compiler_params=pltpu.CompilerParams(
                dimension_semantics=("parallel", "parallel", "parallel",
                                     "arbitrary"),
                vmem_limit_bytes=VMEM_LIMIT_BYTES),
        )(*inputs)
        out = out[:, :M, :N]

    return out[0] if squeeze else out


# --------------------------------------------------------------------------- #
# Depthwise 3x3 conv + BN + SiLU (no im2col: in-kernel shifted taps)
# --------------------------------------------------------------------------- #
def _make_dw_kernel(stride, Ho, Wo):
    def kernel(x_ref, w_ref, sc_ref, bi_ref, o_ref):
        # x_ref: (1, P, Hq, Wq, TC) bf16; w_ref: (9, 1, 1, TC) f32,
        # sc/bi: (1, 1, TC) f32, o_ref: (1, Ho, Wo, TC) bf16
        acc = None
        for kh in range(3):
            for kw in range(3):
                if stride == 1:
                    tap = x_ref[0, 0, kh:kh + Ho, kw:kw + Wo, :]
                else:
                    p = 2 * (kh % 2) + (kw % 2)
                    tap = x_ref[0, p,
                                kh // 2:kh // 2 + Ho,
                                kw // 2:kw // 2 + Wo, :]
                term = tap * w_ref[kh * 3 + kw]     # bf16 * f32 -> f32
                acc = term if acc is None else acc + term
        y = acc * sc_ref[...] + bi_ref[...]
        o_ref[0] = (y * jax.nn.sigmoid(y)).astype(o_ref.dtype)

    return kernel


def dwconv3x3_bn_silu(x, dp, stride):
    """x: (B,H,W,C) bf16; dp: {'w': (9,C) f32, 'scale': (C,), 'bias': (C,)}."""
    B, H, W, C = x.shape
    Ho = (H + 2 - 3) // stride + 1
    Wo = (W + 2 - 3) // stride + 1
    xp = jnp.pad(x, ((0, 0), (1, 1), (1, 1), (0, 0)))

    if stride == 1:
        phases = xp[:, None]                      # (B, 1, Hp, Wp, C)
        P, Hq, Wq = 1, H + 2, W + 2
    else:
        Hq, Wq = Ho + 1, Wo + 1
        Hp, Wp = H + 2, W + 2
        xp = jnp.pad(xp, ((0, 0),
                          (0, max(0, 2 * Hq - Hp)),
                          (0, max(0, 2 * Wq - Wp)),
                          (0, 0)))
        planes = [xp[:, a::2, b::2][:, :Hq, :Wq]
                  for a in range(2) for b in range(2)]
        phases = jnp.stack(planes, axis=1)        # (B, 4, Hq, Wq, C)
        P = 4

    # Keep channels un-padded: full-dim channel blocks are legal, so no extra
    # pad/slice HBM passes.  Tile by 128 lanes only when C divides evenly.
    TC = LANE if C % LANE == 0 else C
    wq = dp["w"].reshape(9, 1, 1, C)
    sc = dp["scale"].reshape(1, 1, C)
    bi = dp["bias"].reshape(1, 1, C)

    # TODO(synk): row-tile (Ho axis) + pltpu.roll-based kw shifts for large
    #             resolutions; full-plane blocks are fine at these sizes.
    out = pl.pallas_call(
        _make_dw_kernel(stride, Ho, Wo),
        out_shape=jax.ShapeDtypeStruct((B, Ho, Wo, C), jnp.bfloat16),
        grid=(B, C // TC),
        in_specs=[
            pl.BlockSpec((1, P, Hq, Wq, TC), lambda b, c: (b, 0, 0, 0, c)),
            pl.BlockSpec((9, 1, 1, TC), lambda b, c: (0, 0, 0, c)),
            pl.BlockSpec((1, 1, TC), lambda b, c: (0, 0, c)),
            pl.BlockSpec((1, 1, TC), lambda b, c: (0, 0, c)),
        ],
        out_specs=pl.BlockSpec((1, Ho, Wo, TC), lambda b, c: (b, 0, 0, c)),
        compiler_params=pltpu.CompilerParams(
            dimension_semantics=("parallel", "parallel"),
            vmem_limit_bytes=VMEM_LIMIT_BYTES),
    )(phases, wq, sc, bi)
    return out


# --------------------------------------------------------------------------- #
# Fused SE gate: global average pool + FC1(SiLU) + FC2(sigmoid), one kernel
# --------------------------------------------------------------------------- #
def _se_kernel(x_ref, w1_ref, b1_ref, w2_ref, b2_ref, o_ref, *, inv_hw):
    # x_ref: (1, HW, Ch) bf16; w1: (Ch, H1) bf16; b1: (1, H1) f32;
    # w2: (H1, Ch) bf16; b2: (1, Ch) f32; o_ref: (1, 1, Ch) f32
    pooled = jnp.sum(x_ref[0].astype(jnp.float32), axis=0, keepdims=True) * inv_hw
    h = jnp.dot(pooled.astype(jnp.bfloat16), w1_ref[...],
                preferred_element_type=jnp.float32) + b1_ref[...]
    h = h * jax.nn.sigmoid(h)                                  # SiLU
    s = jnp.dot(h.astype(jnp.bfloat16), w2_ref[...],
                preferred_element_type=jnp.float32) + b2_ref[...]
    o_ref[0] = jax.nn.sigmoid(s)


def se_gate(y, sp):
    """y: (B, HW, Ch) bf16 -> (B, Ch) f32 sigmoid gate (one fused pallas_call)."""
    B, HW, Ch = y.shape
    H1 = sp["w1"].shape[1]
    b1 = sp["b1"].reshape(1, H1)
    b2 = sp["b2"].reshape(1, Ch)
    out = pl.pallas_call(
        functools.partial(_se_kernel, inv_hw=1.0 / HW),
        out_shape=jax.ShapeDtypeStruct((B, 1, Ch), jnp.float32),
        grid=(B,),
        in_specs=[
            pl.BlockSpec((1, HW, Ch), lambda b: (b, 0, 0)),
            pl.BlockSpec((Ch, H1), lambda b: (0, 0)),
            pl.BlockSpec((1, H1), lambda b: (0, 0)),
            pl.BlockSpec((H1, Ch), lambda b: (0, 0)),
            pl.BlockSpec((1, Ch), lambda b: (0, 0)),
        ],
        out_specs=pl.BlockSpec((1, 1, Ch), lambda b: (b, 0, 0)),
        compiler_params=pltpu.CompilerParams(
            dimension_semantics=("parallel",),
            vmem_limit_bytes=VMEM_LIMIT_BYTES),
    )(y, sp["w1"], b1, sp["w2"], b2)
    return out[:, 0, :]


# --------------------------------------------------------------------------- #
# Global average pool over spatial positions (final pool before classifier)
# --------------------------------------------------------------------------- #
def _pool_kernel(x_ref, o_ref, *, inv_hw):
    o_ref[0] = (jnp.sum(x_ref[0].astype(jnp.float32), axis=0, keepdims=True)
                * inv_hw)


def avgpool_spatial(x):
    """(B, HW, C) bf16 -> (B, C) f32 mean over spatial."""
    B, HW, C = x.shape
    TC = LANE if C % LANE == 0 else C
    out = pl.pallas_call(
        functools.partial(_pool_kernel, inv_hw=1.0 / HW),
        out_shape=jax.ShapeDtypeStruct((B, 1, C), jnp.float32),
        grid=(B, C // TC),
        in_specs=[pl.BlockSpec((1, HW, TC), lambda b, c: (b, 0, c))],
        out_specs=pl.BlockSpec((1, 1, TC), lambda b, c: (b, 0, c)),
        compiler_params=pltpu.CompilerParams(
            dimension_semantics=("parallel", "parallel"),
            vmem_limit_bytes=VMEM_LIMIT_BYTES),
    )(x)
    return out[:, 0, :]


# --------------------------------------------------------------------------- #
# JAX glue: im2col (dense 3x3 only), layer wrappers
# --------------------------------------------------------------------------- #
def make_divisible_by_8(v):
    new_v = max(8, int(v + 4) // 8 * 8)
    if new_v < 0.9 * v:
        new_v += 8
    return new_v


def extract_patches_3x3(x, stride):
    """x: (B,H,W,C) NHWC, 3x3 kernel, padding=1 -> (9,B,Ho,Wo,C)."""
    B, H, W, C = x.shape
    Ho = (H + 2 - 3) // stride + 1
    Wo = (W + 2 - 3) // stride + 1
    xp = jnp.pad(x, ((0, 0), (1, 1), (1, 1), (0, 0)))
    taps = []
    for kh in range(3):
        for kw in range(3):
            taps.append(xp[:,
                           kh:kh + (Ho - 1) * stride + 1:stride,
                           kw:kw + (Wo - 1) * stride + 1:stride, :])
    return jnp.stack(taps, axis=0), Ho, Wo


def conv3x3_bn_act(x, cp, stride, act):
    B, H, W, Cin = x.shape
    patches, Ho, Wo = extract_patches_3x3(x, stride)          # (9,B,Ho,Wo,Cin) bf16
    pm = patches.transpose(1, 2, 3, 0, 4).reshape(B * Ho * Wo, 9 * Cin)
    Cout = cp["wm"].shape[1]
    y = fused_matmul(pm, cp["wm"], cp["scale"], cp["bias"], act=act)
    return y.reshape(B, Ho, Wo, Cout)


def conv1x1_bn_act(x, cp, act):
    B, H, W, Cin = x.shape
    Cout = cp["wm"].shape[1]
    y = fused_matmul(x.reshape(B * H * W, Cin), cp["wm"], cp["scale"],
                     cp["bias"], act=act)
    return y.reshape(B, H, W, Cout)


def mbconv_forward(x, p):
    inp = x
    B, H, W, Cin = x.shape
    if p["use_se"]:
        y = conv1x1_bn_act(x, p["expand"], "silu")            # bf16
        y = dwconv3x3_bn_silu(y, p["dw"], p["stride"])        # bf16
        _, Ho, Wo, Ch = y.shape
        yf = y.reshape(B, Ho * Wo, Ch)
        s = se_gate(yf, p["se"])                               # (B, Ch) f32
        res = inp.reshape(B, H * W, Cin) if p["use_res"] else None
        Cout = p["project"]["wm"].shape[1]
        # SE scale + project 1x1 + BN + residual fused into one kernel.
        out = fused_matmul(yf, p["project"]["wm"], p["project"]["scale"],
                           p["project"]["bias"], act="none",
                           in_scale=s, residual=res)
        return out.reshape(B, Ho, Wo, Cout)
    else:
        y = conv3x3_bn_act(x, p["conv3"], p["stride"], "silu")
        _, Ho, Wo, Ch = y.shape
        yf = y.reshape(B * Ho * Wo, Ch)
        res = inp.reshape(B * H * W, Cin) if p["use_res"] else None
        Cout = p["project"]["wm"].shape[1]
        out = fused_matmul(yf, p["project"]["wm"], p["project"]["scale"],
                           p["project"]["bias"], act="none", residual=res)
        return out.reshape(B, Ho, Wo, Cout)


def efficientnet_forward(pp, x_nchw):
    # NCHW -> NHWC once, cast to bf16 once; channels stay on the lane axis.
    x = jnp.transpose(x_nchw, (0, 2, 3, 1)).astype(jnp.bfloat16)
    x = conv3x3_bn_act(x, pp["stem"], stride=2, act="silu")
    for bp in pp["blocks"]:
        x = mbconv_forward(x, bp)
    x = conv1x1_bn_act(x, pp["head"], "silu")
    B, H, W, C = x.shape
    pooled = avgpool_spatial(x.reshape(B, H * W, C))          # (B, 1792) f32
    # Classifier (N=10): plain XLA dot, a Pallas kernel here is pure overhead.
    logits = pooled @ pp["cls_w"] + pp["cls_b"]
    return logits


# --------------------------------------------------------------------------- #
# Parameter preparation: fold BN, transpose weights, cast matmul weights to bf16
# --------------------------------------------------------------------------- #
def _fold_bn(p):
    scale = p["gamma"] / jnp.sqrt(p["var"] + BN_EPS)
    bias = p["beta"] - p["mean"] * scale
    return scale.astype(jnp.float32), bias.astype(jnp.float32)


def prepare_conv_bn(p, depthwise=False):
    scale, bias = _fold_bn(p)
    w = p["w"]
    if depthwise:
        # (C,1,3,3) -> (9,C) in (kh,kw) tap order; kept f32 (VPU math stays f32)
        wt = w[:, 0].reshape(w.shape[0], 9).T
        return {"w": wt.astype(jnp.float32), "scale": scale, "bias": bias}
    Cout, Cin, kh, kw = w.shape
    if kh == 1:
        wm = w.reshape(Cout, Cin).T
    else:
        wm = w.transpose(2, 3, 1, 0).reshape(kh * kw * Cin, Cout)
    return {"wm": wm.astype(jnp.bfloat16), "scale": scale, "bias": bias}


def prepare_params(params):
    pp = {
        "stem": prepare_conv_bn(params["stem"]),
        "head": prepare_conv_bn(params["head"]),
        "cls_w": params["cls_w"].T.astype(jnp.float32),
        "cls_b": params["cls_b"].astype(jnp.float32),
        "blocks": [],
    }
    for bp in params["blocks"]:
        nb = {"use_se": bp["use_se"], "stride": bp["stride"],
              "use_res": bp["use_res"]}
        if bp["use_se"]:
            nb["expand"] = prepare_conv_bn(bp["expand"])
            nb["dw"] = prepare_conv_bn(bp["dw"], depthwise=True)
            nb["se"] = {
                "w1": bp["se"]["w1"].T.astype(jnp.bfloat16),
                "b1": bp["se"]["b1"].astype(jnp.float32),
                "w2": bp["se"]["w2"].T.astype(jnp.bfloat16),
                "b2": bp["se"]["b2"].astype(jnp.float32),
            }
        else:
            nb["conv3"] = prepare_conv_bn(bp["conv3"])
        nb["project"] = prepare_conv_bn(bp["project"])
        pp["blocks"].append(nb)
    return pp


# --------------------------------------------------------------------------- #
# Deterministic parameter initialization (mirrors EfficientNet.__init__)
# --------------------------------------------------------------------------- #
class _KeyGen:
    def __init__(self, key):
        self.key = key
        self.i = 0

    def __call__(self):
        self.i += 1
        return jax.random.fold_in(self.key, self.i)


def conv_bn_init(kg, cin, cout, k, depthwise=False):
    shape = (cout, 1, k, k) if depthwise else (cout, cin, k, k)
    return {
        "w": jax.random.normal(kg(), shape, jnp.float32) * 0.1,
        "gamma": 1.0 + 0.05 * jax.random.normal(kg(), (cout,), jnp.float32),
        "beta": 0.05 * jax.random.normal(kg(), (cout,), jnp.float32),
        "mean": 0.05 * jax.random.normal(kg(), (cout,), jnp.float32),
        "var": 0.5 + jnp.abs(jax.random.normal(kg(), (cout,), jnp.float32)) * 0.1,
    }


def mbconv_init(kg, inp, oup, stride, expand_ratio, use_se):
    hidden = round(inp * expand_ratio)
    p = {"use_se": use_se, "stride": stride,
         "use_res": (stride == 1 and inp == oup)}
    if use_se:
        se_hid = make_divisible_by_8(inp // 4)
        p["expand"] = conv_bn_init(kg, inp, hidden, 1)
        p["dw"] = conv_bn_init(kg, hidden, hidden, 3, depthwise=True)
        p["se"] = {
            "w1": jax.random.normal(kg(), (se_hid, hidden), jnp.float32) * 0.1,
            "b1": 0.05 * jax.random.normal(kg(), (se_hid,), jnp.float32),
            "w2": jax.random.normal(kg(), (hidden, se_hid), jnp.float32) * 0.1,
            "b2": 0.05 * jax.random.normal(kg(), (hidden,), jnp.float32),
        }
        p["project"] = conv_bn_init(kg, hidden, oup, 1)
    else:
        p["conv3"] = conv_bn_init(kg, inp, hidden, 3)
        p["project"] = conv_bn_init(kg, hidden, oup, 1)
    return p


def init_efficientnet_params(key, config, limit):
    kg = _KeyGen(key)
    params = {}
    input_channel = make_divisible_by_8(24)
    params["stem"] = conv_bn_init(kg, 3, input_channel, 3)
    blocks = []
    for t, c, n, s, use_se in config:
        output_channel = make_divisible_by_8(c)
        for i in range(n):
            stride = s if i == 0 else 1
            blocks.append(
                mbconv_init(kg, input_channel, output_channel, stride, t, use_se))
            input_channel = output_channel
    params["blocks"] = blocks
    params["head"] = conv_bn_init(kg, input_channel, 1792, 1)
    params["cls_w"] = jax.random.normal(kg(), (limit, 1792), jnp.float32) * 0.02
    params["cls_b"] = 0.02 * jax.random.normal(kg(), (limit,), jnp.float32)
    return params


# --------------------------------------------------------------------------- #
if __name__ == "__main__":
    # Small EfficientNet-style config: (expand_ratio t, channels c, repeats n,
    # stride s, use_se). Second stage exercises SE, depthwise conv and residual.
    config = [
        (1, 16, 1, 1, False),
        (4, 24, 2, 2, True),
    ]
    limit = 10

    key = jax.random.PRNGKey(0)
    pkey, xkey = jax.random.split(key)
    params = init_efficientnet_params(pkey, config, limit)
    prepared = prepare_params(params)

    x = jax.random.normal(xkey, (2, 3, 16, 16), jnp.float32)  # NCHW like PyTorch

    # jit via closure so the static Python flags (use_se / stride / use_res) are
    # not traced and the folded/padded/cast weights are baked in as constants.
    fwd = jax.jit(functools.partial(efficientnet_forward, prepared))
    logits = jax.block_until_ready(fwd(x))

    assert logits.shape == (2, limit)
    assert bool(jnp.all(jnp.isfinite(logits)))
    print("KERNEL_OK")
</pallas_src>

<mosaic_0001>
module attributes {stable_mosaic.version = 11 : i64} {
  func.func @kernel(%arg0: i32, %arg1: i32, %arg2: memref<1x128x27xbf16, #tpu.memory_space<vmem>>, %arg3: memref<27x24xbf16, #tpu.memory_space<vmem>>, %arg4: memref<1x24xf32, #tpu.memory_space<vmem>>, %arg5: memref<1x24xf32, #tpu.memory_space<vmem>>, %arg6: memref<1x128x24xbf16, #tpu.memory_space<vmem>>) attributes {dimension_semantics = [#tpu.dimension_semantics<parallel>, #tpu.dimension_semantics<parallel>], iteration_bounds = array<i64: 1, 1>, scalar_prefetch = 0 : i64, scratch_operands = 0 : i64, tpu.core_type = #tpu.core_type<tc>, window_params = [{transform_indices = @transform_0, window_bounds = array<i64: 1, 128, 27>}, {pipeline_mode = #tpu.pipeline_mode<synchronous>, transform_indices = @transform_1, window_bounds = array<i64: 27, 24>}, {pipeline_mode = #tpu.pipeline_mode<synchronous>, transform_indices = @transform_2, window_bounds = array<i64: 1, 24>}, {pipeline_mode = #tpu.pipeline_mode<synchronous>, transform_indices = @transform_3, window_bounds = array<i64: 1, 24>}, {transform_indices = @transform_4, window_bounds = array<i64: 1, 128, 24>}]} {
    %c0 = arith.constant 0 : index
    %c0_0 = arith.constant 0 : index
    %c0_1 = arith.constant 0 : index
    %0 = vector.load %arg2[%c0, %c0_0, %c0_1] : memref<1x128x27xbf16, #tpu.memory_space<vmem>>, vector<1x128x27xbf16>
    %1 = vector.shape_cast %0 : vector<1x128x27xbf16> to vector<128x27xbf16>
    %c0_2 = arith.constant 0 : index
    %c0_3 = arith.constant 0 : index
    %2 = vector.load %arg3[%c0_2, %c0_3] : memref<27x24xbf16, #tpu.memory_space<vmem>>, vector<27x24xbf16>
    %cst = arith.constant dense<0.000000e+00> : vector<128x24xf32>
    %3 = tpu.matmul %1, %2, %cst {dimension_numbers = #tpu.dot_dimension_numbers<[1], [0], [0], [1], [0, 0, 1, 1], [], []>} : vector<128x27xbf16>, vector<27x24xbf16>, vector<128x24xf32> -> vector<128x24xf32>
    %c0_4 = arith.constant 0 : index
    %c0_5 = arith.constant 0 : index
    %4 = vector.load %arg4[%c0_4, %c0_5] : memref<1x24xf32, #tpu.memory_space<vmem>>, vector<1x24xf32>
    %5 = vector.broadcast %4 : vector<1x24xf32> to vector<128x24xf32>
    %6 = arith.mulf %3, %5 : vector<128x24xf32>
    %c0_6 = arith.constant 0 : index
    %c0_7 = arith.constant 0 : index
    %7 = vector.load %arg5[%c0_6, %c0_7] : memref<1x24xf32, #tpu.memory_space<vmem>>, vector<1x24xf32>
    %8 = vector.broadcast %7 : vector<1x24xf32> to vector<128x24xf32>
    %9 = arith.addf %6, %8 : vector<128x24xf32>
    %10 = arith.negf %9 : vector<128x24xf32>
    %11 = math.exp %10 : vector<128x24xf32>
    %cst_8 = arith.constant 1.000000e+00 : f32
    %12 = vector.broadcast %cst_8 : f32 to vector<128x24xf32>
    %13 = arith.addf %12, %11 : vector<128x24xf32>
    %14 = arith.divf %12, %13 : vector<128x24xf32>
    %15 = arith.mulf %9, %14 : vector<128x24xf32>
    %16 = arith.truncf %15 : vector<128x24xf32> to vector<128x24xbf16>
    %c0_9 = arith.constant 0 : index
    %c0_10 = arith.constant 0 : index
    %c0_11 = arith.constant 0 : index
    %17 = vector.load %arg6[%c0_9, %c0_10, %c0_11] : memref<1x128x24xbf16, #tpu.memory_space<vmem>>, vector<1x128x24xbf16>
    %18 = vector.shape_cast %17 : vector<1x128x24xbf16> to vector<128x24xbf16>
    %19 = vector.shape_cast %16 : vector<128x24xbf16> to vector<1x128x24xbf16>
    tpu.vector_store %arg6[%c0_9, %c0_10, %c0_11], %19 {strides = array<i32>} : memref<1x128x24xbf16, #tpu.memory_space<vmem>>, vector<1x128x24xbf16>,
    return
  }
  func.func @transform_0(%arg0: i32, %arg1: i32) -> (i32, i32, i32) {
    %c0_i32 = arith.constant 0 : i32
    %c0_i32_0 = arith.constant 0 : i32
    return %arg0, %arg1, %c0_i32 : i32, i32, i32
  }
  func.func @transform_1(%arg0: i32, %arg1: i32) -> (i32, i32) {
    %c0_i32 = arith.constant 0 : i32
    %c0_i32_0 = arith.constant 0 : i32
    %c0_i32_1 = arith.constant 0 : i32
    return %c0_i32, %c0_i32_0 : i32, i32
  }
  func.func @transform_2(%arg0: i32, %arg1: i32) -> (i32, i32) {
    %c0_i32 = arith.constant 0 : i32
    %c0_i32_0 = arith.constant 0 : i32
    %c0_i32_1 = arith.constant 0 : i32
    return %c0_i32, %c0_i32_0 : i32, i32
  }
  func.func @transform_3(%arg0: i32, %arg1: i32) -> (i32, i32) {
    %c0_i32 = arith.constant 0 : i32
    %c0_i32_0 = arith.constant 0 : i32
    %c0_i32_1 = arith.constant 0 : i32
    return %c0_i32, %c0_i32_0 : i32, i32
  }
  func.func @transform_4(%arg0: i32, %arg1: i32) -> (i32, i32, i32) {
    %c0_i32 = arith.constant 0 : i32
    %c0_i32_0 = arith.constant 0 : i32
    return %arg0, %arg1, %c0_i32 : i32, i32, i32
  }
}

module attributes {stable_mosaic.version = 11 : i64} {
  func.func @kernel(%arg0: i32, %arg1: i32, %arg2: memref<1x128x216xbf16, #tpu.memory_space<vmem>>, %arg3: memref<216x24xbf16, #tpu.memory_space<vmem>>, %arg4: memref<1x24xf32, #tpu.memory_space<vmem>>, %arg5: memref<1x24xf32, #tpu.memory_space<vmem>>, %arg6: memref<1x128x24xbf16, #tpu.memory_space<vmem>>) attributes {dimension_semantics = [#tpu.dimension_semantics<parallel>, #tpu.dimension_semantics<parallel>], iteration_bounds = array<i64: 1, 1>, scalar_prefetch = 0 : i64, scratch_operands = 0 : i64, tpu.core_type = #tpu.core_type<tc>, window_params = [{transform_indices = @transform_0, window_bounds = array<i64: 1, 128, 216>}, {pipeline_mode = #tpu.pipeline_mode<synchronous>, transform_indices = @transform_1, window_bounds = array<i64: 216, 24>}, {pipeline_mode = #tpu.pipeline_mode<synchronous>, transform_indices = @transform_2, window_bounds = array<i64: 1, 24>}, {pipeline_mode = #tpu.pipeline_mode<synchronous>, transform_indices = @transform_3, window_bounds = array<i64: 1, 24>}, {transform_indices = @transform_4, window_bounds = array<i64: 1, 128, 24>}]} {
    %c0 = arith.constant 0 : index
    %c0_0 = arith.constant 0 : index
    %c0_1 = arith.constant 0 : index
    %0 = vector.load %arg2[%c0, %c0_0, %c0_1] : memref<1x128x216xbf16, #tpu.memory_space<vmem>>, vector<1x128x216xbf16>
    %1 = vector.shape_cast %0 : vector<1x128x216xbf16> to vector<128x216xbf16>
    %c0_2 = arith.constant 0 : index
    %c0_3 = arith.constant 0 : index
    %2 = vector.load %arg3[%c0_2, %c0_3] : memref<216x24xbf16, #tpu.memory_space<vmem>>, vector<216x24xbf16>
    %cst = arith.constant dense<0.000000e+00> : vector<128x24xf32>
    %3 = tpu.matmul %1, %2, %cst {dimension_numbers = #tpu.dot_dimension_numbers<[1], [0], [0], [1], [0, 0, 1, 1], [], []>} : vector<128x216xbf16>, vector<216x24xbf16>, vector<128x24xf32> -> vector<128x24xf32>
    %c0_4 = arith.constant 0 : index
    %c0_5 = arith.constant 0 : index
    %4 = vector.load %arg4[%c0_4, %c0_5] : memref<1x24xf32, #tpu.memory_space<vmem>>, vector<1x24xf32>
    %5 = vector.broadcast %4 : vector<1x24xf32> to vector<128x24xf32>
    %6 = arith.mulf %3, %5 : vector<128x24xf32>
    %c0_6 = arith.constant 0 : index
    %c0_7 = arith.constant 0 : index
    %7 = vector.load %arg5[%c0_6, %c0_7] : memref<1x24xf32, #tpu.memory_space<vmem>>, vector<1x24xf32>
    %8 = vector.broadcast %7 : vector<1x24xf32> to vector<128x24xf32>
    %9 = arith.addf %6, %8 : vector<128x24xf32>
    %10 = arith.negf %9 : vector<128x24xf32>
    %11 = math.exp %10 : vector<128x24xf32>
    %cst_8 = arith.constant 1.000000e+00 : f32
    %12 = vector.broadcast %cst_8 : f32 to vector<128x24xf32>
    %13 = arith.addf %12, %11 : vector<128x24xf32>
    %14 = arith.divf %12, %13 : vector<128x24xf32>
    %15 = arith.mulf %9, %14 : vector<128x24xf32>
    %16 = arith.truncf %15 : vector<128x24xf32> to vector<128x24xbf16>
    %c0_9 = arith.constant 0 : index
    %c0_10 = arith.constant 0 : index
    %c0_11 = arith.constant 0 : index
    %17 = vector.load %arg6[%c0_9, %c0_10, %c0_11] : memref<1x128x24xbf16, #tpu.memory_space<vmem>>, vector<1x128x24xbf16>
    %18 = vector.shape_cast %17 : vector<1x128x24xbf16> to vector<128x24xbf16>
    %19 = vector.shape_cast %16 : vector<128x24xbf16> to vector<1x128x24xbf16>
    tpu.vector_store %arg6[%c0_9, %c0_10, %c0_11], %19 {strides = array<i32>} : memref<1x128x24xbf16, #tpu.memory_space<vmem>>, vector<1x128x24xbf16>,
    return
  }
  func.func @transform_0(%arg0: i32, %arg1: i32) -> (i32, i32, i32) {
    %c0_i32 = arith.constant 0 : i32
    %c0_i32_0 = arith.constant 0 : i32
    return %arg0, %arg1, %c0_i32 : i32, i32, i32
  }
  func.func @transform_1(%arg0: i32, %arg1: i32) -> (i32, i32) {
    %c0_i32 = arith.constant 0 : i32
    %c0_i32_0 = arith.constant 0 : i32
    %c0_i32_1 = arith.constant 0 : i32
    return %c0_i32, %c0_i32_0 : i32, i32
  }
  func.func @transform_2(%arg0: i32, %arg1: i32) -> (i32, i32) {
    %c0_i32 = arith.constant 0 : i32
    %c0_i32_0 = arith.constant 0 : i32
    %c0_i32_1 = arith.constant 0 : i32
    return %c0_i32, %c0_i32_0 : i32, i32
  }
  func.func @transform_3(%arg0: i32, %arg1: i32) -> (i32, i32) {
    %c0_i32 = arith.constant 0 : i32
    %c0_i32_0 = arith.constant 0 : i32
    %c0_i32_1 = arith.constant 0 : i32
    return %c0_i32, %c0_i32_0 : i32, i32
  }
  func.func @transform_4(%arg0: i32, %arg1: i32) -> (i32, i32, i32) {
    %c0_i32 = arith.constant 0 : i32
    %c0_i32_0 = arith.constant 0 : i32
    return %arg0, %arg1, %c0_i32 : i32, i32, i32
  }
}

module attributes {stable_mosaic.version = 11 : i64} {
  func.func @kernel(%arg0: i32, %arg1: i32, %arg2: memref<1x128x24xbf16, #tpu.memory_space<vmem>>, %arg3: memref<24x16xbf16, #tpu.memory_space<vmem>>, %arg4: memref<1x16xf32, #tpu.memory_space<vmem>>, %arg5: memref<1x16xf32, #tpu.memory_space<vmem>>, %arg6: memref<1x128x16xbf16, #tpu.memory_space<vmem>>) attributes {dimension_semantics = [#tpu.dimension_semantics<parallel>, #tpu.dimension_semantics<parallel>], iteration_bounds = array<i64: 1, 1>, scalar_prefetch = 0 : i64, scratch_operands = 0 : i64, tpu.core_type = #tpu.core_type<tc>, window_params = [{transform_indices = @transform_0, window_bounds = array<i64: 1, 128, 24>}, {pipeline_mode = #tpu.pipeline_mode<synchronous>, transform_indices = @transform_1, window_bounds = array<i64: 24, 16>}, {pipeline_mode = #tpu.pipeline_mode<synchronous>, transform_indices = @transform_2, window_bounds = array<i64: 1, 16>}, {pipeline_mode = #tpu.pipeline_mode<synchronous>, transform_indices = @transform_3, window_bounds = array<i64: 1, 16>}, {transform_indices = @transform_4, window_bounds = array<i64: 1, 128, 16>}]} {
    %c0 = arith.constant 0 : index
    %c0_0 = arith.constant 0 : index
    %c0_1 = arith.constant 0 : index
    %0 = vector.load %arg2[%c0, %c0_0, %c0_1] : memref<1x128x24xbf16, #tpu.memory_space<vmem>>, vector<1x128x24xbf16>
    %1 = vector.shape_cast %0 : vector<1x128x24xbf16> to vector<128x24xbf16>
    %c0_2 = arith.constant 0 : index
    %c0_3 = arith.constant 0 : index
    %2 = vector.load %arg3[%c0_2, %c0_3] : memref<24x16xbf16, #tpu.memory_space<vmem>>, vector<24x16xbf16>
    %cst = arith.constant dense<0.000000e+00> : vector<128x16xf32>
    %3 = tpu.matmul %1, %2, %cst {dimension_numbers = #tpu.dot_dimension_numbers<[1], [0], [0], [1], [0, 0, 1, 1], [], []>} : vector<128x24xbf16>, vector<24x16xbf16>, vector<128x16xf32> -> vector<128x16xf32>
    %c0_4 = arith.constant 0 : index
    %c0_5 = arith.constant 0 : index
    %4 = vector.load %arg4[%c0_4, %c0_5] : memref<1x16xf32, #tpu.memory_space<vmem>>, vector<1x16xf32>
    %5 = vector.broadcast %4 : vector<1x16xf32> to vector<128x16xf32>
    %6 = arith.mulf %3, %5 : vector<128x16xf32>
    %c0_6 = arith.constant 0 : index
    %c0_7 = arith.constant 0 : index
    %7 = vector.load %arg5[%c0_6, %c0_7] : memref<1x16xf32, #tpu.memory_space<vmem>>, vector<1x16xf32>
    %8 = vector.broadcast %7 : vector<1x16xf32> to vector<128x16xf32>
    %9 = arith.addf %6, %8 : vector<128x16xf32>
    %10 = arith.truncf %9 : vector<128x16xf32> to vector<128x16xbf16>
    %c0_8 = arith.constant 0 : index
    %c0_9 = arith.constant 0 : index
    %c0_10 = arith.constant 0 : index
    %11 = vector.load %arg6[%c0_8, %c0_9, %c0_10] : memref<1x128x16xbf16, #tpu.memory_space<vmem>>, vector<1x128x16xbf16>
    %12 = vector.shape_cast %11 : vector<1x128x16xbf16> to vector<128x16xbf16>
    %13 = vector.shape_cast %10 : vector<128x16xbf16> to vector<1x128x16xbf16>
    tpu.vector_store %arg6[%c0_8, %c0_9, %c0_10], %13 {strides = array<i32>} : memref<1x128x16xbf16, #tpu.memory_space<vmem>>, vector<1x128x16xbf16>,
    return
  }
  func.func @transform_0(%arg0: i32, %arg1: i32) -> (i32, i32, i32) {
    %c0_i32 = arith.constant 0 : i32
    %c0_i32_0 = arith.constant 0 : i32
    return %arg0, %arg1, %c0_i32 : i32, i32, i32
  }
  func.func @transform_1(%arg0: i32, %arg1: i32) -> (i32, i32) {
    %c0_i32 = arith.constant 0 : i32
    %c0_i32_0 = arith.constant 0 : i32
    %c0_i32_1 = arith.constant 0 : i32
    return %c0_i32, %c0_i32_0 : i32, i32
  }
  func.func @transform_2(%arg0: i32, %arg1: i32) -> (i32, i32) {
    %c0_i32 = arith.constant 0 : i32
    %c0_i32_0 = arith.constant 0 : i32
    %c0_i32_1 = arith.constant 0 : i32
    return %c0_i32, %c0_i32_0 : i32, i32
  }
  func.func @transform_3(%arg0: i32, %arg1: i32) -> (i32, i32) {
    %c0_i32 = arith.constant 0 : i32
    %c0_i32_0 = arith.constant 0 : i32
    %c0_i32_1 = arith.constant 0 : i32
    return %c0_i32, %c0_i32_0 : i32, i32
  }
  func.func @transform_4(%arg0: i32, %arg1: i32) -> (i32, i32, i32) {
    %c0_i32 = arith.constant 0 : i32
    %c0_i32_0 = arith.constant 0 : i32
    return %arg0, %arg1, %c0_i32 : i32, i32, i32
  }
}

module attributes {stable_mosaic.version = 11 : i64} {
  func.func @kernel(%arg0: i32, %arg1: i32, %arg2: memref<1x128x16xbf16, #tpu.memory_space<vmem>>, %arg3: memref<16x64xbf16, #tpu.memory_space<vmem>>, %arg4: memref<1x64xf32, #tpu.memory_space<vmem>>, %arg5: memref<1x64xf32, #tpu.memory_space<vmem>>, %arg6: memref<1x128x64xbf16, #tpu.memory_space<vmem>>) attributes {dimension_semantics = [#tpu.dimension_semantics<parallel>, #tpu.dimension_semantics<parallel>], iteration_bounds = array<i64: 1, 1>, scalar_prefetch = 0 : i64, scratch_operands = 0 : i64, tpu.core_type = #tpu.core_type<tc>, window_params = [{transform_indices = @transform_0, window_bounds = array<i64: 1, 128, 16>}, {pipeline_mode = #tpu.pipeline_mode<synchronous>, transform_indices = @transform_1, window_bounds = array<i64: 16, 64>}, {pipeline_mode = #tpu.pipeline_mode<synchronous>, transform_indices = @transform_2, window_bounds = array<i64: 1, 64>}, {pipeline_mode = #tpu.pipeline_mode<synchronous>, transform_indices = @transform_3, window_bounds = array<i64: 1, 64>}, {transform_indices = @transform_4, window_bounds = array<i64: 1, 128, 64>}]} {
    %c0 = arith.constant 0 : index
    %c0_0 = arith.constant 0 : index
    %c0_1 = arith.constant 0 : index
    %0 = vector.load %arg2[%c0, %c0_0, %c0_1] : memref<1x128x16xbf16, #tpu.memory_space<vmem>>, vector<1x128x16xbf16>
    %1 = vector.shape_cast %0 : vector<1x128x16xbf16> to vector<128x16xbf16>
    %c0_2 = arith.constant 0 : index
    %c0_3 = arith.constant 0 : index
    %2 = vector.load %arg3[%c0_2, %c0_3] : memref<16x64xbf16, #tpu.memory_space<vmem>>, vector<16x64xbf16>
    %cst = arith.constant dense<0.000000e+00> : vector<128x64xf32>
    %3 = tpu.matmul %1, %2, %cst {dimension_numbers = #tpu.dot_dimension_numbers<[1], [0], [0], [1], [0, 0, 1, 1], [], []>} : vector<128x16xbf16>, vector<16x64xbf16>, vector<128x64xf32> -> vector<128x64xf32>
    %c0_4 = arith.constant 0 : index
    %c0_5 = arith.constant 0 : index
    %4 = vector.load %arg4[%c0_4, %c0_5] : memref<1x64xf32, #tpu.memory_space<vmem>>, vector<1x64xf32>
    %5 = vector.broadcast %4 : vector<1x64xf32> to vector<128x64xf32>
    %6 = arith.mulf %3, %5 : vector<128x64xf32>
    %c0_6 = arith.constant 0 : index
    %c0_7 = arith.constant 0 : index
    %7 = vector.load %arg5[%c0_6, %c0_7] : memref<1x64xf32, #tpu.memory_space<vmem>>, vector<1x64xf32>
    %8 = vector.broadcast %7 : vector<1x64xf32> to vector<128x64xf32>
    %9 = arith.addf %6, %8 : vector<128x64xf32>
    %10 = arith.negf %9 : vector<128x64xf32>
    %11 = math.exp %10 : vector<128x64xf32>
    %cst_8 = arith.constant 1.000000e+00 : f32
    %12 = vector.broadcast %cst_8 : f32 to vector<128x64xf32>
    %13 = arith.addf %12, %11 : vector<128x64xf32>
    %14 = arith.divf %12, %13 : vector<128x64xf32>
    %15 = arith.mulf %9, %14 : vector<128x64xf32>
    %16 = arith.truncf %15 : vector<128x64xf32> to vector<128x64xbf16>
    %c0_9 = arith.constant 0 : index
    %c0_10 = arith.constant 0 : index
    %c0_11 = arith.constant 0 : index
    %17 = vector.load %arg6[%c0_9, %c0_10, %c0_11] : memref<1x128x64xbf16, #tpu.memory_space<vmem>>, vector<1x128x64xbf16>
    %18 = vector.shape_cast %17 : vector<1x128x64xbf16> to vector<128x64xbf16>
    %19 = vector.shape_cast %16 : vector<128x64xbf16> to vector<1x128x64xbf16>
    tpu.vector_store %arg6[%c0_9, %c0_10, %c0_11], %19 {strides = array<i32>} : memref<1x128x64xbf16, #tpu.memory_space<vmem>>, vector<1x128x64xbf16>,
    return
  }
  func.func @transform_0(%arg0: i32, %arg1: i32) -> (i32, i32, i32) {
    %c0_i32 = arith.constant 0 : i32
    %c0_i32_0 = arith.constant 0 : i32
    return %arg0, %arg1, %c0_i32 : i32, i32, i32
  }
  func.func @transform_1(%arg0: i32, %arg1: i32) -> (i32, i32) {
    %c0_i32 = arith.constant 0 : i32
    %c0_i32_0 = arith.constant 0 : i32
    %c0_i32_1 = arith.constant 0 : i32
    return %c0_i32, %c0_i32_0 : i32, i32
  }
  func.func @transform_2(%arg0: i32, %arg1: i32) -> (i32, i32) {
    %c0_i32 = arith.constant 0 : i32
    %c0_i32_0 = arith.constant 0 : i32
    %c0_i32_1 = arith.constant 0 : i32
    return %c0_i32, %c0_i32_0 : i32, i32
  }
  func.func @transform_3(%arg0: i32, %arg1: i32) -> (i32, i32) {
    %c0_i32 = arith.constant 0 : i32
    %c0_i32_0 = arith.constant 0 : i32
    %c0_i32_1 = arith.constant 0 : i32
    return %c0_i32, %c0_i32_0 : i32, i32
  }
  func.func @transform_4(%arg0: i32, %arg1: i32) -> (i32, i32, i32) {
    %c0_i32 = arith.constant 0 : i32
    %c0_i32_0 = arith.constant 0 : i32
    return %arg0, %arg1, %c0_i32 : i32, i32, i32
  }
}

module attributes {stable_mosaic.version = 11 : i64} {
  func.func @kernel(%arg0: i32, %arg1: i32, %arg2: memref<1x4x5x5x64xbf16, #tpu.memory_space<vmem>>, %arg3: memref<9x1x1x64xf32, #tpu.memory_space<vmem>>, %arg4: memref<1x1x64xf32, #tpu.memory_space<vmem>>, %arg5: memref<1x1x64xf32, #tpu.memory_space<vmem>>, %arg6: memref<1x4x4x64xbf16, #tpu.memory_space<vmem>>) attributes {dimension_semantics = [#tpu.dimension_semantics<parallel>, #tpu.dimension_semantics<parallel>], iteration_bounds = array<i64: 2, 1>, scalar_prefetch = 0 : i64, scratch_operands = 0 : i64, tpu.core_type = #tpu.core_type<tc>, window_params = [{transform_indices = @transform_0, window_bounds = array<i64: 1, 4, 5, 5, 64>}, {transform_indices = @transform_1, window_bounds = array<i64: 9, 1, 1, 64>}, {transform_indices = @transform_2, window_bounds = array<i64: 1, 1, 64>}, {transform_indices = @transform_3, window_bounds = array<i64: 1, 1, 64>}, {transform_indices = @transform_4, window_bounds = array<i64: 1, 4, 4, 64>}]} {
    %c0 = arith.constant 0 : index
    %c0_0 = arith.constant 0 : index
    %c0_1 = arith.constant 0 : index
    %c0_2 = arith.constant 0 : index
    %c0_3 = arith.constant 0 : index
    %0 = vector.load %arg2[%c0, %c0_0, %c0_1, %c0_2, %c0_3] : memref<1x4x5x5x64xbf16, #tpu.memory_space<vmem>>, vector<1x1x4x4x64xbf16>
    %1 = vector.shape_cast %0 : vector<1x1x4x4x64xbf16> to vector<4x4x64xbf16>
    %c0_4 = arith.constant 0 : index
    %c0_5 = arith.constant 0 : index
    %c0_6 = arith.constant 0 : index
    %c0_7 = arith.constant 0 : index
    %2 = vector.load %arg3[%c0_4, %c0_5, %c0_6, %c0_7] : memref<9x1x1x64xf32, #tpu.memory_space<vmem>>, vector<1x1x1x64xf32>
    %3 = vector.shape_cast %2 : vector<1x1x1x64xf32> to vector<1x1x64xf32>
    %4 = arith.extf %1 : vector<4x4x64xbf16> to vector<4x4x64xf32>
    %5 = vector.broadcast %3 : vector<1x1x64xf32> to vector<4x4x64xf32>
    %6 = arith.mulf %4, %5 : vector<4x4x64xf32>
    %c0_8 = arith.constant 0 : index
    %c1 = arith.constant 1 : index
    %c0_9 = arith.constant 0 : index
    %c0_10 = arith.constant 0 : index
    %c0_11 = arith.constant 0 : index
    %7 = vector.load %arg2[%c0_8, %c1, %c0_9, %c0_10, %c0_11] : memref<1x4x5x5x64xbf16, #tpu.memory_space<vmem>>, vector<1x1x4x4x64xbf16>
    %8 = vector.shape_cast %7 : vector<1x1x4x4x64xbf16> to vector<4x4x64xbf16>
    %c1_12 = arith.constant 1 : index
    %c0_13 = arith.constant 0 : index
    %c0_14 = arith.constant 0 : index
    %c0_15 = arith.constant 0 : index
    %9 = vector.load %arg3[%c1_12, %c0_13, %c0_14, %c0_15] : memref<9x1x1x64xf32, #tpu.memory_space<vmem>>, vector<1x1x1x64xf32>
    %10 = vector.shape_cast %9 : vector<1x1x1x64xf32> to vector<1x1x64xf32>
    %11 = arith.extf %8 : vector<4x4x64xbf16> to vector<4x4x64xf32>
    %12 = vector.broadcast %10 : vector<1x1x64xf32> to vector<4x4x64xf32>
    %13 = arith.mulf %11, %12 : vector<4x4x64xf32>
    %14 = arith.addf %6, %13 : vector<4x4x64xf32>
    %c0_16 = arith.constant 0 : index
    %c0_17 = arith.constant 0 : index
    %c0_18 = arith.constant 0 : index
    %c1_19 = arith.constant 1 : index
    %c0_20 = arith.constant 0 : index
    %15 = vector.load %arg2[%c0_16, %c0_17, %c0_18, %c1_19, %c0_20] : memref<1x4x5x5x64xbf16, #tpu.memory_space<vmem>>, vector<1x1x4x4x64xbf16>
    %16 = vector.shape_cast %15 : vector<1x1x4x4x64xbf16> to vector<4x4x64xbf16>
    %c2 = arith.constant 2 : index
    %c0_21 = arith.constant 0 : index
    %c0_22 = arith.constant 0 : index
    %c0_23 = arith.constant 0 : index
    %17 = vector.load %arg3[%c2, %c0_21, %c0_22, %c0_23] : memref<9x1x1x64xf32, #tpu.memory_space<vmem>>, vector<1x1x1x64xf32>
    %18 = vector.shape_cast %17 : vector<1x1x1x64xf32> to vector<1x1x64xf32>
    %19 = arith.extf %16 : vector<4x4x64xbf16> to vector<4x4x64xf32>
    %20 = vector.broadcast %18 : vector<1x1x64xf32> to vector<4x4x64xf32>
    %21 = arith.mulf %19, %20 : vector<4x4x64xf32>
    %22 = arith.addf %14, %21 : vector<4x4x64xf32>
    %c0_24 = arith.constant 0 : index
    %c2_25 = arith.constant 2 : index
    %c0_26 = arith.constant 0 : index
    %c0_27 = arith.constant 0 : index
    %c0_28 = arith.constant 0 : index
    %23 = vector.load %arg2[%c0_24, %c2_25, %c0_26, %c0_27, %c0_28] : memref<1x4x5x5x64xbf16, #tpu.memory_space<vmem>>, vector<1x1x4x4x64xbf16>
    %24 = vector.shape_cast %23 : vector<1x1x4x4x64xbf16> to vector<4x4x64xbf16>
    %c3 = arith.constant 3 : index
    %c0_29 = arith.constant 0 : index
    %c0_30 = arith.constant 0 : index
    %c0_31 = arith.constant 0 : index
    %25 = vector.load %arg3[%c3, %c0_29, %c0_30, %c0_31] : memref<9x1x1x64xf32, #tpu.memory_space<vmem>>, vector<1x1x1x64xf32>
    %26 = vector.shape_cast %25 : vector<1x1x1x64xf32> to vector<1x1x64xf32>
    %27 = arith.extf %24 : vector<4x4x64xbf16> to vector<4x4x64xf32>
    %28 = vector.broadcast %26 : vector<1x1x64xf32> to vector<4x4x64xf32>
    %29 = arith.mulf %27, %28 : vector<4x4x64xf32>
    %30 = arith.addf %22, %29 : vector<4x4x64xf32>
    %c0_32 = arith.constant 0 : index
    %c3_33 = arith.constant 3 : index
    %c0_34 = arith.constant 0 : index
    %c0_35 = arith.constant 0 : index
    %c0_36 = arith.constant 0 : index
    %31 = vector.load %arg2[%c0_32, %c3_33, %c0_34, %c0_35, %c0_36] : memref<1x4x5x5x64xbf16, #tpu.memory_space<vmem>>, vector<1x1x4x4x64xbf16>
    %32 = vector.shape_cast %31 : vector<1x1x4x4x64xbf16> to vector<4x4x64xbf16>
    %c4 = arith.constant 4 : index
    %c0_37 = arith.constant 0 : index
    %c0_38 = arith.constant 0 : index
    %c0_39 = arith.constant 0 : index
    %33 = vector.load %arg3[%c4, %c0_37, %c0_38, %c0_39] : memref<9x1x1x64xf32, #tpu.memory_space<vmem>>, vector<1x1x1x64xf32>
    %34 = vector.shape_cast %33 : vector<1x1x1x64xf32> to vector<1x1x64xf32>
    %35 = arith.extf %32 : vector<4x4x64xbf16> to vector<4x4x64xf32>
    %36 = vector.broadcast %34 : vector<1x1x64xf32> to vector<4x4x64xf32>
    %37 = arith.mulf %35, %36 : vector<4x4x64xf32>
    %38 = arith.addf %30, %37 : vector<4x4x64xf32>
    %c0_40 = arith.constant 0 : index
    %c2_41 = arith.constant 2 : index
    %c0_42 = arith.constant 0 : index
    %c1_43 = arith.constant 1 : index
    %c0_44 = arith.constant 0 : index
    %39 = vector.load %arg2[%c0_40, %c2_41, %c0_42, %c1_43, %c0_44] : memref<1x4x5x5x64xbf16, #tpu.memory_space<vmem>>, vector<1x1x4x4x64xbf16>
    %40 = vector.shape_cast %39 : vector<1x1x4x4x64xbf16> to vector<4x4x64xbf16>
    %c5 = arith.constant 5 : index
    %c0_45 = arith.constant 0 : index
    %c0_46 = arith.constant 0 : index
    %c0_47 = arith.constant 0 : index
    %41 = vector.load %arg3[%c5, %c0_45, %c0_46, %c0_47] : memref<9x1x1x64xf32, #tpu.memory_space<vmem>>, vector<1x1x1x64xf32>
    %42 = vector.shape_cast %41 : vector<1x1x1x64xf32> to vector<1x1x64xf32>
    %43 = arith.extf %40 : vector<4x4x64xbf16> to vector<4x4x64xf32>
    %44 = vector.broadcast %42 : vector<1x1x64xf32> to vector<4x4x64xf32>
    %45 = arith.mulf %43, %44 : vector<4x4x64xf32>
    %46 = arith.addf %38, %45 : vector<4x4x64xf32>
    %c0_48 = arith.constant 0 : index
    %c0_49 = arith.constant 0 : index
    %c1_50 = arith.constant 1 : index
    %c0_51 = arith.constant 0 : index
    %c0_52 = arith.constant 0 : index
    %47 = vector.load %arg2[%c0_48, %c0_49, %c1_50, %c0_51, %c0_52] : memref<1x4x5x5x64xbf16, #tpu.memory_space<vmem>>, vector<1x1x4x4x64xbf16>
    %48 = vector.shape_cast %47 : vector<1x1x4x4x64xbf16> to vector<4x4x64xbf16>
    %c6 = arith.constant 6 : index
    %c0_53 = arith.constant 0 : index
    %c0_54 = arith.constant 0 : index
    %c0_55 = arith.constant 0 : index
    %49 = vector.load %arg3[%c6, %c0_53, %c0_54, %c0_55] : memref<9x1x1x64xf32, #tpu.memory_space<vmem>>, vector<1x1x1x64xf32>
    %50 = vector.shape_cast %49 : vector<1x1x1x64xf32> to vector<1x1x64xf32>
    %51 = arith.extf %48 : vector<4x4x64xbf16> to vector<4x4x64xf32>
    %52 = vector.broadcast %50 : vector<1x1x64xf32> to vector<4x4x64xf32>
    %53 = arith.mulf %51, %52 : vector<4x4x64xf32>
    %54 = arith.addf %46, %53 : vector<4x4x64xf32>
    %c0_56 = arith.constant 0 : index
    %c1_57 = arith.constant 1 : index
    %c1_58 = arith.constant 1 : index
    %c0_59 = arith.constant 0 : index
    %c0_60 = arith.constant 0 : index
    %55 = vector.load %arg2[%c0_56, %c1_57, %c1_58, %c0_59, %c0_60] : memref<1x4x5x5x64xbf16, #tpu.memory_space<vmem>>, vector<1x1x4x4x64xbf16>
    %56 = vector.shape_cast %55 : vector<1x1x4x4x64xbf16> to vector<4x4x64xbf16>
    %c7 = arith.constant 7 : index
    %c0_61 = arith.constant 0 : index
    %c0_62 = arith.constant 0 : index
    %c0_63 = arith.constant 0 : index
    %57 = vector.load %arg3[%c7, %c0_61, %c0_62, %c0_63] : memref<9x1x1x64xf32, #tpu.memory_space<vmem>>, vector<1x1x1x64xf32>
    %58 = vector.shape_cast %57 : vector<1x1x1x64xf32> to vector<1x1x64xf32>
    %59 = arith.extf %56 : vector<4x4x64xbf16> to vector<4x4x64xf32>
    %60 = vector.broadcast %58 : vector<1x1x64xf32> to vector<4x4x64xf32>
    %61 = arith.mulf %59, %60 : vector<4x4x64xf32>
    %62 = arith.addf %54, %61 : vector<4x4x64xf32>
    %c0_64 = arith.constant 0 : index
    %c0_65 = arith.constant 0 : index
    %c1_66 = arith.constant 1 : index
    %c1_67 = arith.constant 1 : index
    %c0_68 = arith.constant 0 : index
    %63 = vector.load %arg2[%c0_64, %c0_65, %c1_66, %c1_67, %c0_68] : memref<1x4x5x5x64xbf16, #tpu.memory_space<vmem>>, vector<1x1x4x4x64xbf16>
    %64 = vector.shape_cast %63 : vector<1x1x4x4x64xbf16> to vector<4x4x64xbf16>
    %c8 = arith.constant 8 : index
    %c0_69 = arith.constant 0 : index
    %c0_70 = arith.constant 0 : index
    %c0_71 = arith.constant 0 : index
    %65 = vector.load %arg3[%c8, %c0_69, %c0_70, %c0_71] : memref<9x1x1x64xf32, #tpu.memory_space<vmem>>, vector<1x1x1x64xf32>
    %66 = vector.shape_cast %65 : vector<1x1x1x64xf32> to vector<1x1x64xf32>
    %67 = arith.extf %64 : vector<4x4x64xbf16> to vector<4x4x64xf32>
    %68 = vector.broadcast %66 : vector<1x1x64xf32> to vector<4x4x64xf32>
    %69 = arith.mulf %67, %68 : vector<4x4x64xf32>
    %70 = arith.addf %62, %69 : vector<4x4x64xf32>
    %c0_72 = arith.constant 0 : index
    %c0_73 = arith.constant 0 : index
    %c0_74 = arith.constant 0 : index
    %71 = vector.load %arg4[%c0_72, %c0_73, %c0_74] : memref<1x1x64xf32, #tpu.memory_space<vmem>>, vector<1x1x64xf32>
    %72 = vector.broadcast %71 : vector<1x1x64xf32> to vector<4x4x64xf32>
    %73 = arith.mulf %70, %72 : vector<4x4x64xf32>
    %c0_75 = arith.constant 0 : index
    %c0_76 = arith.constant 0 : index
    %c0_77 = arith.constant 0 : index
    %74 = vector.load %arg5[%c0_75, %c0_76, %c0_77] : memref<1x1x64xf32, #tpu.memory_space<vmem>>, vector<1x1x64xf32>
    %75 = vector.broadcast %74 : vector<1x1x64xf32> to vector<4x4x64xf32>
    %76 = arith.addf %73, %75 : vector<4x4x64xf32>
    %77 = arith.negf %76 : vector<4x4x64xf32>
    %78 = math.exp %77 : vector<4x4x64xf32>
    %cst = arith.constant 1.000000e+00 : f32
    %79 = vector.broadcast %cst : f32 to vector<4x4x64xf32>
    %80 = arith.addf %79, %78 : vector<4x4x64xf32>
    %81 = arith.divf %79, %80 : vector<4x4x64xf32>
    %82 = arith.mulf %76, %81 : vector<4x4x64xf32>
    %83 = arith.truncf %82 : vector<4x4x64xf32> to vector<4x4x64xbf16>
    %c0_78 = arith.constant 0 : index
    %c0_79 = arith.constant 0 : index
    %c0_80 = arith.constant 0 : index
    %c0_81 = arith.constant 0 : index
    %84 = vector.load %arg6[%c0_78, %c0_79, %c0_80, %c0_81] : memref<1x4x4x64xbf16, #tpu.memory_space<vmem>>, vector<1x4x4x64xbf16>
    %85 = vector.shape_cast %84 : vector<1x4x4x64xbf16> to vector<4x4x64xbf16>
    %86 = vector.shape_cast %83 : vector<4x4x64xbf16> to vector<1x4x4x64xbf16>
    tpu.vector_store %arg6[%c0_78, %c0_79, %c0_80, %c0_81], %86 {strides = array<i32>} : memref<1x4x4x64xbf16, #tpu.memory_space<vmem>>, vector<1x4x4x64xbf16>,
    return
  }
  func.func @transform_0(%arg0: i32, %arg1: i32) -> (i32, i32, i32, i32, i32) {
    %c0_i32 = arith.constant 0 : i32
    %c0_i32_0 = arith.constant 0 : i32
    %c0_i32_1 = arith.constant 0 : i32
    %c0_i32_2 = arith.constant 0 : i32
    return %arg0, %c0_i32, %c0_i32_0, %c0_i32_1, %arg1 : i32, i32, i32, i32, i32
  }
  func.func @transform_1(%arg0: i32, %arg1: i32) -> (i32, i32, i32, i32) {
    %c0_i32 = arith.constant 0 : i32
    %c0_i32_0 = arith.constant 0 : i32
    %c0_i32_1 = arith.constant 0 : i32
    %c0_i32_2 = arith.constant 0 : i32
    return %c0_i32, %c0_i32_0, %c0_i32_1, %arg1 : i32, i32, i32, i32
  }
  func.func @transform_2(%arg0: i32, %arg1: i32) -> (i32, i32, i32) {
    %c0_i32 = arith.constant 0 : i32
    %c0_i32_0 = arith.constant 0 : i32
    %c0_i32_1 = arith.constant 0 : i32
    return %c0_i32, %c0_i32_0, %arg1 : i32, i32, i32
  }
  func.func @transform_3(%arg0: i32, %arg1: i32) -> (i32, i32, i32) {
    %c0_i32 = arith.constant 0 : i32
    %c0_i32_0 = arith.constant 0 : i32
    %c0_i32_1 = arith.constant 0 : i32
    return %c0_i32, %c0_i32_0, %arg1 : i32, i32, i32
  }
  func.func @transform_4(%arg0: i32, %arg1: i32) -> (i32, i32, i32, i32) {
    %c0_i32 = arith.constant 0 : i32
    %c0_i32_0 = arith.constant 0 : i32
    %c0_i32_1 = arith.constant 0 : i32
    return %arg0, %c0_i32, %c0_i32_0, %arg1 : i32, i32, i32, i32
  }
}

module attributes {stable_mosaic.version = 11 : i64} {
  func.func @kernel(%arg0: i32, %arg1: i32, %arg2: memref<1x16x64xbf16, #tpu.memory_space<vmem>>, %arg3: memref<64x24xbf16, #tpu.memory_space<vmem>>, %arg4: memref<1x24xf32, #tpu.memory_space<vmem>>, %arg5: memref<1x24xf32, #tpu.memory_space<vmem>>, %arg6: memref<1x1x64xf32, #tpu.memory_space<vmem>>, %arg7: memref<1x16x24xbf16, #tpu.memory_space<vmem>>) attributes {dimension_semantics = [#tpu.dimension_semantics<parallel>, #tpu.dimension_semantics<parallel>], iteration_bounds = array<i64: 2, 1>, scalar_prefetch = 0 : i64, scratch_operands = 0 : i64, tpu.core_type = #tpu.core_type<tc>, window_params = [{transform_indices = @transform_0, window_bounds = array<i64: 1, 16, 64>}, {pipeline_mode = #tpu.pipeline_mode<synchronous>, transform_indices = @transform_1, window_bounds = array<i64: 64, 24>}, {pipeline_mode = #tpu.pipeline_mode<synchronous>, transform_indices = @transform_2, window_bounds = array<i64: 1, 24>}, {pipeline_mode = #tpu.pipeline_mode<synchronous>, transform_indices = @transform_3, window_bounds = array<i64: 1, 24>}, {transform_indices = @transform_4, window_bounds = array<i64: 1, 1, 64>}, {transform_indices = @transform_5, window_bounds = array<i64: 1, 16, 24>}]} {
    %c0 = arith.constant 0 : index
    %c0_0 = arith.constant 0 : index
    %c0_1 = arith.constant 0 : index
    %0 = vector.load %arg2[%c0, %c0_0, %c0_1] : memref<1x16x64xbf16, #tpu.memory_space<vmem>>, vector<1x16x64xbf16>
    %1 = vector.shape_cast %0 : vector<1x16x64xbf16> to vector<16x64xbf16>
    %2 = arith.extf %1 : vector<16x64xbf16> to vector<16x64xf32>
    %c0_2 = arith.constant 0 : index
    %c0_3 = arith.constant 0 : index
    %c0_4 = arith.constant 0 : index
    %3 = vector.load %arg6[%c0_2, %c0_3, %c0_4] : memref<1x1x64xf32, #tpu.memory_space<vmem>>, vector<1x1x64xf32>
    %4 = vector.shape_cast %3 : vector<1x1x64xf32> to vector<1x64xf32>
    %5 = vector.broadcast %4 : vector<1x64xf32> to vector<16x64xf32>
    %6 = arith.mulf %2, %5 : vector<16x64xf32>
    %7 = arith.truncf %6 : vector<16x64xf32> to vector<16x64xbf16>
    %c0_5 = arith.constant 0 : index
    %c0_6 = arith.constant 0 : index
    %8 = vector.load %arg3[%c0_5, %c0_6] : memref<64x24xbf16, #tpu.memory_space<vmem>>, vector<64x24xbf16>
    %cst = arith.constant dense<0.000000e+00> : vector<16x24xf32>
    %9 = tpu.matmul %7, %8, %cst {dimension_numbers = #tpu.dot_dimension_numbers<[1], [0], [0], [1], [0, 0, 1, 1], [], []>} : vector<16x64xbf16>, vector<64x24xbf16>, vector<16x24xf32> -> vector<16x24xf32>
    %c0_7 = arith.constant 0 : index
    %c0_8 = arith.constant 0 : index
    %10 = vector.load %arg4[%c0_7, %c0_8] : memref<1x24xf32, #tpu.memory_space<vmem>>, vector<1x24xf32>
    %11 = vector.broadcast %10 : vector<1x24xf32> to vector<16x24xf32>
    %12 = arith.mulf %9, %11 : vector<16x24xf32>
    %c0_9 = arith.constant 0 : index
    %c0_10 = arith.constant 0 : index
    %13 = vector.load %arg5[%c0_9, %c0_10] : memref<1x24xf32, #tpu.memory_space<vmem>>, vector<1x24xf32>
    %14 = vector.broadcast %13 : vector<1x24xf32> to vector<16x24xf32>
    %15 = arith.addf %12, %14 : vector<16x24xf32>
    %16 = arith.truncf %15 : vector<16x24xf32> to vector<16x24xbf16>
    %c0_11 = arith.constant 0 : index
    %c0_12 = arith.constant 0 : index
    %c0_13 = arith.constant 0 : index
    %17 = vector.load %arg7[%c0_11, %c0_12, %c0_13] : memref<1x16x24xbf16, #tpu.memory_space<vmem>>, vector<1x16x24xbf16>
    %18 = vector.shape_cast %17 : vector<1x16x24xbf16> to vector<16x24xbf16>
    %19 = vector.shape_cast %16 : vector<16x24xbf16> to vector<1x16x24xbf16>
    tpu.vector_store %arg7[%c0_11, %c0_12, %c0_13], %19 {strides = array<i32>} : memref<1x16x24xbf16, #tpu.memory_space<vmem>>, vector<1x16x24xbf16>,
    return
  }
  func.func @transform_0(%arg0: i32, %arg1: i32) -> (i32, i32, i32) {
    %c0_i32 = arith.constant 0 : i32
    %c0_i32_0 = arith.constant 0 : i32
    return %arg0, %arg1, %c0_i32 : i32, i32, i32
  }
  func.func @transform_1(%arg0: i32, %arg1: i32) -> (i32, i32) {
    %c0_i32 = arith.constant 0 : i32
    %c0_i32_0 = arith.constant 0 : i32
    %c0_i32_1 = arith.constant 0 : i32
    return %c0_i32, %c0_i32_0 : i32, i32
  }
  func.func @transform_2(%arg0: i32, %arg1: i32) -> (i32, i32) {
    %c0_i32 = arith.constant 0 : i32
    %c0_i32_0 = arith.constant 0 : i32
    %c0_i32_1 = arith.constant 0 : i32
    return %c0_i32, %c0_i32_0 : i32, i32
  }
  func.func @transform_3(%arg0: i32, %arg1: i32) -> (i32, i32) {
    %c0_i32 = arith.constant 0 : i32
    %c0_i32_0 = arith.constant 0 : i32
    %c0_i32_1 = arith.constant 0 : i32
    return %c0_i32, %c0_i32_0 : i32, i32
  }
  func.func @transform_4(%arg0: i32, %arg1: i32) -> (i32, i32, i32) {
    %c0_i32 = arith.constant 0 : i32
    %c0_i32_0 = arith.constant 0 : i32
    %c0_i32_1 = arith.constant 0 : i32
    return %arg0, %c0_i32, %c0_i32_0 : i32, i32, i32
  }
  func.func @transform_5(%arg0: i32, %arg1: i32) -> (i32, i32, i32) {
    %c0_i32 = arith.constant 0 : i32
    %c0_i32_0 = arith.constant 0 : i32
    return %arg0, %arg1, %c0_i32 : i32, i32, i32
  }
}

module attributes {stable_mosaic.version = 11 : i64} {
  func.func @_se_kernel(%arg0: i32, %arg1: memref<1x16x64xbf16, #tpu.memory_space<vmem>>, %arg2: memref<64x8xbf16, #tpu.memory_space<vmem>>, %arg3: memref<1x8xf32, #tpu.memory_space<vmem>>, %arg4: memref<8x64xbf16, #tpu.memory_space<vmem>>, %arg5: memref<1x64xf32, #tpu.memory_space<vmem>>, %arg6: memref<1x1x64xf32, #tpu.memory_space<vmem>>) attributes {dimension_semantics = [#tpu.dimension_semantics<parallel>], iteration_bounds = array<i64: 2>, scalar_prefetch = 0 : i64, scratch_operands = 0 : i64, tpu.core_type = #tpu.core_type<tc>, window_params = [{transform_indices = @transform_0, window_bounds = array<i64: 1, 16, 64>}, {pipeline_mode = #tpu.pipeline_mode<synchronous>, transform_indices = @transform_1, window_bounds = array<i64: 64, 8>}, {pipeline_mode = #tpu.pipeline_mode<synchronous>, transform_indices = @transform_2, window_bounds = array<i64: 1, 8>}, {pipeline_mode = #tpu.pipeline_mode<synchronous>, transform_indices = @transform_3, window_bounds = array<i64: 8, 64>}, {pipeline_mode = #tpu.pipeline_mode<synchronous>, transform_indices = @transform_4, window_bounds = array<i64: 1, 64>}, {transform_indices = @transform_5, window_bounds = array<i64: 1, 1, 64>}]} {
    %c0 = arith.constant 0 : index
    %c0_0 = arith.constant 0 : index
    %c0_1 = arith.constant 0 : index
    %0 = vector.load %arg1[%c0, %c0_0, %c0_1] : memref<1x16x64xbf16, #tpu.memory_space<vmem>>, vector<1x16x64xbf16>
    %1 = vector.shape_cast %0 : vector<1x16x64xbf16> to vector<16x64xbf16>
    %2 = arith.extf %1 : vector<16x64xbf16> to vector<16x64xf32>
    %cst = arith.constant dense<0.000000e+00> : vector<64xf32>
    %3 = vector.multi_reduction <add>, %2, %cst [0] : vector<16x64xf32> to vector<64xf32>
    %4 = vector.shape_cast %3 : vector<64xf32> to vector<1x64xf32>
    %cst_2 = arith.constant 6.250000e-02 : f32
    %5 = vector.broadcast %cst_2 : f32 to vector<1x64xf32>
    %6 = arith.mulf %4, %5 : vector<1x64xf32>
    %7 = arith.truncf %6 : vector<1x64xf32> to vector<1x64xbf16>
    %c0_3 = arith.constant 0 : index
    %c0_4 = arith.constant 0 : index
    %8 = vector.load %arg2[%c0_3, %c0_4] : memref<64x8xbf16, #tpu.memory_space<vmem>>, vector<64x8xbf16>
    %cst_5 = arith.constant dense<0.000000e+00> : vector<1x8xf32>
    %9 = tpu.matmul %7, %8, %cst_5 {dimension_numbers = #tpu.dot_dimension_numbers<[1], [0], [0], [1], [0, 0, 1, 1], [], []>} : vector<1x64xbf16>, vector<64x8xbf16>, vector<1x8xf32> -> vector<1x8xf32>
    %c0_6 = arith.constant 0 : index
    %c0_7 = arith.constant 0 : index
    %10 = vector.load %arg3[%c0_6, %c0_7] : memref<1x8xf32, #tpu.memory_space<vmem>>, vector<1x8xf32>
    %11 = arith.addf %9, %10 : vector<1x8xf32>
    %12 = arith.negf %11 : vector<1x8xf32>
    %13 = math.exp %12 : vector<1x8xf32>
    %cst_8 = arith.constant 1.000000e+00 : f32
    %14 = vector.broadcast %cst_8 : f32 to vector<1x8xf32>
    %15 = arith.addf %14, %13 : vector<1x8xf32>
    %16 = arith.divf %14, %15 : vector<1x8xf32>
    %17 = arith.mulf %11, %16 : vector<1x8xf32>
    %18 = arith.truncf %17 : vector<1x8xf32> to vector<1x8xbf16>
    %c0_9 = arith.constant 0 : index
    %c0_10 = arith.constant 0 : index
    %19 = vector.load %arg4[%c0_9, %c0_10] : memref<8x64xbf16, #tpu.memory_space<vmem>>, vector<8x64xbf16>
    %cst_11 = arith.constant dense<0.000000e+00> : vector<1x64xf32>
    %20 = tpu.matmul %18, %19, %cst_11 {dimension_numbers = #tpu.dot_dimension_numbers<[1], [0], [0], [1], [0, 0, 1, 1], [], []>} : vector<1x8xbf16>, vector<8x64xbf16>, vector<1x64xf32> -> vector<1x64xf32>
    %c0_12 = arith.constant 0 : index
    %c0_13 = arith.constant 0 : index
    %21 = vector.load %arg5[%c0_12, %c0_13] : memref<1x64xf32, #tpu.memory_space<vmem>>, vector<1x64xf32>
    %22 = arith.addf %20, %21 : vector<1x64xf32>
    %23 = arith.negf %22 : vector<1x64xf32>
    %24 = math.exp %23 : vector<1x64xf32>
    %cst_14 = arith.constant 1.000000e+00 : f32
    %25 = vector.broadcast %cst_14 : f32 to vector<1x64xf32>
    %26 = arith.addf %25, %24 : vector<1x64xf32>
    %27 = arith.divf %25, %26 : vector<1x64xf32>
    %c0_15 = arith.constant 0 : index
    %c0_16 = arith.constant 0 : index
    %c0_17 = arith.constant 0 : index
    %28 = vector.load %arg6[%c0_15, %c0_16, %c0_17] : memref<1x1x64xf32, #tpu.memory_space<vmem>>, vector<1x1x64xf32>
    %29 = vector.shape_cast %28 : vector<1x1x64xf32> to vector<1x64xf32>
    %30 = vector.shape_cast %27 : vector<1x64xf32> to vector<1x1x64xf32>
    tpu.vector_store %arg6[%c0_15, %c0_16, %c0_17], %30 {strides = array<i32>} : memref<1x1x64xf32, #tpu.memory_space<vmem>>, vector<1x1x64xf32>,
    return
  }
  func.func @transform_0(%arg0: i32) -> (i32, i32, i32) {
    %c0_i32 = arith.constant 0 : i32
    %c0_i32_0 = arith.constant 0 : i32
    %c0_i32_1 = arith.constant 0 : i32
    return %arg0, %c0_i32, %c0_i32_0 : i32, i32, i32
  }
  func.func @transform_1(%arg0: i32) -> (i32, i32) {
    %c0_i32 = arith.constant 0 : i32
    %c0_i32_0 = arith.constant 0 : i32
    %c0_i32_1 = arith.constant 0 : i32
    return %c0_i32, %c0_i32_0 : i32, i32
  }
  func.func @transform_2(%arg0: i32) -> (i32, i32) {
    %c0_i32 = arith.constant 0 : i32
    %c0_i32_0 = arith.constant 0 : i32
    %c0_i32_1 = arith.constant 0 : i32
    return %c0_i32, %c0_i32_0 : i32, i32
  }
  func.func @transform_3(%arg0: i32) -> (i32, i32) {
    %c0_i32 = arith.constant 0 : i32
    %c0_i32_0 = arith.constant 0 : i32
    %c0_i32_1 = arith.constant 0 : i32
    return %c0_i32, %c0_i32_0 : i32, i32
  }
  func.func @transform_4(%arg0: i32) -> (i32, i32) {
    %c0_i32 = arith.constant 0 : i32
    %c0_i32_0 = arith.constant 0 : i32
    %c0_i32_1 = arith.constant 0 : i32
    return %c0_i32, %c0_i32_0 : i32, i32
  }
  func.func @transform_5(%arg0: i32) -> (i32, i32, i32) {
    %c0_i32 = arith.constant 0 : i32
    %c0_i32_0 = arith.constant 0 : i32
    %c0_i32_1 = arith.constant 0 : i32
    return %arg0, %c0_i32, %c0_i32_0 : i32, i32, i32
  }
}

module attributes {stable_mosaic.version = 11 : i64} {
  func.func @kernel(%arg0: i32, %arg1: i32, %arg2: memref<1x32x24xbf16, #tpu.memory_space<vmem>>, %arg3: memref<24x96xbf16, #tpu.memory_space<vmem>>, %arg4: memref<1x96xf32, #tpu.memory_space<vmem>>, %arg5: memref<1x96xf32, #tpu.memory_space<vmem>>, %arg6: memref<1x32x96xbf16, #tpu.memory_space<vmem>>) attributes {dimension_semantics = [#tpu.dimension_semantics<parallel>, #tpu.dimension_semantics<parallel>], iteration_bounds = array<i64: 1, 1>, scalar_prefetch = 0 : i64, scratch_operands = 0 : i64, tpu.core_type = #tpu.core_type<tc>, window_params = [{transform_indices = @transform_0, window_bounds = array<i64: 1, 32, 24>}, {pipeline_mode = #tpu.pipeline_mode<synchronous>, transform_indices = @transform_1, window_bounds = array<i64: 24, 96>}, {pipeline_mode = #tpu.pipeline_mode<synchronous>, transform_indices = @transform_2, window_bounds = array<i64: 1, 96>}, {pipeline_mode = #tpu.pipeline_mode<synchronous>, transform_indices = @transform_3, window_bounds = array<i64: 1, 96>}, {transform_indices = @transform_4, window_bounds = array<i64: 1, 32, 96>}]} {
    %c0 = arith.constant 0 : index
    %c0_0 = arith.constant 0 : index
    %c0_1 = arith.constant 0 : index
    %0 = vector.load %arg2[%c0, %c0_0, %c0_1] : memref<1x32x24xbf16, #tpu.memory_space<vmem>>, vector<1x32x24xbf16>
    %1 = vector.shape_cast %0 : vector<1x32x24xbf16> to vector<32x24xbf16>
    %c0_2 = arith.constant 0 : index
    %c0_3 = arith.constant 0 : index
    %2 = vector.load %arg3[%c0_2, %c0_3] : memref<24x96xbf16, #tpu.memory_space<vmem>>, vector<24x96xbf16>
    %cst = arith.constant dense<0.000000e+00> : vector<32x96xf32>
    %3 = tpu.matmul %1, %2, %cst {dimension_numbers = #tpu.dot_dimension_numbers<[1], [0], [0], [1], [0, 0, 1, 1], [], []>} : vector<32x24xbf16>, vector<24x96xbf16>, vector<32x96xf32> -> vector<32x96xf32>
    %c0_4 = arith.constant 0 : index
    %c0_5 = arith.constant 0 : index
    %4 = vector.load %arg4[%c0_4, %c0_5] : memref<1x96xf32, #tpu.memory_space<vmem>>, vector<1x96xf32>
    %5 = vector.broadcast %4 : vector<1x96xf32> to vector<32x96xf32>
    %6 = arith.mulf %3, %5 : vector<32x96xf32>
    %c0_6 = arith.constant 0 : index
    %c0_7 = arith.constant 0 : index
    %7 = vector.load %arg5[%c0_6, %c0_7] : memref<1x96xf32, #tpu.memory_space<vmem>>, vector<1x96xf32>
    %8 = vector.broadcast %7 : vector<1x96xf32> to vector<32x96xf32>
    %9 = arith.addf %6, %8 : vector<32x96xf32>
    %10 = arith.negf %9 : vector<32x96xf32>
    %11 = math.exp %10 : vector<32x96xf32>
    %cst_8 = arith.constant 1.000000e+00 : f32
    %12 = vector.broadcast %cst_8 : f32 to vector<32x96xf32>
    %13 = arith.addf %12, %11 : vector<32x96xf32>
    %14 = arith.divf %12, %13 : vector<32x96xf32>
    %15 = arith.mulf %9, %14 : vector<32x96xf32>
    %16 = arith.truncf %15 : vector<32x96xf32> to vector<32x96xbf16>
    %c0_9 = arith.constant 0 : index
    %c0_10 = arith.constant 0 : index
    %c0_11 = arith.constant 0 : index
    %17 = vector.load %arg6[%c0_9, %c0_10, %c0_11] : memref<1x32x96xbf16, #tpu.memory_space<vmem>>, vector<1x32x96xbf16>
    %18 = vector.shape_cast %17 : vector<1x32x96xbf16> to vector<32x96xbf16>
    %19 = vector.shape_cast %16 : vector<32x96xbf16> to vector<1x32x96xbf16>
    tpu.vector_store %arg6[%c0_9, %c0_10, %c0_11], %19 {strides = array<i32>} : memref<1x32x96xbf16, #tpu.memory_space<vmem>>, vector<1x32x96xbf16>,
    return
  }
  func.func @transform_0(%arg0: i32, %arg1: i32) -> (i32, i32, i32) {
    %c0_i32 = arith.constant 0 : i32
    %c0_i32_0 = arith.constant 0 : i32
    return %arg0, %arg1, %c0_i32 : i32, i32, i32
  }
  func.func @transform_1(%arg0: i32, %arg1: i32) -> (i32, i32) {
    %c0_i32 = arith.constant 0 : i32
    %c0_i32_0 = arith.constant 0 : i32
    %c0_i32_1 = arith.constant 0 : i32
    return %c0_i32, %c0_i32_0 : i32, i32
  }
  func.func @transform_2(%arg0: i32, %arg1: i32) -> (i32, i32) {
    %c0_i32 = arith.constant 0 : i32
    %c0_i32_0 = arith.constant 0 : i32
    %c0_i32_1 = arith.constant 0 : i32
    return %c0_i32, %c0_i32_0 : i32, i32
  }
  func.func @transform_3(%arg0: i32, %arg1: i32) -> (i32, i32) {
    %c0_i32 = arith.constant 0 : i32
    %c0_i32_0 = arith.constant 0 : i32
    %c0_i32_1 = arith.constant 0 : i32
    return %c0_i32, %c0_i32_0 : i32, i32
  }
  func.func @transform_4(%arg0: i32, %arg1: i32) -> (i32, i32, i32) {
    %c0_i32 = arith.constant 0 : i32
    %c0_i32_0 = arith.constant 0 : i32
    return %arg0, %arg1, %c0_i32 : i32, i32, i32
  }
}

module attributes {stable_mosaic.version = 11 : i64} {
  func.func @kernel(%arg0: i32, %arg1: i32, %arg2: memref<1x1x6x6x96xbf16, #tpu.memory_space<vmem>>, %arg3: memref<9x1x1x96xf32, #tpu.memory_space<vmem>>, %arg4: memref<1x1x96xf32, #tpu.memory_space<vmem>>, %arg5: memref<1x1x96xf32, #tpu.memory_space<vmem>>, %arg6: memref<1x4x4x96xbf16, #tpu.memory_space<vmem>>) attributes {dimension_semantics = [#tpu.dimension_semantics<parallel>, #tpu.dimension_semantics<parallel>], iteration_bounds = array<i64: 2, 1>, scalar_prefetch = 0 : i64, scratch_operands = 0 : i64, tpu.core_type = #tpu.core_type<tc>, window_params = [{transform_indices = @transform_0, window_bounds = array<i64: 1, 1, 6, 6, 96>}, {transform_indices = @transform_1, window_bounds = array<i64: 9, 1, 1, 96>}, {transform_indices = @transform_2, window_bounds = array<i64: 1, 1, 96>}, {transform_indices = @transform_3, window_bounds = array<i64: 1, 1, 96>}, {transform_indices = @transform_4, window_bounds = array<i64: 1, 4, 4, 96>}]} {
    %c0 = arith.constant 0 : index
    %c0_0 = arith.constant 0 : index
    %c0_1 = arith.constant 0 : index
    %c0_2 = arith.constant 0 : index
    %c0_3 = arith.constant 0 : index
    %0 = vector.load %arg2[%c0, %c0_0, %c0_1, %c0_2, %c0_3] : memref<1x1x6x6x96xbf16, #tpu.memory_space<vmem>>, vector<1x1x4x4x96xbf16>
    %1 = vector.shape_cast %0 : vector<1x1x4x4x96xbf16> to vector<4x4x96xbf16>
    %c0_4 = arith.constant 0 : index
    %c0_5 = arith.constant 0 : index
    %c0_6 = arith.constant 0 : index
    %c0_7 = arith.constant 0 : index
    %2 = vector.load %arg3[%c0_4, %c0_5, %c0_6, %c0_7] : memref<9x1x1x96xf32, #tpu.memory_space<vmem>>, vector<1x1x1x96xf32>
    %3 = vector.shape_cast %2 : vector<1x1x1x96xf32> to vector<1x1x96xf32>
    %4 = arith.extf %1 : vector<4x4x96xbf16> to vector<4x4x96xf32>
    %5 = vector.broadcast %3 : vector<1x1x96xf32> to vector<4x4x96xf32>
    %6 = arith.mulf %4, %5 : vector<4x4x96xf32>
    %c0_8 = arith.constant 0 : index
    %c0_9 = arith.constant 0 : index
    %c0_10 = arith.constant 0 : index
    %c1 = arith.constant 1 : index
    %c0_11 = arith.constant 0 : index
    %7 = vector.load %arg2[%c0_8, %c0_9, %c0_10, %c1, %c0_11] : memref<1x1x6x6x96xbf16, #tpu.memory_space<vmem>>, vector<1x1x4x4x96xbf16>
    %8 = vector.shape_cast %7 : vector<1x1x4x4x96xbf16> to vector<4x4x96xbf16>
    %c1_12 = arith.constant 1 : index
    %c0_13 = arith.constant 0 : index
    %c0_14 = arith.constant 0 : index
    %c0_15 = arith.constant 0 : index
    %9 = vector.load %arg3[%c1_12, %c0_13, %c0_14, %c0_15] : memref<9x1x1x96xf32, #tpu.memory_space<vmem>>, vector<1x1x1x96xf32>
    %10 = vector.shape_cast %9 : vector<1x1x1x96xf32> to vector<1x1x96xf32>
    %11 = arith.extf %8 : vector<4x4x96xbf16> to vector<4x4x96xf32>
    %12 = vector.broadcast %10 : vector<1x1x96xf32> to vector<4x4x96xf32>
    %13 = arith.mulf %11, %12 : vector<4x4x96xf32>
    %14 = arith.addf %6, %13 : vector<4x4x96xf32>
    %c0_16 = arith.constant 0 : index
    %c0_17 = arith.constant 0 : index
    %c0_18 = arith.constant 0 : index
    %c2 = arith.constant 2 : index
    %c0_19 = arith.constant 0 : index
    %15 = vector.load %arg2[%c0_16, %c0_17, %c0_18, %c2, %c0_19] : memref<1x1x6x6x96xbf16, #tpu.memory_space<vmem>>, vector<1x1x4x4x96xbf16>
    %16 = vector.shape_cast %15 : vector<1x1x4x4x96xbf16> to vector<4x4x96xbf16>
    %c2_20 = arith.constant 2 : index
    %c0_21 = arith.constant 0 : index
    %c0_22 = arith.constant 0 : index
    %c0_23 = arith.constant 0 : index
    %17 = vector.load %arg3[%c2_20, %c0_21, %c0_22, %c0_23] : memref<9x1x1x96xf32, #tpu.memory_space<vmem>>, vector<1x1x1x96xf32>
    %18 = vector.shape_cast %17 : vector<1x1x1x96xf32> to vector<1x1x96xf32>
    %19 = arith.extf %16 : vector<4x4x96xbf16> to vector<4x4x96xf32>
    %20 = vector.broadcast %18 : vector<1x1x96xf32> to vector<4x4x96xf32>
    %21 = arith.mulf %19, %20 : vector<4x4x96xf32>
    %22 = arith.addf %14, %21 : vector<4x4x96xf32>
    %c0_24 = arith.constant 0 : index
    %c0_25 = arith.constant 0 : index
    %c1_26 = arith.constant 1 : index
    %c0_27 = arith.constant 0 : index
    %c0_28 = arith.constant 0 : index
    %23 = vector.load %arg2[%c0_24, %c0_25, %c1_26, %c0_27, %c0_28] : memref<1x1x6x6x96xbf16, #tpu.memory_space<vmem>>, vector<1x1x4x4x96xbf16>
    %24 = vector.shape_cast %23 : vector<1x1x4x4x96xbf16> to vector<4x4x96xbf16>
    %c3 = arith.constant 3 : index
    %c0_29 = arith.constant 0 : index
    %c0_30 = arith.constant 0 : index
    %c0_31 = arith.constant 0 : index
    %25 = vector.load %arg3[%c3, %c0_29, %c0_30, %c0_31] : memref<9x1x1x96xf32, #tpu.memory_space<vmem>>, vector<1x1x1x96xf32>
    %26 = vector.shape_cast %25 : vector<1x1x1x96xf32> to vector<1x1x96xf32>
    %27 = arith.extf %24 : vector<4x4x96xbf16> to vector<4x4x96xf32>
    %28 = vector.broadcast %26 : vector<1x1x96xf32> to vector<4x4x96xf32>
    %29 = arith.mulf %27, %28 : vector<4x4x96xf32>
    %30 = arith.addf %22, %29 : vector<4x4x96xf32>
    %c0_32 = arith.constant 0 : index
    %c0_33 = arith.constant 0 : index
    %c1_34 = arith.constant 1 : index
    %c1_35 = arith.constant 1 : index
    %c0_36 = arith.constant 0 : index
    %31 = vector.load %arg2[%c0_32, %c0_33, %c1_34, %c1_35, %c0_36] : memref<1x1x6x6x96xbf16, #tpu.memory_space<vmem>>, vector<1x1x4x4x96xbf16>
    %32 = vector.shape_cast %31 : vector<1x1x4x4x96xbf16> to vector<4x4x96xbf16>
    %c4 = arith.constant 4 : index
    %c0_37 = arith.constant 0 : index
    %c0_38 = arith.constant 0 : index
    %c0_39 = arith.constant 0 : index
    %33 = vector.load %arg3[%c4, %c0_37, %c0_38, %c0_39] : memref<9x1x1x96xf32, #tpu.memory_space<vmem>>, vector<1x1x1x96xf32>
    %34 = vector.shape_cast %33 : vector<1x1x1x96xf32> to vector<1x1x96xf32>
    %35 = arith.extf %32 : vector<4x4x96xbf16> to vector<4x4x96xf32>
    %36 = vector.broadcast %34 : vector<1x1x96xf32> to vector<4x4x96xf32>
    %37 = arith.mulf %35, %36 : vector<4x4x96xf32>
    %38 = arith.addf %30, %37 : vector<4x4x96xf32>
    %c0_40 = arith.constant 0 : index
    %c0_41 = arith.constant 0 : index
    %c1_42 = arith.constant 1 : index
    %c2_43 = arith.constant 2 : index
    %c0_44 = arith.constant 0 : index
    %39 = vector.load %arg2[%c0_40, %c0_41, %c1_42, %c2_43, %c0_44] : memref<1x1x6x6x96xbf16, #tpu.memory_space<vmem>>, vector<1x1x4x4x96xbf16>
    %40 = vector.shape_cast %39 : vector<1x1x4x4x96xbf16> to vector<4x4x96xbf16>
    %c5 = arith.constant 5 : index
    %c0_45 = arith.constant 0 : index
    %c0_46 = arith.constant 0 : index
    %c0_47 = arith.constant 0 : index
    %41 = vector.load %arg3[%c5, %c0_45, %c0_46, %c0_47] : memref<9x1x1x96xf32, #tpu.memory_space<vmem>>, vector<1x1x1x96xf32>
    %42 = vector.shape_cast %41 : vector<1x1x1x96xf32> to vector<1x1x96xf32>
    %43 = arith.extf %40 : vector<4x4x96xbf16> to vector<4x4x96xf32>
    %44 = vector.broadcast %42 : vector<1x1x96xf32> to vector<4x4x96xf32>
    %45 = arith.mulf %43, %44 : vector<4x4x96xf32>
    %46 = arith.addf %38, %45 : vector<4x4x96xf32>
    %c0_48 = arith.constant 0 : index
    %c0_49 = arith.constant 0 : index
    %c2_50 = arith.constant 2 : index
    %c0_51 = arith.constant 0 : index
    %c0_52 = arith.constant 0 : index
    %47 = vector.load %arg2[%c0_48, %c0_49, %c2_50, %c0_51, %c0_52] : memref<1x1x6x6x96xbf16, #tpu.memory_space<vmem>>, vector<1x1x4x4x96xbf16>
    %48 = vector.shape_cast %47 : vector<1x1x4x4x96xbf16> to vector<4x4x96xbf16>
    %c6 = arith.constant 6 : index
    %c0_53 = arith.constant 0 : index
    %c0_54 = arith.constant 0 : index
    %c0_55 = arith.constant 0 : index
    %49 = vector.load %arg3[%c6, %c0_53, %c0_54, %c0_55] : memref<9x1x1x96xf32, #tpu.memory_space<vmem>>, vector<1x1x1x96xf32>
    %50 = vector.shape_cast %49 : vector<1x1x1x96xf32> to vector<1x1x96xf32>
    %51 = arith.extf %48 : vector<4x4x96xbf16> to vector<4x4x96xf32>
    %52 = vector.broadcast %50 : vector<1x1x96xf32> to vector<4x4x96xf32>
    %53 = arith.mulf %51, %52 : vector<4x4x96xf32>
    %54 = arith.addf %46, %53 : vector<4x4x96xf32>
    %c0_56 = arith.constant 0 : index
    %c0_57 = arith.constant 0 : index
    %c2_58 = arith.constant 2 : index
    %c1_59 = arith.constant 1 : index
    %c0_60 = arith.constant 0 : index
    %55 = vector.load %arg2[%c0_56, %c0_57, %c2_58, %c1_59, %c0_60] : memref<1x1x6x6x96xbf16, #tpu.memory_space<vmem>>, vector<1x1x4x4x96xbf16>
    %56 = vector.shape_cast %55 : vector<1x1x4x4x96xbf16> to vector<4x4x96xbf16>
    %c7 = arith.constant 7 : index
    %c0_61 = arith.constant 0 : index
    %c0_62 = arith.constant 0 : index
    %c0_63 = arith.constant 0 : index
    %57 = vector.load %arg3[%c7, %c0_61, %c0_62, %c0_63] : memref<9x1x1x96xf32, #tpu.memory_space<vmem>>, vector<1x1x1x96xf32>
    %58 = vector.shape_cast %57 : vector<1x1x1x96xf32> to vector<1x1x96xf32>
    %59 = arith.extf %56 : vector<4x4x96xbf16> to vector<4x4x96xf32>
    %60 = vector.broadcast %58 : vector<1x1x96xf32> to vector<4x4x96xf32>
    %61 = arith.mulf %59, %60 : vector<4x4x96xf32>
    %62 = arith.addf %54, %61 : vector<4x4x96xf32>
    %c0_64 = arith.constant 0 : index
    %c0_65 = arith.constant 0 : index
    %c2_66 = arith.constant 2 : index
    %c2_67 = arith.constant 2 : index
    %c0_68 = arith.constant 0 : index
    %63 = vector.load %arg2[%c0_64, %c0_65, %c2_66, %c2_67, %c0_68] : memref<1x1x6x6x96xbf16, #tpu.memory_space<vmem>>, vector<1x1x4x4x96xbf16>
    %64 = vector.shape_cast %63 : vector<1x1x4x4x96xbf16> to vector<4x4x96xbf16>
    %c8 = arith.constant 8 : index
    %c0_69 = arith.constant 0 : index
    %c0_70 = arith.constant 0 : index
    %c0_71 = arith.constant 0 : index
    %65 = vector.load %arg3[%c8, %c0_69, %c0_70, %c0_71] : memref<9x1x1x96xf32, #tpu.memory_space<vmem>>, vector<1x1x1x96xf32>
    %66 = vector.shape_cast %65 : vector<1x1x1x96xf32> to vector<1x1x96xf32>
    %67 = arith.extf %64 : vector<4x4x96xbf16> to vector<4x4x96xf32>
    %68 = vector.broadcast %66 : vector<1x1x96xf32> to vector<4x4x96xf32>
    %69 = arith.mulf %67, %68 : vector<4x4x96xf32>
    %70 = arith.addf %62, %69 : vector<4x4x96xf32>
    %c0_72 = arith.constant 0 : index
    %c0_73 = arith.constant 0 : index
    %c0_74 = arith.constant 0 : index
    %71 = vector.load %arg4[%c0_72, %c0_73, %c0_74] : memref<1x1x96xf32, #tpu.memory_space<vmem>>, vector<1x1x96xf32>
    %72 = vector.broadcast %71 : vector<1x1x96xf32> to vector<4x4x96xf32>
    %73 = arith.mulf %70, %72 : vector<4x4x96xf32>
    %c0_75 = arith.constant 0 : index
    %c0_76 = arith.constant 0 : index
    %c0_77 = arith.constant 0 : index
    %74 = vector.load %arg5[%c0_75, %c0_76, %c0_77] : memref<1x1x96xf32, #tpu.memory_space<vmem>>, vector<1x1x96xf32>
    %75 = vector.broadcast %74 : vector<1x1x96xf32> to vector<4x4x96xf32>
    %76 = arith.addf %73, %75 : vector<4x4x96xf32>
    %77 = arith.negf %76 : vector<4x4x96xf32>
    %78 = math.exp %77 : vector<4x4x96xf32>
    %cst = arith.constant 1.000000e+00 : f32
    %79 = vector.broadcast %cst : f32 to vector<4x4x96xf32>
    %80 = arith.addf %79, %78 : vector<4x4x96xf32>
    %81 = arith.divf %79, %80 : vector<4x4x96xf32>
    %82 = arith.mulf %76, %81 : vector<4x4x96xf32>
    %83 = arith.truncf %82 : vector<4x4x96xf32> to vector<4x4x96xbf16>
    %c0_78 = arith.constant 0 : index
    %c0_79 = arith.constant 0 : index
    %c0_80 = arith.constant 0 : index
    %c0_81 = arith.constant 0 : index
    %84 = vector.load %arg6[%c0_78, %c0_79, %c0_80, %c0_81] : memref<1x4x4x96xbf16, #tpu.memory_space<vmem>>, vector<1x4x4x96xbf16>
    %85 = vector.shape_cast %84 : vector<1x4x4x96xbf16> to vector<4x4x96xbf16>
    %86 = vector.shape_cast %83 : vector<4x4x96xbf16> to vector<1x4x4x96xbf16>
    tpu.vector_store %arg6[%c0_78, %c0_79, %c0_80, %c0_81], %86 {strides = array<i32>} : memref<1x4x4x96xbf16, #tpu.memory_space<vmem>>, vector<1x4x4x96xbf16>,
    return
  }
  func.func @transform_0(%arg0: i32, %arg1: i32) -> (i32, i32, i32, i32, i32) {
    %c0_i32 = arith.constant 0 : i32
    %c0_i32_0 = arith.constant 0 : i32
    %c0_i32_1 = arith.constant 0 : i32
    %c0_i32_2 = arith.constant 0 : i32
    return %arg0, %c0_i32, %c0_i32_0, %c0_i32_1, %arg1 : i32, i32, i32, i32, i32
  }
  func.func @transform_1(%arg0: i32, %arg1: i32) -> (i32, i32, i32, i32) {
    %c0_i32 = arith.constant 0 : i32
    %c0_i32_0 = arith.constant 0 : i32
    %c0_i32_1 = arith.constant 0 : i32
    %c0_i32_2 = arith.constant 0 : i32
    return %c0_i32, %c0_i32_0, %c0_i32_1, %arg1 : i32, i32, i32, i32
  }
  func.func @transform_2(%arg0: i32, %arg1: i32) -> (i32, i32, i32) {
    %c0_i32 = arith.constant 0 : i32
    %c0_i32_0 = arith.constant 0 : i32
    %c0_i32_1 = arith.constant 0 : i32
    return %c0_i32, %c0_i32_0, %arg1 : i32, i32, i32
  }
  func.func @transform_3(%arg0: i32, %arg1: i32) -> (i32, i32, i32) {
    %c0_i32 = arith.constant 0 : i32
    %c0_i32_0 = arith.constant 0 : i32
    %c0_i32_1 = arith.constant 0 : i32
    return %c0_i32, %c0_i32_0, %arg1 : i32, i32, i32
  }
  func.func @transform_4(%arg0: i32, %arg1: i32) -> (i32, i32, i32, i32) {
    %c0_i32 = arith.constant 0 : i32
    %c0_i32_0 = arith.constant 0 : i32
    %c0_i32_1 = arith.constant 0 : i32
    return %arg0, %c0_i32, %c0_i32_0, %arg1 : i32, i32, i32, i32
  }
}

module attributes {stable_mosaic.version = 11 : i64} {
  func.func @_se_kernel(%arg0: i32, %arg1: memref<1x16x96xbf16, #tpu.memory_space<vmem>>, %arg2: memref<96x8xbf16, #tpu.memory_space<vmem>>, %arg3: memref<1x8xf32, #tpu.memory_space<vmem>>, %arg4: memref<8x96xbf16, #tpu.memory_space<vmem>>, %arg5: memref<1x96xf32, #tpu.memory_space<vmem>>, %arg6: memref<1x1x96xf32, #tpu.memory_space<vmem>>) attributes {dimension_semantics = [#tpu.dimension_semantics<parallel>], iteration_bounds = array<i64: 2>, scalar_prefetch = 0 : i64, scratch_operands = 0 : i64, tpu.core_type = #tpu.core_type<tc>, window_params = [{transform_indices = @transform_0, window_bounds = array<i64: 1, 16, 96>}, {pipeline_mode = #tpu.pipeline_mode<synchronous>, transform_indices = @transform_1, window_bounds = array<i64: 96, 8>}, {pipeline_mode = #tpu.pipeline_mode<synchronous>, transform_indices = @transform_2, window_bounds = array<i64: 1, 8>}, {pipeline_mode = #tpu.pipeline_mode<synchronous>, transform_indices = @transform_3, window_bounds = array<i64: 8, 96>}, {pipeline_mode = #tpu.pipeline_mode<synchronous>, transform_indices = @transform_4, window_bounds = array<i64: 1, 96>}, {transform_indices = @transform_5, window_bounds = array<i64: 1, 1, 96>}]} {
    %c0 = arith.constant 0 : index
    %c0_0 = arith.constant 0 : index
    %c0_1 = arith.constant 0 : index
    %0 = vector.load %arg1[%c0, %c0_0, %c0_1] : memref<1x16x96xbf16, #tpu.memory_space<vmem>>, vector<1x16x96xbf16>
    %1 = vector.shape_cast %0 : vector<1x16x96xbf16> to vector<16x96xbf16>
    %2 = arith.extf %1 : vector<16x96xbf16> to vector<16x96xf32>
    %cst = arith.constant dense<0.000000e+00> : vector<96xf32>
    %3 = vector.multi_reduction <add>, %2, %cst [0] : vector<16x96xf32> to vector<96xf32>
    %4 = vector.shape_cast %3 : vector<96xf32> to vector<1x96xf32>
    %cst_2 = arith.constant 6.250000e-02 : f32
    %5 = vector.broadcast %cst_2 : f32 to vector<1x96xf32>
    %6 = arith.mulf %4, %5 : vector<1x96xf32>
    %7 = arith.truncf %6 : vector<1x96xf32> to vector<1x96xbf16>
    %c0_3 = arith.constant 0 : index
    %c0_4 = arith.constant 0 : index
    %8 = vector.load %arg2[%c0_3, %c0_4] : memref<96x8xbf16, #tpu.memory_space<vmem>>, vector<96x8xbf16>
    %cst_5 = arith.constant dense<0.000000e+00> : vector<1x8xf32>
    %9 = tpu.matmul %7, %8, %cst_5 {dimension_numbers = #tpu.dot_dimension_numbers<[1], [0], [0], [1], [0, 0, 1, 1], [], []>} : vector<1x96xbf16>, vector<96x8xbf16>, vector<1x8xf32> -> vector<1x8xf32>
    %c0_6 = arith.constant 0 : index
    %c0_7 = arith.constant 0 : index
    %10 = vector.load %arg3[%c0_6, %c0_7] : memref<1x8xf32, #tpu.memory_space<vmem>>, vector<1x8xf32>
    %11 = arith.addf %9, %10 : vector<1x8xf32>
    %12 = arith.negf %11 : vector<1x8xf32>
    %13 = math.exp %12 : vector<1x8xf32>
    %cst_8 = arith.constant 1.000000e+00 : f32
    %14 = vector.broadcast %cst_8 : f32 to vector<1x8xf32>
    %15 = arith.addf %14, %13 : vector<1x8xf32>
    %16 = arith.divf %14, %15 : vector<1x8xf32>
    %17 = arith.mulf %11, %16 : vector<1x8xf32>
    %18 = arith.truncf %17 : vector<1x8xf32> to vector<1x8xbf16>
    %c0_9 = arith.constant 0 : index
    %c0_10 = arith.constant 0 : index
    %19 = vector.load %arg4[%c0_9, %c0_10] : memref<8x96xbf16, #tpu.memory_space<vmem>>, vector<8x96xbf16>
    %cst_11 = arith.constant dense<0.000000e+00> : vector<1x96xf32>
    %20 = tpu.matmul %18, %19, %cst_11 {dimension_numbers = #tpu.dot_dimension_numbers<[1], [0], [0], [1], [0, 0, 1, 1], [], []>} : vector<1x8xbf16>, vector<8x96xbf16>, vector<1x96xf32> -> vector<1x96xf32>
    %c0_12 = arith.constant 0 : index
    %c0_13 = arith.constant 0 : index
    %21 = vector.load %arg5[%c0_12, %c0_13] : memref<1x96xf32, #tpu.memory_space<vmem>>, vector<1x96xf32>
    %22 = arith.addf %20, %21 : vector<1x96xf32>
    %23 = arith.negf %22 : vector<1x96xf32>
    %24 = math.exp %23 : vector<1x96xf32>
    %cst_14 = arith.constant 1.000000e+00 : f32
    %25 = vector.broadcast %cst_14 : f32 to vector<1x96xf32>
    %26 = arith.addf %25, %24 : vector<1x96xf32>
    %27 = arith.divf %25, %26 : vector<1x96xf32>
    %c0_15 = arith.constant 0 : index
    %c0_16 = arith.constant 0 : index
    %c0_17 = arith.constant 0 : index
    %28 = vector.load %arg6[%c0_15, %c0_16, %c0_17] : memref<1x1x96xf32, #tpu.memory_space<vmem>>, vector<1x1x96xf32>
    %29 = vector.shape_cast %28 : vector<1x1x96xf32> to vector<1x96xf32>
    %30 = vector.shape_cast %27 : vector<1x96xf32> to vector<1x1x96xf32>
    tpu.vector_store %arg6[%c0_15, %c0_16, %c0_17], %30 {strides = array<i32>} : memref<1x1x96xf32, #tpu.memory_space<vmem>>, vector<1x1x96xf32>,
    return
  }
  func.func @transform_0(%arg0: i32) -> (i32, i32, i32) {
    %c0_i32 = arith.constant 0 : i32
    %c0_i32_0 = arith.constant 0 : i32
    %c0_i32_1 = arith.constant 0 : i32
    return %arg0, %c0_i32, %c0_i32_0 : i32, i32, i32
  }
  func.func @transform_1(%arg0: i32) -> (i32, i32) {
    %c0_i32 = arith.constant 0 : i32
    %c0_i32_0 = arith.constant 0 : i32
    %c0_i32_1 = arith.constant 0 : i32
    return %c0_i32, %c0_i32_0 : i32, i32
  }
  func.func @transform_2(%arg0: i32) -> (i32, i32) {
    %c0_i32 = arith.constant 0 : i32
    %c0_i32_0 = arith.constant 0 : i32
    %c0_i32_1 = arith.constant 0 : i32
    return %c0_i32, %c0_i32_0 : i32, i32
  }
  func.func @transform_3(%arg0: i32) -> (i32, i32) {
    %c0_i32 = arith.constant 0 : i32
    %c0_i32_0 = arith.constant 0 : i32
    %c0_i32_1 = arith.constant 0 : i32
    return %c0_i32, %c0_i32_0 : i32, i32
  }
  func.func @transform_4(%arg0: i32) -> (i32, i32) {
    %c0_i32 = arith.constant 0 : i32
    %c0_i32_0 = arith.constant 0 : i32
    %c0_i32_1 = arith.constant 0 : i32
    return %c0_i32, %c0_i32_0 : i32, i32
  }
  func.func @transform_5(%arg0: i32) -> (i32, i32, i32) {
    %c0_i32 = arith.constant 0 : i32
    %c0_i32_0 = arith.constant 0 : i32
    %c0_i32_1 = arith.constant 0 : i32
    return %arg0, %c0_i32, %c0_i32_0 : i32, i32, i32
  }
}

module attributes {stable_mosaic.version = 11 : i64} {
  func.func @kernel(%arg0: i32, %arg1: i32, %arg2: memref<1x32x24xbf16, #tpu.memory_space<vmem>>, %arg3: memref<24x1792xbf16, #tpu.memory_space<vmem>>, %arg4: memref<1x1792xf32, #tpu.memory_space<vmem>>, %arg5: memref<1x1792xf32, #tpu.memory_space<vmem>>, %arg6: memref<1x32x1792xbf16, #tpu.memory_space<vmem>>) attributes {dimension_semantics = [#tpu.dimension_semantics<parallel>, #tpu.dimension_semantics<parallel>], iteration_bounds = array<i64: 1, 1>, scalar_prefetch = 0 : i64, scratch_operands = 0 : i64, tpu.core_type = #tpu.core_type<tc>, window_params = [{transform_indices = @transform_0, window_bounds = array<i64: 1, 32, 24>}, {pipeline_mode = #tpu.pipeline_mode<synchronous>, transform_indices = @transform_1, window_bounds = array<i64: 24, 1792>}, {pipeline_mode = #tpu.pipeline_mode<synchronous>, transform_indices = @transform_2, window_bounds = array<i64: 1, 1792>}, {pipeline_mode = #tpu.pipeline_mode<synchronous>, transform_indices = @transform_3, window_bounds = array<i64: 1, 1792>}, {transform_indices = @transform_4, window_bounds = array<i64: 1, 32, 1792>}]} {
    %c0 = arith.constant 0 : index
    %c0_0 = arith.constant 0 : index
    %c0_1 = arith.constant 0 : index
    %0 = vector.load %arg2[%c0, %c0_0, %c0_1] : memref<1x32x24xbf16, #tpu.memory_space<vmem>>, vector<1x32x24xbf16>
    %1 = vector.shape_cast %0 : vector<1x32x24xbf16> to vector<32x24xbf16>
    %c0_2 = arith.constant 0 : index
    %c0_3 = arith.constant 0 : index
    %2 = vector.load %arg3[%c0_2, %c0_3] : memref<24x1792xbf16, #tpu.memory_space<vmem>>, vector<24x1792xbf16>
    %cst = arith.constant dense<0.000000e+00> : vector<32x1792xf32>
    %3 = tpu.matmul %1, %2, %cst {dimension_numbers = #tpu.dot_dimension_numbers<[1], [0], [0], [1], [0, 0, 1, 1], [], []>} : vector<32x24xbf16>, vector<24x1792xbf16>, vector<32x1792xf32> -> vector<32x1792xf32>
    %c0_4 = arith.constant 0 : index
    %c0_5 = arith.constant 0 : index
    %4 = vector.load %arg4[%c0_4, %c0_5] : memref<1x1792xf32, #tpu.memory_space<vmem>>, vector<1x1792xf32>
    %5 = vector.broadcast %4 : vector<1x1792xf32> to vector<32x1792xf32>
    %6 = arith.mulf %3, %5 : vector<32x1792xf32>
    %c0_6 = arith.constant 0 : index
    %c0_7 = arith.constant 0 : index
    %7 = vector.load %arg5[%c0_6, %c0_7] : memref<1x1792xf32, #tpu.memory_space<vmem>>, vector<1x1792xf32>
    %8 = vector.broadcast %7 : vector<1x1792xf32> to vector<32x1792xf32>
    %9 = arith.addf %6, %8 : vector<32x1792xf32>
    %10 = arith.negf %9 : vector<32x1792xf32>
    %11 = math.exp %10 : vector<32x1792xf32>
    %cst_8 = arith.constant 1.000000e+00 : f32
    %12 = vector.broadcast %cst_8 : f32 to vector<32x1792xf32>
    %13 = arith.addf %12, %11 : vector<32x1792xf32>
    %14 = arith.divf %12, %13 : vector<32x1792xf32>
    %15 = arith.mulf %9, %14 : vector<32x1792xf32>
    %16 = arith.truncf %15 : vector<32x1792xf32> to vector<32x1792xbf16>
    %c0_9 = arith.constant 0 : index
    %c0_10 = arith.constant 0 : index
    %c0_11 = arith.constant 0 : index
    %17 = vector.load %arg6[%c0_9, %c0_10, %c0_11] : memref<1x32x1792xbf16, #tpu.memory_space<vmem>>, vector<1x32x1792xbf16>
    %18 = vector.shape_cast %17 : vector<1x32x1792xbf16> to vector<32x1792xbf16>
    %19 = vector.shape_cast %16 : vector<32x1792xbf16> to vector<1x32x1792xbf16>
    tpu.vector_store %arg6[%c0_9, %c0_10, %c0_11], %19 {strides = array<i32>} : memref<1x32x1792xbf16, #tpu.memory_space<vmem>>, vector<1x32x1792xbf16>,
    return
  }
  func.func @transform_0(%arg0: i32, %arg1: i32) -> (i32, i32, i32) {
    %c0_i32 = arith.constant 0 : i32
    %c0_i32_0 = arith.constant 0 : i32
    return %arg0, %arg1, %c0_i32 : i32, i32, i32
  }
  func.func @transform_1(%arg0: i32, %arg1: i32) -> (i32, i32) {
    %c0_i32 = arith.constant 0 : i32
    %c0_i32_0 = arith.constant 0 : i32
    %c0_i32_1 = arith.constant 0 : i32
    return %c0_i32, %c0_i32_0 : i32, i32
  }
  func.func @transform_2(%arg0: i32, %arg1: i32) -> (i32, i32) {
    %c0_i32 = arith.constant 0 : i32
    %c0_i32_0 = arith.constant 0 : i32
    %c0_i32_1 = arith.constant 0 : i32
    return %c0_i32, %c0_i32_0 : i32, i32
  }
  func.func @transform_3(%arg0: i32, %arg1: i32) -> (i32, i32) {
    %c0_i32 = arith.constant 0 : i32
    %c0_i32_0 = arith.constant 0 : i32
    %c0_i32_1 = arith.constant 0 : i32
    return %c0_i32, %c0_i32_0 : i32, i32
  }
  func.func @transform_4(%arg0: i32, %arg1: i32) -> (i32, i32, i32) {
    %c0_i32 = arith.constant 0 : i32
    %c0_i32_0 = arith.constant 0 : i32
    return %arg0, %arg1, %c0_i32 : i32, i32, i32
  }
}

module attributes {stable_mosaic.version = 11 : i64} {
  func.func @kernel(%arg0: i32, %arg1: i32, %arg2: memref<1x16x96xbf16, #tpu.memory_space<vmem>>, %arg3: memref<96x24xbf16, #tpu.memory_space<vmem>>, %arg4: memref<1x24xf32, #tpu.memory_space<vmem>>, %arg5: memref<1x24xf32, #tpu.memory_space<vmem>>, %arg6: memref<1x1x96xf32, #tpu.memory_space<vmem>>, %arg7: memref<1x16x24xbf16, #tpu.memory_space<vmem>>, %arg8: memref<1x16x24xbf16, #tpu.memory_space<vmem>>) attributes {dimension_semantics = [#tpu.dimension_semantics<parallel>, #tpu.dimension_semantics<parallel>], iteration_bounds = array<i64: 2, 1>, scalar_prefetch = 0 : i64, scratch_operands = 0 : i64, tpu.core_type = #tpu.core_type<tc>, window_params = [{transform_indices = @transform_0, window_bounds = array<i64: 1, 16, 96>}, {pipeline_mode = #tpu.pipeline_mode<synchronous>, transform_indices = @transform_1, window_bounds = array<i64: 96, 24>}, {pipeline_mode = #tpu.pipeline_mode<synchronous>, transform_indices = @transform_2, window_bounds = array<i64: 1, 24>}, {pipeline_mode = #tpu.pipeline_mode<synchronous>, transform_indices = @transform_3, window_bounds = array<i64: 1, 24>}, {transform_indices = @transform_4, window_bounds = array<i64: 1, 1, 96>}, {transform_indices = @transform_5, window_bounds = array<i64: 1, 16, 24>}, {transform_indices = @transform_6, window_bounds = array<i64: 1, 16, 24>}]} {
    %c0 = arith.constant 0 : index
    %c0_0 = arith.constant 0 : index
    %c0_1 = arith.constant 0 : index
    %0 = vector.load %arg2[%c0, %c0_0, %c0_1] : memref<1x16x96xbf16, #tpu.memory_space<vmem>>, vector<1x16x96xbf16>
    %1 = vector.shape_cast %0 : vector<1x16x96xbf16> to vector<16x96xbf16>
    %2 = arith.extf %1 : vector<16x96xbf16> to vector<16x96xf32>
    %c0_2 = arith.constant 0 : index
    %c0_3 = arith.constant 0 : index
    %c0_4 = arith.constant 0 : index
    %3 = vector.load %arg6[%c0_2, %c0_3, %c0_4] : memref<1x1x96xf32, #tpu.memory_space<vmem>>, vector<1x1x96xf32>
    %4 = vector.shape_cast %3 : vector<1x1x96xf32> to vector<1x96xf32>
    %5 = vector.broadcast %4 : vector<1x96xf32> to vector<16x96xf32>
    %6 = arith.mulf %2, %5 : vector<16x96xf32>
    %7 = arith.truncf %6 : vector<16x96xf32> to vector<16x96xbf16>
    %c0_5 = arith.constant 0 : index
    %c0_6 = arith.constant 0 : index
    %8 = vector.load %arg3[%c0_5, %c0_6] : memref<96x24xbf16, #tpu.memory_space<vmem>>, vector<96x24xbf16>
    %cst = arith.constant dense<0.000000e+00> : vector<16x24xf32>
    %9 = tpu.matmul %7, %8, %cst {dimension_numbers = #tpu.dot_dimension_numbers<[1], [0], [0], [1], [0, 0, 1, 1], [], []>} : vector<16x96xbf16>, vector<96x24xbf16>, vector<16x24xf32> -> vector<16x24xf32>
    %c0_7 = arith.constant 0 : index
    %c0_8 = arith.constant 0 : index
    %10 = vector.load %arg4[%c0_7, %c0_8] : memref<1x24xf32, #tpu.memory_space<vmem>>, vector<1x24xf32>
    %11 = vector.broadcast %10 : vector<1x24xf32> to vector<16x24xf32>
    %12 = arith.mulf %9, %11 : vector<16x24xf32>
    %c0_9 = arith.constant 0 : index
    %c0_10 = arith.constant 0 : index
    %13 = vector.load %arg5[%c0_9, %c0_10] : memref<1x24xf32, #tpu.memory_space<vmem>>, vector<1x24xf32>
    %14 = vector.broadcast %13 : vector<1x24xf32> to vector<16x24xf32>
    %15 = arith.addf %12, %14 : vector<16x24xf32>
    %c0_11 = arith.constant 0 : index
    %c0_12 = arith.constant 0 : index
    %c0_13 = arith.constant 0 : index
    %16 = vector.load %arg7[%c0_11, %c0_12, %c0_13] : memref<1x16x24xbf16, #tpu.memory_space<vmem>>, vector<1x16x24xbf16>
    %17 = vector.shape_cast %16 : vector<1x16x24xbf16> to vector<16x24xbf16>
    %18 = arith.extf %17 : vector<16x24xbf16> to vector<16x24xf32>
    %19 = arith.addf %15, %18 : vector<16x24xf32>
    %20 = arith.truncf %19 : vector<16x24xf32> to vector<16x24xbf16>
    %c0_14 = arith.constant 0 : index
    %c0_15 = arith.constant 0 : index
    %c0_16 = arith.constant 0 : index
    %21 = vector.load %arg8[%c0_14, %c0_15, %c0_16] : memref<1x16x24xbf16, #tpu.memory_space<vmem>>, vector<1x16x24xbf16>
    %22 = vector.shape_cast %21 : vector<1x16x24xbf16> to vector<16x24xbf16>
    %23 = vector.shape_cast %20 : vector<16x24xbf16> to vector<1x16x24xbf16>
    tpu.vector_store %arg8[%c0_14, %c0_15, %c0_16], %23 {strides = array<i32>} : memref<1x16x24xbf16, #tpu.memory_space<vmem>>, vector<1x16x24xbf16>,
    return
  }
  func.func @transform_0(%arg0: i32, %arg1: i32) -> (i32, i32, i32) {
    %c0_i32 = arith.constant 0 : i32
    %c0_i32_0 = arith.constant 0 : i32
    return %arg0, %arg1, %c0_i32 : i32, i32, i32
  }
  func.func @transform_1(%arg0: i32, %arg1: i32) -> (i32, i32) {
    %c0_i32 = arith.constant 0 : i32
    %c0_i32_0 = arith.constant 0 : i32
    %c0_i32_1 = arith.constant 0 : i32
    return %c0_i32, %c0_i32_0 : i32, i32
  }
  func.func @transform_2(%arg0: i32, %arg1: i32) -> (i32, i32) {
    %c0_i32 = arith.constant 0 : i32
    %c0_i32_0 = arith.constant 0 : i32
    %c0_i32_1 = arith.constant 0 : i32
    return %c0_i32, %c0_i32_0 : i32, i32
  }
  func.func @transform_3(%arg0: i32, %arg1: i32) -> (i32, i32) {
    %c0_i32 = arith.constant 0 : i32
    %c0_i32_0 = arith.constant 0 : i32
    %c0_i32_1 = arith.constant 0 : i32
    return %c0_i32, %c0_i32_0 : i32, i32
  }
  func.func @transform_4(%arg0: i32, %arg1: i32) -> (i32, i32, i32) {
    %c0_i32 = arith.constant 0 : i32
    %c0_i32_0 = arith.constant 0 : i32
    %c0_i32_1 = arith.constant 0 : i32
    return %arg0, %c0_i32, %c0_i32_0 : i32, i32, i32
  }
  func.func @transform_5(%arg0: i32, %arg1: i32) -> (i32, i32, i32) {
    %c0_i32 = arith.constant 0 : i32
    %c0_i32_0 = arith.constant 0 : i32
    return %arg0, %arg1, %c0_i32 : i32, i32, i32
  }
  func.func @transform_6(%arg0: i32, %arg1: i32) -> (i32, i32, i32) {
    %c0_i32 = arith.constant 0 : i32
    %c0_i32_0 = arith.constant 0 : i32
    return %arg0, %arg1, %c0_i32 : i32, i32, i32
  }
}

module attributes {stable_mosaic.version = 11 : i64} {
  func.func @_pool_kernel(%arg0: i32, %arg1: i32, %arg2: memref<1x16x128xbf16, #tpu.memory_space<vmem>>, %arg3: memref<1x1x128xf32, #tpu.memory_space<vmem>>) attributes {dimension_semantics = [#tpu.dimension_semantics<parallel>, #tpu.dimension_semantics<parallel>], iteration_bounds = array<i64: 2, 14>, scalar_prefetch = 0 : i64, scratch_operands = 0 : i64, tpu.core_type = #tpu.core_type<tc>, window_params = [{transform_indices = @transform_0, window_bounds = array<i64: 1, 16, 128>}, {transform_indices = @transform_1, window_bounds = array<i64: 1, 1, 128>}]} {
    %c0 = arith.constant 0 : index
    %c0_0 = arith.constant 0 : index
    %c0_1 = arith.constant 0 : index
    %0 = vector.load %arg2[%c0, %c0_0, %c0_1] : memref<1x16x128xbf16, #tpu.memory_space<vmem>>, vector<1x16x128xbf16>
    %1 = vector.shape_cast %0 : vector<1x16x128xbf16> to vector<16x128xbf16>
    %2 = arith.extf %1 : vector<16x128xbf16> to vector<16x128xf32>
    %cst = arith.constant dense<0.000000e+00> : vector<128xf32>
    %3 = vector.multi_reduction <add>, %2, %cst [0] : vector<16x128xf32> to vector<128xf32>
    %4 = vector.shape_cast %3 : vector<128xf32> to vector<1x128xf32>
    %cst_2 = arith.constant 6.250000e-02 : f32
    %5 = vector.broadcast %cst_2 : f32 to vector<1x128xf32>
    %6 = arith.mulf %4, %5 : vector<1x128xf32>
    %c0_3 = arith.constant 0 : index
    %c0_4 = arith.constant 0 : index
    %c0_5 = arith.constant 0 : index
    %7 = vector.load %arg3[%c0_3, %c0_4, %c0_5] : memref<1x1x128xf32, #tpu.memory_space<vmem>>, vector<1x1x128xf32>
    %8 = vector.shape_cast %7 : vector<1x1x128xf32> to vector<1x128xf32>
    %9 = vector.shape_cast %6 : vector<1x128xf32> to vector<1x1x128xf32>
    tpu.vector_store %arg3[%c0_3, %c0_4, %c0_5], %9 {strides = array<i32>} : memref<1x1x128xf32, #tpu.memory_space<vmem>>, vector<1x1x128xf32>,
    return
  }
  func.func @transform_0(%arg0: i32, %arg1: i32) -> (i32, i32, i32) {
    %c0_i32 = arith.constant 0 : i32
    %c0_i32_0 = arith.constant 0 : i32
    return %arg0, %c0_i32, %arg1 : i32, i32, i32
  }
  func.func @transform_1(%arg0: i32, %arg1: i32) -> (i32, i32, i32) {
    %c0_i32 = arith.constant 0 : i32
    %c0_i32_0 = arith.constant 0 : i32
    return %arg0, %c0_i32, %arg1 : i32, i32, i32
  }
}

</mosaic_0001>

<bundles_post_ra>
// kernel: efficientnet_forward.13
= control target key start
LH: loop header
LB: loop body
LE: loop exit
PB: predicated region body
PF: predicated region fallthrough
CT: control target
= control target key end

     0   :  { %vm114_vm0 = vcmask 1044480   ;;  %vm115_vm1 = vcmask 1045504   ;;  %v638_v1 = vmov 65535   ;;  %vm89_vm2 = vcmask 220160   ;;  %s872_s1 = inlined_call_operand.vmem [shape: bf16[27,24], index: 1, kind: input, shape index: {}]   ;;  %s873_s0 = inlined_call_operand.vmem [shape: bf16[1,128,27], index: 0, kind: input, shape index: {}]   ;;  %s874_s2 = inlined_call_operand.vmem [shape: f32[1,24], index: 2, kind: input, shape index: {}]   ;;  %s875_s3 = inlined_call_operand.vmem [shape: f32[1,24], index: 3, kind: input, shape index: {}]   ;;  %s876_s4 = inlined_call_operand.vmem [shape: bf16[1,128,24], index: 4, kind: output, shape index: {}]  }
   0x1   :  { %v564_v0 = vld [vmem:[%s872_s1 + $0x8] sm:$0x3f]   ;;  %v116_v2 = vsel %vm114_vm0, 4294967295, %v638_v1  ;;  %v566_v4 = vld [vmem:[%s873_s0] sm:$0xff]   ;;  %v570_v10 = vld [vmem:[%s873_s0 + $0x10] sm:$0xff]   ;;  %vm440_vm3 = vcmask 191488  }
   0x2   :  { %v117_v3 = vsel %vm115_vm1, %v116_v2, 0  ;;  %v565_v6 = vld [vmem:[%s872_s1] sm:$0xff]   ;;  %543 = vmatprep.mubr.msk.bf16.mxu0 %vm89_vm2, %v566_v4  ;;  %v568_v8 = vld [vmem:[%s873_s0 + $0x8] sm:$0xff]   ;;  %v571_v11 = vld [vmem:[%s873_s0 + $0x30] sm:$0xff]  }
   0x3   :  { %v119_v5 = vand.u32 %v564_v0, %v117_v3  ;;  %v567_v7 = vld [vmem:[%s873_s0 + $0x20] sm:$0xff]   ;;  %v569_v9 = vld [vmem:[%s873_s0 + $0x28] sm:$0xff]   ;;  %v572_v12 = vld [vmem:[%s873_s0 + $0x18] sm:$0xff]  }
   0x4   :  { %551 = vmatprep.mubr.msk.bf16.mxu1 %vm89_vm2, %v567_v7  ;;  %v573_v13 = vld [vmem:[%s873_s0 + $0x38] sm:$0xff]   ;;  %v705_v14 = vld [vmem:[%s874_s2] ss:$0 sm:$0xff] }
   0x5   :  { %539 = vmatprep.subr.bf16.mxu0 %v119_v5  ;;  %559 = vmatprep.subr.bf16.mxu1 %v119_v5  ;;  %v710_v16 = vld [vmem:[%s875_s3] ss:$0 sm:$0xff] }
   0x6   :  { %540 = vmatpush3.bf16.msra.mxu0 %v119_v5  ;;  %561 = vmatpush3.bf16.msra.mxu1 %v119_v5 }
   0x7   :  { %541 = vmatprep.subr.bf16.mxu0 %v565_v6  ;;  %560 = vmatprep.subr.bf16.mxu1 %v565_v6 }
   0xa   :  { %542 = vmatpush3.bf16.msra.mxu0 %v565_v6  ;;  %562 = vmatpush3.bf16.msra.mxu1 %v565_v6 }
   0xd   :  { %544 = vmatmul.mubr.msk.bf16.vlgmr.msra.gmra.mxu0 %vm89_vm2, %v568_v8  ;;  %552 = vmatmul.mubr.msk.bf16.vlgmr.msra.gmra.mxu1 %vm89_vm2, %v569_v9 }
   0xe   :  { %547 = vmatprep.mubr.msk.bf16.mxu0 %vm89_vm2, %v570_v10  ;;  %555 = vmatprep.mubr.msk.bf16.mxu1 %vm89_vm2, %v571_v11 }
  0x15   :  { %548 = vmatmul.mubr.msk.bf16.gmra.mxu0 %vm89_vm2, %v572_v12  ;;  %556 = vmatmul.mubr.msk.bf16.gmra.mxu1 %vm89_vm2, %v573_v13 }
  0xcd   :  { %v545_v15 = vpop.f32.mrf.mxu0  ;;  %v553_v17 = vpop.f32.mrf.mxu1 }
  0xce   :  { %v227_v18 = vmul.f32 %v545_v15, %v705_v14  ;;  %v235_v19 = vmul.f32 %v553_v17, %v705_v14 }
  0xcf   :  { %v155_v20 = vpop.f32.mrf.mxu0  ;;  %v187_v21 = vpop.f32.mrf.mxu1 }
  0xd0   :  { %v715_v22 = vadd.f32 %v710_v16, %v227_v18  ;;  %v718_v23 = vadd.f32 %v710_v16, %v235_v19  ;;  %v225_v24 = vmul.f32 %v705_v14, %v155_v20  ;;  %v233_v25 = vmul.f32 %v705_v14, %v187_v21 }
  0xd1   :  { %v546_v26 = vpop.f32.mrf.mxu0  ;;  %v554_v27 = vpop.f32.mrf.mxu1 }
  0xd2   :  { %v483_v28 = vmul.f32 -1.442695, %v715_v22  ;;  %v491_v29 = vmul.f32 -1.442695, %v718_v23  ;;  %v725_v30 = vadd.f32 %v710_v16, %v225_v24  ;;  %v728_v31 = vadd.f32 %v710_v16, %v233_v25 }
  0xd3   :  { %v228_v32 = vmul.f32 %v546_v26, %v705_v14  ;;  %v236_v33 = vmul.f32 %v554_v27, %v705_v14  ;;  %v158_v34 = vpop.f32.mrf.mxu0  ;;  %v190_v35 = vpop.f32.mrf.mxu1 }
  0xd4   :  { %574 = vpow2.f32 %v483_v28  ;;  %v481_v36 = vmul.f32 -1.442695, %v725_v30  ;;  %v489_v37 = vmul.f32 -1.442695, %v728_v31  ;;  %v226_v38 = vmul.f32 %v705_v14, %v158_v34 }
  0xd5   :  { %576 = vpow2.f32 %v491_v29  ;;  %v736_v39 = vadd.f32 %v710_v16, %v228_v32  ;;  %v739_v40 = vadd.f32 %v710_v16, %v236_v33  ;;  %v234_v41 = vmul.f32 %v705_v14, %v190_v35  ;;  %v549_v42 = vpop.f32.mrf.mxu0  ;;  %v557_v43 = vpop.f32.mrf.mxu1 }
  0xd6   :  { %578 = vpow2.f32 %v481_v36  ;;  %v743_v44 = vadd.f32 %v710_v16, %v226_v38  ;;  %v231_v45 = vmul.f32 %v549_v42, %v705_v14  ;;  %v239_v46 = vmul.f32 %v557_v43, %v705_v14 }
  0xd7   :  { %580 = vpow2.f32 %v489_v37  ;;  %v484_v47 = vmul.f32 -1.442695, %v736_v39  ;;  %v492_v48 = vmul.f32 -1.442695, %v739_v40  ;;  %v750_v49 = vadd.f32 %v710_v16, %v234_v41  ;;  %v171_v50 = vpop.f32.mrf.mxu0  ;;  %v203_v51 = vpop.f32.mrf.mxu1 }
  0xd8   :  { %v482_v52 = vmul.f32 -1.442695, %v743_v44  ;;  %v754_v53 = vadd.f32 %v710_v16, %v231_v45  ;;  %v757_v54 = vadd.f32 %v710_v16, %v239_v46  ;;  %v229_v55 = vmul.f32 %v705_v14, %v171_v50 }
  0xd9   :  { %582 = vpow2.f32 %v484_v47  ;;  %v490_v56 = vmul.f32 -1.442695, %v750_v49  ;;  %v237_v57 = vmul.f32 %v705_v14, %v203_v51  ;;  %v550_v58 = vpop.f32.mrf.mxu0  ;;  %v558_v59 = vpop.f32.mrf.mxu1 }
  0xda   :  { %584 = vpow2.f32 %v492_v48  ;;  %v487_v60 = vmul.f32 -1.442695, %v754_v53  ;;  %v495_v61 = vmul.f32 -1.442695, %v757_v54  ;;  %v765_v62 = vadd.f32 %v710_v16, %v229_v55 }
  0xdb   :  { %586 = vpow2.f32 %v482_v52  ;;  %v768_v63 = vadd.f32 %v710_v16, %v237_v57  ;;  %v232_v0 = vmul.f32 %v550_v58, %v705_v14  ;;  %v240_v1 = vmul.f32 %v558_v59, %v705_v14  ;;  %v174_v2 = vpop.f32.mrf.mxu0  ;;  %v206_v3 = vpop.f32.mrf.mxu1 }
  0xdc   :  { %588 = vpow2.f32 %v490_v56  ;;  %v485_v4 = vmul.f32 -1.442695, %v765_v62  ;;  %v230_v5 = vmul.f32 %v705_v14, %v174_v2  ;;  %v238_v6 = vmul.f32 %v705_v14, %v206_v3 }
  0xdd   :  { %590 = vpow2.f32 %v487_v60  ;;  %v493_v7 = vmul.f32 -1.442695, %v768_v63  ;;  %v777_v8 = vadd.f32 %v710_v16, %v232_v0  ;;  %v780_v9 = vadd.f32 %v710_v16, %v240_v1 }
  0xde   :  { %592 = vpow2.f32 %v495_v61  ;;  %v783_v10 = vadd.f32 %v710_v16, %v230_v5  ;;  %v789_v14 = vadd.f32 %v710_v16, %v238_v6 }
  0xdf   :  { %594 = vpow2.f32 %v485_v4  ;;  %v488_v11 = vmul.f32 -1.442695, %v777_v8  ;;  %v496_v12 = vmul.f32 -1.442695, %v780_v9 }
  0xe0   :  { %596 = vpow2.f32 %v493_v7  ;;  %v486_v13 = vmul.f32 -1.442695, %v783_v10  ;;  %v494_v25 = vmul.f32 -1.442695, %v789_v14 }
  0xe1   :  { %v575_v15 = vpop.eup %574  ;;  %598 = vpow2.f32 %v488_v11 }
  0xe2   :  { %v577_v17 = vpop.eup %576  ;;  %v314_v18 = vadd.f32 1.0, %v575_v15  ;;  %600 = vpow2.f32 %v496_v12 }
  0xe3   :  { %v579_v19 = vpop.eup %578  ;;  %v322_v20 = vadd.f32 1.0, %v577_v17  ;;  %602 = vpow2.f32 %v486_v13 }
  0xe4   :  { %v581_v21 = vpop.eup %580  ;;  %604 = vrcp.f32 %v314_v18  ;;  %v312_v24 = vadd.f32 1.0, %v579_v19 }
  0xe5   :  { %606 = vrcp.f32 %v322_v20  ;;  %v320_v26 = vadd.f32 1.0, %v581_v21 }
  0xe6   :  { %v583_v27 = vpop.eup %582  ;;  %608 = vrcp.f32 %v312_v24 }
  0xe7   :  { %v585_v28 = vpop.eup %584  ;;  %610 = vrcp.f32 %v320_v26  ;;  %v315_v16 = vadd.f32 1.0, %v583_v27 }
  0xe8   :  { %v587_v29 = vpop.eup %586  ;;  %v323_v32 = vadd.f32 1.0, %v585_v28  ;;  %612 = vpow2.f32 %v494_v25 }
  0xe9   :  { %v589_v33 = vpop.eup %588  ;;  %614 = vrcp.f32 %v315_v16  ;;  %v313_v34 = vadd.f32 1.0, %v587_v29 }
  0xea   :  { %v591_v35 = vpop.eup %590  ;;  %616 = vrcp.f32 %v323_v32  ;;  %v321_v36 = vadd.f32 1.0, %v589_v33 }
  0xeb   :  { %v593_v37 = vpop.eup %592  ;;  %618 = vrcp.f32 %v313_v34  ;;  %v318_v38 = vadd.f32 1.0, %v591_v35 }
  0xec   :  { %v595_v41 = vpop.eup %594  ;;  %620 = vrcp.f32 %v321_v36  ;;  %v326_v42 = vadd.f32 1.0, %v593_v37 }
  0xed   :  { %v597_v43 = vpop.eup %596  ;;  %622 = vrcp.f32 %v318_v38  ;;  %v316_v45 = vadd.f32 1.0, %v595_v41 }
  0xee   :  { %v599_v46 = vpop.eup %598  ;;  %624 = vrcp.f32 %v326_v42  ;;  %v324_v47 = vadd.f32 1.0, %v597_v43 }
  0xef   :  { %v601_v48 = vpop.eup %600  ;;  %626 = vrcp.f32 %v316_v45  ;;  %v319_v50 = vadd.f32 1.0, %v599_v46 }
  0xf0   :  { %v603_v51 = vpop.eup %602  ;;  %628 = vrcp.f32 %v324_v47  ;;  %v327_v52 = vadd.f32 1.0, %v601_v48 }
  0xf1   :  { %v605_v55 = vpop.eup %604  ;;  %630 = vrcp.f32 %v319_v50  ;;  %v317_v56 = vadd.f32 1.0, %v603_v51 }
  0xf2   :  { %v607_v57 = vpop.eup %606  ;;  %v362_v58 = vmul.f32 %v605_v55, %v715_v22  ;;  %632 = vrcp.f32 %v327_v52 }
  0xf3   :  { %v609_v59 = vpop.eup %608  ;;  %v370_v60 = vmul.f32 %v607_v57, %v718_v23  ;;  %634 = vrcp.f32 %v317_v56 }
  0xf4   :  { %v611_v61 = vpop.eup %610  ;;  %v515_v0 = vpack.c.bf16 %v362_v58, %v362_v58  ;;  %v360_v1 = vmul.f32 %v609_v59, %v725_v30 }
  0xf5   :  { %v613_v2 = vpop.eup %612  ;;  %v523_v3 = vpack.c.bf16 %v370_v60, %v370_v60  ;;  %v368_v4 = vmul.f32 %v611_v61, %v728_v31 }
  0xf6   :  { %v615_v5 = vpop.eup %614  ;;  %443 = vst.msk [vmem:[%s876_s4 + $0x8] sm:$0xf] %vm440_vm3, %v515_v0  ;;  %v513_v22 = vpack.c.bf16 %v360_v1, %v360_v1  ;;  %v325_v6 = vadd.f32 1.0, %v613_v2 }
  0xf7   :  { %v617_v7 = vpop.eup %616  ;;  %451 = vst.msk [vmem:[%s876_s4 + $0x28] sm:$0xf] %vm440_vm3, %v523_v3  ;;  %v521_v23 = vpack.c.bf16 %v368_v4, %v368_v4  ;;  %v363_v30 = vmul.f32 %v615_v5, %v736_v39 }
  0xf8   :  { %v619_v11 = vpop.eup %618  ;;  %441 = vst.msk [vmem:[%s876_s4] sm:$0xf] %vm440_vm3, %v513_v22  ;;  %v371_v31 = vmul.f32 %v617_v7, %v739_v40  ;;  %636 = vrcp.f32 %v325_v6 }
  0xf9   :  { %v621_v12 = vpop.eup %620  ;;  %449 = vst.msk [vmem:[%s876_s4 + $0x20] sm:$0xf] %vm440_vm3, %v521_v23  ;;  %v516_v13 = vpack.c.bf16 %v363_v30, %v363_v30  ;;  %v361_v15 = vmul.f32 %v619_v11, %v743_v44 }
  0xfa   :  { %v623_v17 = vpop.eup %622  ;;  %v524_v39 = vpack.c.bf16 %v371_v31, %v371_v31  ;;  %v369_v18 = vmul.f32 %v621_v12, %v750_v49 }
  0xfb   :  { %v625_v19 = vpop.eup %624  ;;  %444 = vst.msk [vmem:[%s876_s4 + $0xc] sm:$0xf] %vm440_vm3, %v516_v13  ;;  %v514_v40 = vpack.c.bf16 %v361_v15, %v361_v15  ;;  %v366_v20 = vmul.f32 %v623_v17, %v754_v53 }
  0xfc   :  { %v627_v21 = vpop.eup %626  ;;  %452 = vst.msk [vmem:[%s876_s4 + $0x2c] sm:$0xf] %vm440_vm3, %v524_v39  ;;  %v522_v44 = vpack.c.bf16 %v369_v18, %v369_v18  ;;  %v374_v24 = vmul.f32 %v625_v19, %v757_v54 }
  0xfd   :  { %v629_v25 = vpop.eup %628  ;;  %442 = vst.msk [vmem:[%s876_s4 + $0x4] sm:$0xf] %vm440_vm3, %v514_v40  ;;  %v519_v49 = vpack.c.bf16 %v366_v20, %v366_v20  ;;  %v364_v26 = vmul.f32 %v627_v21, %v765_v62 }
  0xfe   :  { %v631_v27 = vpop.eup %630  ;;  %450 = vst.msk [vmem:[%s876_s4 + $0x24] sm:$0xf] %vm440_vm3, %v522_v44  ;;  %v527_v53 = vpack.c.bf16 %v374_v24, %v374_v24  ;;  %v372_v28 = vmul.f32 %v629_v25, %v768_v63 }
  0xff   :  { %v633_v16 = vpop.eup %632  ;;  %447 = vst.msk [vmem:[%s876_s4 + $0x18] sm:$0xf] %vm440_vm3, %v519_v49  ;;  %v517_v54 = vpack.c.bf16 %v364_v26, %v364_v26  ;;  %v367_v29 = vmul.f32 %v631_v27, %v777_v8 }
 0x100   :  { %v635_v32 = vpop.eup %634  ;;  %455 = vst.msk [vmem:[%s876_s4 + $0x38] sm:$0xf] %vm440_vm3, %v527_v53  ;;  %v525_v62 = vpack.c.bf16 %v372_v28, %v372_v28  ;;  %v375_v33 = vmul.f32 %v633_v16, %v780_v9 }
 0x101   :  { %445 = vst.msk [vmem:[%s876_s4 + $0x10] sm:$0xf] %vm440_vm3, %v517_v54  ;;  %v520_v63 = vpack.c.bf16 %v367_v29, %v367_v29  ;;  %v365_v34 = vmul.f32 %v635_v32, %v783_v10 }
 0x102   :  { %453 = vst.msk [vmem:[%s876_s4 + $0x30] sm:$0xf] %vm440_vm3, %v525_v62  ;;  %v528_v8 = vpack.c.bf16 %v375_v33, %v375_v33 }
 0x103   :  { %448 = vst.msk [vmem:[%s876_s4 + $0x1c] sm:$0xf] %vm440_vm3, %v520_v63  ;;  %v518_v9 = vpack.c.bf16 %v365_v34, %v365_v34 }
 0x104   :  { %456 = vst.msk [vmem:[%s876_s4 + $0x3c] sm:$0xf] %vm440_vm3, %v528_v8 }
 0x105   :  { %v637_v35 = vpop.eup %636  ;;  %446 = vst.msk [vmem:[%s876_s4 + $0x14] sm:$0xf] %vm440_vm3, %v518_v9 }
 0x106   :  { %v373_v10 = vmul.f32 %v637_v35, %v789_v14 }
 0x108   :  { %v526_v36 = vpack.c.bf16 %v373_v10, %v373_v10 }
 0x10a   :  { %454 = vst.msk [vmem:[%s876_s4 + $0x34] sm:$0xf] %vm440_vm3, %v526_v36 }

// kernel: efficientnet_forward.14
= control target key start
LH: loop header
LB: loop body
LE: loop exit
PB: predicated region body
PF: predicated region fallthrough
CT: control target
= control target key end

     0   :  { %v802_v0 = vmov 0   ;;  %vm214_vm0 = vcmask 719872   ;;  %vm239_vm1 = vcmask 1043456   ;;  %vm562_vm2 = vcmask 191488   ;;  %s1124_s1 = inlined_call_operand.vmem [shape: bf16[216,24], index: 1, kind: input, shape index: {}]   ;;  %s1125_s0 = inlined_call_operand.vmem [shape: bf16[1,128,216], index: 0, kind: input, shape index: {}]   ;;  %s1126_s2 = inlined_call_operand.vmem [shape: f32[1,24], index: 2, kind: input, shape index: {}]   ;;  %s1127_s3 = inlined_call_operand.vmem [shape: f32[1,24], index: 3, kind: input, shape index: {}]   ;;  %s1128_s4 = inlined_call_operand.vmem [shape: bf16[1,128,24], index: 4, kind: output, shape index: {}]  }
   0x1   :  { %243 = vmatprep.subr.bf16.mxu0 %v802_v0  ;;  %671 = vmatprep.subr.bf16.mxu1 %v802_v0  ;;  %v700_v1 = vld [vmem:[%s1124_s1 + $0x38] sm:$0xff]   ;;  %v701_v2 = vld [vmem:[%s1124_s1 + $0x30] sm:$0xff]   ;;  %v702_v3 = vld [vmem:[%s1124_s1 + $0x28] sm:$0xff]  }
   0x2   :  { %244 = vmatpush1.bf16.msra.mxu0 %v700_v1  ;;  %685 = vmatpush1.bf16.msra.mxu1 %v700_v1  ;;  %v703_v4 = vld [vmem:[%s1124_s1 + $0x20] sm:$0xff]   ;;  %v704_v5 = vld [vmem:[%s1124_s1 + $0x18] sm:$0xff]   ;;  %v705_v8 = vld [vmem:[%s1124_s1 + $0x10] sm:$0xff]  }
   0x3   :  { %245 = vmatprep.subr.bf16.mxu0 %v802_v0  ;;  %672 = vmatprep.subr.bf16.mxu1 %v802_v0  ;;  %v716_v6 = vld [vmem:[%s1125_s0 + $0x4] ss:$8 sps:$4 sm:$0xff]   ;;  %v708_v11 = vld [vmem:[%s1124_s1 + $0x68] ss:$0 sps:$4 sm:$0xff]   ;;  %v710_v14 = vld [vmem:[%s1124_s1 + $0x58] sm:$0xff]  }
   0x4   :  { %613 = vmatprep.mubr.msk.bf16.mxu0 %vm214_vm0, %v716_v6  ;;  %v719_v7 = vld [vmem:[%s1125_s0 + $0x44] ss:$8 sps:$4 sm:$0xff]   ;;  %v241_v12 = vsel %vm239_vm1, %v708_v11, 0  ;;  %v711_v15 = vld [vmem:[%s1124_s1 + $0x50] sm:$0xff]   ;;  %v714_v18 = vld [vmem:[%s1125_s0] ss:$8 sps:$4 sm:$0xff]  }
   0x5   :  { %617 = vmatprep.mubr.msk.bf16.mxu1 %vm214_vm0, %v719_v7  ;;  %v706_v9 = vld [vmem:[%s1124_s1 + $0x8] sm:$0xff]   ;;  %v707_v10 = vld [vmem:[%s1124_s1] sm:$0xff]   ;;  %v720_v20 = vld [vmem:[%s1125_s0 + $0x14] ss:$8 sps:$4 sm:$0xff]  }
   0x6   :  { %246 = vmatpush1.bf16.msra.mxu0 %v701_v2  ;;  %686 = vmatpush1.bf16.msra.mxu1 %v701_v2  ;;  %v709_v13 = vld [vmem:[%s1124_s1 + $0x60] sm:$0xff]   ;;  %v712_v16 = vld [vmem:[%s1124_s1 + $0x48] sm:$0xff]   ;;  %v722_v21 = vld [vmem:[%s1125_s0 + $0x54] ss:$8 sps:$4 sm:$0xff]  }
   0x7   :  { %247 = vmatprep.subr.bf16.mxu0 %v802_v0  ;;  %673 = vmatprep.subr.bf16.mxu1 %v802_v0  ;;  %v713_v17 = vld [vmem:[%s1124_s1 + $0x40] sm:$0xff]   ;;  %v724_v22 = vld [vmem:[%s1125_s0 + $0x10] ss:$8 sps:$4 sm:$0xff]   ;;  %v732_v28 = vld [vmem:[%s1125_s0 + $0x34] ss:$8 sps:$4 sm:$0xff]  }
   0x8   :  { %v717_v19 = vld [vmem:[%s1125_s0 + $0x40] ss:$8 sps:$4 sm:$0xff]   ;;  %v725_v23 = vld [vmem:[%s1125_s0 + $0x50] ss:$8 sps:$4 sm:$0xff]   ;;  %v726_v24 = vld [vmem:[%s1125_s0 + $0x24] ss:$8 sps:$4 sm:$0xff]  }
   0x9   :  { %v728_v25 = vld [vmem:[%s1125_s0 + $0x64] ss:$8 sps:$4 sm:$0xff]   ;;  %v730_v26 = vld [vmem:[%s1125_s0 + $0x20] ss:$8 sps:$4 sm:$0xff]   ;;  %v734_v29 = vld [vmem:[%s1125_s0 + $0x74] ss:$8 sps:$4 sm:$0xff]  }
   0xa   :  { %248 = vmatpush1.bf16.msra.mxu0 %v702_v3  ;;  %687 = vmatpush1.bf16.msra.mxu1 %v702_v3  ;;  %v731_v27 = vld [vmem:[%s1125_s0 + $0x60] ss:$8 sps:$4 sm:$0xff]   ;;  %v736_v30 = vld [vmem:[%s1125_s0 + $0x30] ss:$8 sps:$4 sm:$0xff]  }
   0xb   :  { %249 = vmatprep.subr.bf16.mxu0 %v802_v0  ;;  %674 = vmatprep.subr.bf16.mxu1 %v802_v0  ;;  %v737_v31 = vld [vmem:[%s1125_s0 + $0x70] ss:$8 sps:$4 sm:$0xff]   ;;  %v957_v32 = vld [vmem:[%s1126_s2] ss:$0 sm:$0xff] }
   0xc   :  { %v962_v34 = vld [vmem:[%s1127_s3] ss:$0 sm:$0xff] }
   0xe   :  { %250 = vmatpush1.bf16.msra.mxu0 %v703_v4  ;;  %688 = vmatpush1.bf16.msra.mxu1 %v703_v4 }
   0xf   :  { %251 = vmatprep.subr.bf16.mxu0 %v802_v0  ;;  %675 = vmatprep.subr.bf16.mxu1 %v802_v0 }
  0x12   :  { %252 = vmatpush1.bf16.msra.mxu0 %v704_v5  ;;  %689 = vmatpush1.bf16.msra.mxu1 %v704_v5 }
  0x13   :  { %253 = vmatprep.subr.bf16.mxu0 %v802_v0  ;;  %676 = vmatprep.subr.bf16.mxu1 %v802_v0 }
  0x16   :  { %254 = vmatpush1.bf16.msra.mxu0 %v705_v8  ;;  %690 = vmatpush1.bf16.msra.mxu1 %v705_v8 }
  0x17   :  { %255 = vmatprep.subr.bf16.mxu0 %v802_v0  ;;  %677 = vmatprep.subr.bf16.mxu1 %v802_v0 }
  0x1a   :  { %256 = vmatpush1.bf16.msra.mxu0 %v706_v9  ;;  %691 = vmatpush1.bf16.msra.mxu1 %v706_v9 }
  0x1b   :  { %257 = vmatprep.subr.bf16.mxu0 %v802_v0  ;;  %678 = vmatprep.subr.bf16.mxu1 %v802_v0 }
  0x1e   :  { %258 = vmatpush1.bf16.msra.mxu0 %v707_v10  ;;  %692 = vmatpush1.bf16.msra.mxu1 %v707_v10 }
  0x1f   :  { %263 = vmatprep.subr.bf16.mxu0 %v802_v0  ;;  %679 = vmatprep.subr.bf16.mxu1 %v802_v0 }
  0x22   :  { %264 = vmatpush2.bf16.msra.mxu0 %v241_v12  ;;  %693 = vmatpush2.bf16.msra.mxu1 %v241_v12 }
  0x23   :  { %265 = vmatprep.subr.bf16.mxu0 %v802_v0  ;;  %680 = vmatprep.subr.bf16.mxu1 %v802_v0 }
  0x26   :  { %266 = vmatpush2.bf16.msra.mxu0 %v709_v13  ;;  %694 = vmatpush2.bf16.msra.mxu1 %v709_v13 }
  0x27   :  { %267 = vmatprep.subr.bf16.mxu0 %v802_v0  ;;  %681 = vmatprep.subr.bf16.mxu1 %v802_v0 }
  0x2a   :  { %268 = vmatpush2.bf16.msra.mxu0 %v710_v14  ;;  %695 = vmatpush2.bf16.msra.mxu1 %v710_v14 }
  0x2b   :  { %269 = vmatprep.subr.bf16.mxu0 %v802_v0  ;;  %682 = vmatprep.subr.bf16.mxu1 %v802_v0 }
  0x2e   :  { %270 = vmatpush2.bf16.msra.mxu0 %v711_v15  ;;  %696 = vmatpush2.bf16.msra.mxu1 %v711_v15 }
  0x2f   :  { %271 = vmatprep.subr.bf16.mxu0 %v802_v0  ;;  %683 = vmatprep.subr.bf16.mxu1 %v802_v0 }
  0x32   :  { %272 = vmatpush2.bf16.msra.mxu0 %v712_v16  ;;  %697 = vmatpush2.bf16.msra.mxu1 %v712_v16 }
  0x33   :  { %273 = vmatprep.subr.bf16.mxu0 %v802_v0  ;;  %684 = vmatprep.subr.bf16.mxu1 %v802_v0 }
  0x36   :  { %274 = vmatpush2.bf16.msra.mxu0 %v713_v17  ;;  %698 = vmatpush2.bf16.msra.mxu1 %v713_v17 }
  0x39   :  { %276 = vmatmul.mubr.bf16.vlgmr.msra.gmra.mxu0 %v714_v18  ;;  %308 = vmatmul.mubr.bf16.vlgmr.msra.gmra.mxu1 %v717_v19 }
  0x3a   :  { %614 = vmatprep.mubr.msk.bf16.mxu0 %vm214_vm0, %v720_v20  ;;  %618 = vmatprep.mubr.msk.bf16.mxu1 %vm214_vm0, %v722_v21 }
  0x41   :  { %284 = vmatmul.mubr.bf16.gmra.mxu0 %v724_v22  ;;  %316 = vmatmul.mubr.bf16.gmra.mxu1 %v725_v23 }
  0x42   :  { %615 = vmatprep.mubr.msk.bf16.mxu0 %vm214_vm0, %v726_v24  ;;  %619 = vmatprep.mubr.msk.bf16.mxu1 %vm214_vm0, %v728_v25 }
  0x49   :  { %292 = vmatmul.mubr.bf16.gmra.mxu0 %v730_v26  ;;  %324 = vmatmul.mubr.bf16.gmra.mxu1 %v731_v27 }
  0x4a   :  { %616 = vmatprep.mubr.msk.bf16.mxu0 %vm214_vm0, %v732_v28  ;;  %620 = vmatprep.mubr.msk.bf16.mxu1 %vm214_vm0, %v734_v29 }
  0x51   :  { %300 = vmatmul.mubr.bf16.gmra.mxu0 %v736_v30  ;;  %332 = vmatmul.mubr.bf16.gmra.mxu1 %v737_v31 }
  0xf9   :  { %v277_v33 = vpop.f32.mrf.mxu0  ;;  %v309_v35 = vpop.f32.mrf.mxu1 }
  0xfa   :  { %v347_v36 = vmul.f32 %v957_v32, %v277_v33  ;;  %v355_v37 = vmul.f32 %v957_v32, %v309_v35 }
  0xfb   :  { %v279_v38 = vpop.f32.mrf.mxu0  ;;  %v311_v39 = vpop.f32.mrf.mxu1 }
  0xfc   :  { %v967_v40 = vadd.f32 %v962_v34, %v347_v36  ;;  %v970_v41 = vadd.f32 %v962_v34, %v355_v37 }
  0xfd   :  { %v280_v42 = vpop.f32.mrf.mxu0  ;;  %v312_v43 = vpop.f32.mrf.mxu1 }
  0xfe   :  { %v623_v44 = vmul.f32 -1.442695, %v967_v40  ;;  %v631_v45 = vmul.f32 -1.442695, %v970_v41  ;;  %v348_v46 = vmul.f32 %v957_v32, %v280_v42  ;;  %v356_v47 = vmul.f32 %v957_v32, %v312_v43 }
  0xff   :  { %v282_v48 = vpop.f32.mrf.mxu0  ;;  %v314_v49 = vpop.f32.mrf.mxu1 }
 0x100   :  { %738 = vpow2.f32 %v623_v44  ;;  %v977_v50 = vadd.f32 %v962_v34, %v348_v46  ;;  %v980_v51 = vadd.f32 %v962_v34, %v356_v47 }
 0x101   :  { %740 = vpow2.f32 %v631_v45  ;;  %v285_v52 = vpop.f32.mrf.mxu0  ;;  %v317_v53 = vpop.f32.mrf.mxu1 }
 0x102   :  { %v624_v54 = vmul.f32 -1.442695, %v977_v50  ;;  %v632_v55 = vmul.f32 -1.442695, %v980_v51  ;;  %v349_v56 = vmul.f32 %v957_v32, %v285_v52  ;;  %v357_v57 = vmul.f32 %v957_v32, %v317_v53 }
 0x103   :  { %v287_v58 = vpop.f32.mrf.mxu0  ;;  %v319_v59 = vpop.f32.mrf.mxu1 }
 0x104   :  { %742 = vpow2.f32 %v624_v54  ;;  %v987_v60 = vadd.f32 %v962_v34, %v349_v56  ;;  %v990_v61 = vadd.f32 %v962_v34, %v357_v57 }
 0x105   :  { %744 = vpow2.f32 %v632_v55  ;;  %v288_v62 = vpop.f32.mrf.mxu0  ;;  %v320_v63 = vpop.f32.mrf.mxu1 }
 0x106   :  { %v625_v0 = vmul.f32 -1.442695, %v987_v60  ;;  %v633_v1 = vmul.f32 -1.442695, %v990_v61  ;;  %v350_v2 = vmul.f32 %v957_v32, %v288_v62  ;;  %v358_v3 = vmul.f32 %v957_v32, %v320_v63 }
 0x107   :  { %v290_v4 = vpop.f32.mrf.mxu0  ;;  %v322_v5 = vpop.f32.mrf.mxu1 }
 0x108   :  { %746 = vpow2.f32 %v625_v0  ;;  %v997_v6 = vadd.f32 %v962_v34, %v350_v2  ;;  %v1000_v7 = vadd.f32 %v962_v34, %v358_v3 }
 0x109   :  { %748 = vpow2.f32 %v633_v1  ;;  %v293_v8 = vpop.f32.mrf.mxu0  ;;  %v325_v9 = vpop.f32.mrf.mxu1 }
 0x10a   :  { %v626_v10 = vmul.f32 -1.442695, %v997_v6  ;;  %v634_v11 = vmul.f32 -1.442695, %v1000_v7  ;;  %v351_v12 = vmul.f32 %v957_v32, %v293_v8  ;;  %v359_v13 = vmul.f32 %v957_v32, %v325_v9 }
 0x10b   :  { %v295_v14 = vpop.f32.mrf.mxu0  ;;  %v327_v15 = vpop.f32.mrf.mxu1 }
 0x10c   :  { %750 = vpow2.f32 %v626_v10  ;;  %v1007_v16 = vadd.f32 %v962_v34, %v351_v12  ;;  %v1010_v17 = vadd.f32 %v962_v34, %v359_v13 }
 0x10d   :  { %v739_v18 = vpop.eup %738  ;;  %752 = vpow2.f32 %v634_v11  ;;  %v296_v19 = vpop.f32.mrf.mxu0 }
 0x10e   :  { %v328_v20 = vpop.f32.mrf.mxu1  ;;  %v741_v21 = vpop.eup %740  ;;  %v434_v22 = vadd.f32 1.0, %v739_v18  ;;  %v627_v23 = vmul.f32 -1.442695, %v1007_v16  ;;  %v352_v24 = vmul.f32 %v957_v32, %v296_v19  ;;  %v635_v26 = vmul.f32 -1.442695, %v1010_v17 }
 0x10f   :  { %v442_v25 = vadd.f32 1.0, %v741_v21  ;;  %v360_v27 = vmul.f32 %v957_v32, %v328_v20  ;;  %v298_v28 = vpop.f32.mrf.mxu0 }
 0x110   :  { %v330_v29 = vpop.f32.mrf.mxu1  ;;  %754 = vrcp.f32 %v434_v22  ;;  %v1017_v30 = vadd.f32 %v962_v34, %v352_v24 }
 0x111   :  { %v743_v31 = vpop.eup %742  ;;  %756 = vrcp.f32 %v442_v25  ;;  %v1020_v33 = vadd.f32 %v962_v34, %v360_v27  ;;  %v301_v35 = vpop.f32.mrf.mxu0 }
 0x112   :  { %v333_v36 = vpop.f32.mrf.mxu1  ;;  %v745_v37 = vpop.eup %744  ;;  %v435_v38 = vadd.f32 1.0, %v743_v31  ;;  %758 = vpow2.f32 %v627_v23  ;;  %v628_v39 = vmul.f32 -1.442695, %v1017_v30  ;;  %v353_v42 = vmul.f32 %v957_v32, %v301_v35 }
 0x113   :  { %v443_v43 = vadd.f32 1.0, %v745_v37  ;;  %760 = vpow2.f32 %v635_v26  ;;  %v636_v44 = vmul.f32 -1.442695, %v1020_v33  ;;  %v361_v45 = vmul.f32 %v957_v32, %v333_v36  ;;  %v303_v46 = vpop.f32.mrf.mxu0 }
 0x114   :  { %v335_v47 = vpop.f32.mrf.mxu1  ;;  %762 = vrcp.f32 %v435_v38  ;;  %v1027_v48 = vadd.f32 %v962_v34, %v353_v42 }
 0x115   :  { %v747_v49 = vpop.eup %746  ;;  %764 = vrcp.f32 %v443_v43  ;;  %v1030_v52 = vadd.f32 %v962_v34, %v361_v45  ;;  %v304_v53 = vpop.f32.mrf.mxu0 }
 0x116   :  { %v336_v54 = vpop.f32.mrf.mxu1  ;;  %v749_v55 = vpop.eup %748  ;;  %v436_v56 = vadd.f32 1.0, %v747_v49  ;;  %766 = vpow2.f32 %v628_v39  ;;  %v629_v57 = vmul.f32 -1.442695, %v1027_v48  ;;  %v354_v58 = vmul.f32 %v957_v32, %v304_v53 }
 0x117   :  { %v444_v59 = vadd.f32 1.0, %v749_v55  ;;  %768 = vpow2.f32 %v636_v44  ;;  %v637_v62 = vmul.f32 -1.442695, %v1030_v52  ;;  %v362_v63 = vmul.f32 %v957_v32, %v336_v54  ;;  %v306_v0 = vpop.f32.mrf.mxu0 }
 0x118   :  { %v338_v1 = vpop.f32.mrf.mxu1  ;;  %770 = vrcp.f32 %v436_v56  ;;  %v1037_v2 = vadd.f32 %v962_v34, %v354_v58 }
 0x119   :  { %v751_v3 = vpop.eup %750  ;;  %772 = vrcp.f32 %v444_v59  ;;  %v1040_v4 = vadd.f32 %v962_v34, %v362_v63 }
 0x11a   :  { %v753_v5 = vpop.eup %752  ;;  %v437_v8 = vadd.f32 1.0, %v751_v3  ;;  %774 = vpow2.f32 %v629_v57  ;;  %v630_v9 = vmul.f32 -1.442695, %v1037_v2 }
 0x11b   :  { %v445_v10 = vadd.f32 1.0, %v753_v5  ;;  %776 = vpow2.f32 %v637_v62  ;;  %v638_v32 = vmul.f32 -1.442695, %v1040_v4 }
 0x11c   :  { %778 = vrcp.f32 %v437_v8 }
 0x11d   :  { %v755_v11 = vpop.eup %754  ;;  %780 = vrcp.f32 %v445_v10 }
 0x11e   :  { %v757_v12 = vpop.eup %756  ;;  %v482_v13 = vmul.f32 %v755_v11, %v967_v40  ;;  %782 = vpow2.f32 %v630_v9 }
 0x11f   :  { %v759_v14 = vpop.eup %758  ;;  %v490_v34 = vmul.f32 %v757_v12, %v970_v41  ;;  %784 = vpow2.f32 %v638_v32 }
 0x120   :  { %v761_v15 = vpop.eup %760  ;;  %v655_v18 = vpack.c.bf16 %v482_v13, %v482_v13  ;;  %v438_v19 = vadd.f32 1.0, %v759_v14 }
 0x121   :  { %v763_v20 = vpop.eup %762  ;;  %v663_v21 = vpack.c.bf16 %v490_v34, %v490_v34  ;;  %v446_v22 = vadd.f32 1.0, %v761_v15 }
 0x122   :  { %v765_v23 = vpop.eup %764  ;;  %563 = vst.msk [vmem:[%s1128_s4] sm:$0xf] %vm562_vm2, %v655_v18  ;;  %v483_v40 = vmul.f32 %v763_v20, %v977_v50  ;;  %786 = vrcp.f32 %v438_v19 }
 0x123   :  { %v767_v24 = vpop.eup %766  ;;  %571 = vst.msk [vmem:[%s1128_s4 + $0x20] sm:$0xf] %vm562_vm2, %v663_v21  ;;  %v491_v41 = vmul.f32 %v765_v23, %v980_v51  ;;  %788 = vrcp.f32 %v446_v22 }
 0x124   :  { %v769_v25 = vpop.eup %768  ;;  %v656_v26 = vpack.c.bf16 %v483_v40, %v483_v40  ;;  %v439_v27 = vadd.f32 1.0, %v767_v24 }
 0x125   :  { %v771_v28 = vpop.eup %770  ;;  %v664_v29 = vpack.c.bf16 %v491_v41, %v491_v41  ;;  %v447_v31 = vadd.f32 1.0, %v769_v25 }
 0x126   :  { %v773_v35 = vpop.eup %772  ;;  %564 = vst.msk [vmem:[%s1128_s4 + $0x4] sm:$0xf] %vm562_vm2, %v656_v26  ;;  %v484_v50 = vmul.f32 %v771_v28, %v987_v60  ;;  %790 = vrcp.f32 %v439_v27 }
 0x127   :  { %v775_v36 = vpop.eup %774  ;;  %572 = vst.msk [vmem:[%s1128_s4 + $0x24] sm:$0xf] %vm562_vm2, %v664_v29  ;;  %v492_v51 = vmul.f32 %v773_v35, %v990_v61  ;;  %792 = vrcp.f32 %v447_v31 }
 0x128   :  { %v777_v37 = vpop.eup %776  ;;  %v657_v38 = vpack.c.bf16 %v484_v50, %v484_v50  ;;  %v440_v39 = vadd.f32 1.0, %v775_v36 }
 0x129   :  { %v779_v42 = vpop.eup %778  ;;  %v665_v43 = vpack.c.bf16 %v492_v51, %v492_v51  ;;  %v448_v44 = vadd.f32 1.0, %v777_v37 }
 0x12a   :  { %v781_v45 = vpop.eup %780  ;;  %565 = vst.msk [vmem:[%s1128_s4 + $0x8] sm:$0xf] %vm562_vm2, %v657_v38  ;;  %v485_v60 = vmul.f32 %v779_v42, %v997_v6  ;;  %794 = vrcp.f32 %v440_v39 }
 0x12b   :  { %v783_v46 = vpop.eup %782  ;;  %573 = vst.msk [vmem:[%s1128_s4 + $0x28] sm:$0xf] %vm562_vm2, %v665_v43  ;;  %v493_v61 = vmul.f32 %v781_v45, %v1000_v7  ;;  %796 = vrcp.f32 %v448_v44 }
 0x12c   :  { %v785_v47 = vpop.eup %784  ;;  %v658_v49 = vpack.c.bf16 %v485_v60, %v485_v60  ;;  %v441_v53 = vadd.f32 1.0, %v783_v46 }
 0x12d   :  { %v666_v54 = vpack.c.bf16 %v493_v61, %v493_v61  ;;  %v449_v55 = vadd.f32 1.0, %v785_v47 }
 0x12e   :  { %566 = vst.msk [vmem:[%s1128_s4 + $0xc] sm:$0xf] %vm562_vm2, %v658_v49  ;;  %798 = vrcp.f32 %v441_v53 }
 0x12f   :  { %v787_v6 = vpop.eup %786  ;;  %574 = vst.msk [vmem:[%s1128_s4 + $0x2c] sm:$0xf] %vm562_vm2, %v666_v54  ;;  %800 = vrcp.f32 %v449_v55 }
 0x130   :  { %v789_v7 = vpop.eup %788  ;;  %v486_v56 = vmul.f32 %v787_v6, %v1007_v16 }
 0x131   :  { %v494_v57 = vmul.f32 %v789_v7, %v1010_v17 }
 0x132   :  { %v659_v58 = vpack.c.bf16 %v486_v56, %v486_v56 }
 0x133   :  { %v791_v59 = vpop.eup %790  ;;  %v667_v62 = vpack.c.bf16 %v494_v57, %v494_v57 }
 0x134   :  { %v793_v63 = vpop.eup %792  ;;  %567 = vst.msk [vmem:[%s1128_s4 + $0x10] sm:$0xf] %vm562_vm2, %v659_v58  ;;  %v487_v0 = vmul.f32 %v791_v59, %v1017_v30 }
 0x135   :  { %575 = vst.msk [vmem:[%s1128_s4 + $0x30] sm:$0xf] %vm562_vm2, %v667_v62  ;;  %v495_v16 = vmul.f32 %v793_v63, %v1020_v33 }
 0x136   :  { %v660_v1 = vpack.c.bf16 %v487_v0, %v487_v0 }
 0x137   :  { %v795_v17 = vpop.eup %794  ;;  %v668_v3 = vpack.c.bf16 %v495_v16, %v495_v16 }
 0x138   :  { %v797_v5 = vpop.eup %796  ;;  %568 = vst.msk [vmem:[%s1128_s4 + $0x14] sm:$0xf] %vm562_vm2, %v660_v1  ;;  %v488_v8 = vmul.f32 %v795_v17, %v1027_v48 }
 0x139   :  { %576 = vst.msk [vmem:[%s1128_s4 + $0x34] sm:$0xf] %vm562_vm2, %v668_v3  ;;  %v496_v30 = vmul.f32 %v797_v5, %v1030_v52 }
 0x13a   :  { %v661_v9 = vpack.c.bf16 %v488_v8, %v488_v8 }
 0x13b   :  { %v799_v33 = vpop.eup %798  ;;  %v669_v10 = vpack.c.bf16 %v496_v30, %v496_v30 }
 0x13c   :  { %v801_v32 = vpop.eup %800  ;;  %569 = vst.msk [vmem:[%s1128_s4 + $0x18] sm:$0xf] %vm562_vm2, %v661_v9  ;;  %v489_v11 = vmul.f32 %v799_v33, %v1037_v2 }
 0x13d   :  { %577 = vst.msk [vmem:[%s1128_s4 + $0x38] sm:$0xf] %vm562_vm2, %v669_v10  ;;  %v497_v48 = vmul.f32 %v801_v32, %v1040_v4 }
 0x13e   :  { %v662_v12 = vpack.c.bf16 %v489_v11, %v489_v11 }
 0x13f   :  { %v670_v52 = vpack.c.bf16 %v497_v48, %v497_v48 }
 0x140   :  { %570 = vst.msk [vmem:[%s1128_s4 + $0x1c] sm:$0xf] %vm562_vm2, %v662_v12 }
 0x141   :  { %578 = vst.msk [vmem:[%s1128_s4 + $0x3c] sm:$0xf] %vm562_vm2, %v670_v52 }

// kernel: efficientnet_forward.15
= control target key start
LH: loop header
LB: loop body
LE: loop exit
PB: predicated region body
PF: predicated region fallthrough
CT: control target
= control target key end

     0   :  { %vm111_vm0 = vcmask 1043456   ;;  %vm86_vm1 = vcmask 195584   ;;  %vm322_vm2 = vcmask 125952   ;;  %s610_s1 = inlined_call_operand.vmem [shape: bf16[24,16], index: 1, kind: input, shape index: {}]   ;;  %s611_s0 = inlined_call_operand.vmem [shape: bf16[1,128,24], index: 0, kind: input, shape index: {}]   ;;  %s612_s2 = inlined_call_operand.vmem [shape: f32[1,16], index: 2, kind: input, shape index: {}]   ;;  %s613_s3 = inlined_call_operand.vmem [shape: f32[1,16], index: 3, kind: input, shape index: {}]   ;;  %s614_s4 = inlined_call_operand.vmem [shape: bf16[1,128,16], index: 4, kind: output, shape index: {}]  }
   0x1   :  { %v431_v0 = vld [vmem:[%s610_s1 + $0x8] ss:$0 sps:$4 sm:$0xff]   ;;  %v432_v1 = vld [vmem:[%s610_s1] sm:$0xff]   ;;  %v437_v7 = vld [vmem:[%s611_s0 + $0x10] sm:$0xff]  }
   0x2   :  { %429 = vmatprep.subr.msk.bf16.mxu0 %vm111_vm0, %v431_v0  ;;  %430 = vmatprep.subr.msk.bf16.mxu1 %vm111_vm0, %v431_v0  ;;  %v113_v2 = vsel %vm111_vm0, %v431_v0, 0  ;;  %v433_v3 = vld [vmem:[%s611_s0] sm:$0xff]   ;;  %v435_v5 = vld [vmem:[%s611_s0 + $0x8] sm:$0xff]   ;;  %v438_v8 = vld [vmem:[%s611_s0 + $0x30] sm:$0xff]  }
   0x3   :  { %406 = vmatpush3.bf16.msra.mxu0 %v113_v2  ;;  %427 = vmatpush3.bf16.msra.mxu1 %v113_v2  ;;  %v434_v4 = vld [vmem:[%s611_s0 + $0x20] sm:$0xff]   ;;  %v436_v6 = vld [vmem:[%s611_s0 + $0x28] sm:$0xff]   ;;  %v439_v9 = vld [vmem:[%s611_s0 + $0x18] sm:$0xff]  }
   0x4   :  { %407 = vmatprep.subr.bf16.mxu0 %v432_v1  ;;  %426 = vmatprep.subr.bf16.mxu1 %v432_v1  ;;  %v440_v10 = vld [vmem:[%s611_s0 + $0x38] sm:$0xff]   ;;  %v507_v11 = vld [vmem:[%s612_s2] ss:$0 sm:$0xff] }
   0x5   :  { %409 = vmatprep.mubr.msk.bf16.mxu0 %vm86_vm1, %v433_v3  ;;  %417 = vmatprep.mubr.msk.bf16.mxu1 %vm86_vm1, %v434_v4  ;;  %v512_v13 = vld [vmem:[%s613_s3] ss:$0 sm:$0xff] }
   0x7   :  { %408 = vmatpush3.bf16.msra.mxu0 %v432_v1  ;;  %428 = vmatpush3.bf16.msra.mxu1 %v432_v1 }
   0xa   :  { %410 = vmatmul.mubr.msk.bf16.vlgmr.msra.gmra.mxu0 %vm86_vm1, %v435_v5  ;;  %418 = vmatmul.mubr.msk.bf16.vlgmr.msra.gmra.mxu1 %vm86_vm1, %v436_v6 }
   0xb   :  { %413 = vmatprep.mubr.msk.bf16.mxu0 %vm86_vm1, %v437_v7  ;;  %421 = vmatprep.mubr.msk.bf16.mxu1 %vm86_vm1, %v438_v8 }
  0x12   :  { %414 = vmatmul.mubr.msk.bf16.gmra.mxu0 %vm86_vm1, %v439_v9  ;;  %422 = vmatmul.mubr.msk.bf16.gmra.mxu1 %vm86_vm1, %v440_v10 }
  0xca   :  { %v411_v12 = vpop.f32.mrf.mxu0  ;;  %v419_v14 = vpop.f32.mrf.mxu1 }
  0xcb   :  { %v221_v15 = vmul.f32 %v411_v12, %v507_v11  ;;  %v229_v16 = vmul.f32 %v419_v14, %v507_v11 }
  0xcc   :  { %v149_v17 = vpop.f32.mrf.mxu0  ;;  %v181_v18 = vpop.f32.mrf.mxu1 }
  0xcd   :  { %v244_v19 = vadd.f32 %v512_v13, %v221_v15  ;;  %v252_v20 = vadd.f32 %v512_v13, %v229_v16  ;;  %v219_v21 = vmul.f32 %v507_v11, %v149_v17  ;;  %v227_v22 = vmul.f32 %v507_v11, %v181_v18 }
  0xce   :  { %v412_v23 = vpop.f32.mrf.mxu0  ;;  %v420_v24 = vpop.f32.mrf.mxu1 }
  0xcf   :  { %v381_v25 = vpack.c.bf16 %v244_v19, %v244_v19  ;;  %v389_v26 = vpack.c.bf16 %v252_v20, %v252_v20  ;;  %v242_v27 = vadd.f32 %v512_v13, %v219_v21  ;;  %v250_v28 = vadd.f32 %v512_v13, %v227_v22 }
  0xd0   :  { %v222_v29 = vmul.f32 %v412_v23, %v507_v11  ;;  %v230_v30 = vmul.f32 %v420_v24, %v507_v11  ;;  %v152_v31 = vpop.f32.mrf.mxu0  ;;  %v184_v32 = vpop.f32.mrf.mxu1 }
  0xd1   :  { %325 = vst.msk [vmem:[%s614_s4 + $0x8] sm:$0xf] %vm322_vm2, %v381_v25  ;;  %333 = vst.msk [vmem:[%s614_s4 + $0x28] sm:$0xf] %vm322_vm2, %v389_v26  ;;  %v379_v33 = vpack.c.bf16 %v242_v27, %v242_v27  ;;  %v387_v34 = vpack.c.bf16 %v250_v28, %v250_v28  ;;  %v220_v35 = vmul.f32 %v507_v11, %v152_v31 }
  0xd2   :  { %v228_v36 = vmul.f32 %v507_v11, %v184_v32  ;;  %v245_v37 = vadd.f32 %v512_v13, %v222_v29  ;;  %v253_v38 = vadd.f32 %v512_v13, %v230_v30  ;;  %v415_v39 = vpop.f32.mrf.mxu0  ;;  %v423_v40 = vpop.f32.mrf.mxu1 }
  0xd3   :  { %323 = vst.msk [vmem:[%s614_s4] sm:$0xf] %vm322_vm2, %v379_v33  ;;  %331 = vst.msk [vmem:[%s614_s4 + $0x20] sm:$0xf] %vm322_vm2, %v387_v34  ;;  %v243_v41 = vadd.f32 %v512_v13, %v220_v35  ;;  %v225_v43 = vmul.f32 %v415_v39, %v507_v11  ;;  %v233_v44 = vmul.f32 %v423_v40, %v507_v11 }
  0xd4   :  { %v251_v42 = vadd.f32 %v512_v13, %v228_v36  ;;  %v382_v45 = vpack.c.bf16 %v245_v37, %v245_v37  ;;  %v390_v46 = vpack.c.bf16 %v253_v38, %v253_v38  ;;  %v165_v47 = vpop.f32.mrf.mxu0  ;;  %v197_v48 = vpop.f32.mrf.mxu1 }
  0xd5   :  { %v380_v49 = vpack.c.bf16 %v243_v41, %v243_v41  ;;  %v248_v51 = vadd.f32 %v512_v13, %v225_v43  ;;  %v256_v52 = vadd.f32 %v512_v13, %v233_v44  ;;  %v223_v53 = vmul.f32 %v507_v11, %v165_v47 }
  0xd6   :  { %v388_v50 = vpack.c.bf16 %v251_v42, %v251_v42  ;;  %326 = vst.msk [vmem:[%s614_s4 + $0xc] sm:$0xf] %vm322_vm2, %v382_v45  ;;  %334 = vst.msk [vmem:[%s614_s4 + $0x2c] sm:$0xf] %vm322_vm2, %v390_v46  ;;  %v231_v54 = vmul.f32 %v507_v11, %v197_v48  ;;  %v416_v55 = vpop.f32.mrf.mxu0  ;;  %v424_v56 = vpop.f32.mrf.mxu1 }
  0xd7   :  { %324 = vst.msk [vmem:[%s614_s4 + $0x4] sm:$0xf] %vm322_vm2, %v380_v49  ;;  %v385_v57 = vpack.c.bf16 %v248_v51, %v248_v51  ;;  %v393_v58 = vpack.c.bf16 %v256_v52, %v256_v52  ;;  %v226_v59 = vmul.f32 %v416_v55, %v507_v11  ;;  %v234_v60 = vmul.f32 %v424_v56, %v507_v11 }
  0xd8   :  { %332 = vst.msk [vmem:[%s614_s4 + $0x24] sm:$0xf] %vm322_vm2, %v388_v50  ;;  %v246_v61 = vadd.f32 %v512_v13, %v223_v53  ;;  %v254_v62 = vadd.f32 %v512_v13, %v231_v54  ;;  %v168_v63 = vpop.f32.mrf.mxu0  ;;  %v200_v0 = vpop.f32.mrf.mxu1 }
  0xd9   :  { %329 = vst.msk [vmem:[%s614_s4 + $0x18] sm:$0xf] %vm322_vm2, %v385_v57  ;;  %337 = vst.msk [vmem:[%s614_s4 + $0x38] sm:$0xf] %vm322_vm2, %v393_v58  ;;  %v249_v1 = vadd.f32 %v512_v13, %v226_v59  ;;  %v257_v2 = vadd.f32 %v512_v13, %v234_v60  ;;  %v224_v3 = vmul.f32 %v507_v11, %v168_v63 }
  0xda   :  { %v232_v4 = vmul.f32 %v507_v11, %v200_v0  ;;  %v383_v5 = vpack.c.bf16 %v246_v61, %v246_v61  ;;  %v391_v6 = vpack.c.bf16 %v254_v62, %v254_v62 }
  0xdb   :  { %v386_v7 = vpack.c.bf16 %v249_v1, %v249_v1  ;;  %v394_v8 = vpack.c.bf16 %v257_v2, %v257_v2  ;;  %v247_v9 = vadd.f32 %v512_v13, %v224_v3 }
  0xdc   :  { %v255_v10 = vadd.f32 %v512_v13, %v232_v4  ;;  %327 = vst.msk [vmem:[%s614_s4 + $0x10] sm:$0xf] %vm322_vm2, %v383_v5  ;;  %335 = vst.msk [vmem:[%s614_s4 + $0x30] sm:$0xf] %vm322_vm2, %v391_v6 }
  0xdd   :  { %330 = vst.msk [vmem:[%s614_s4 + $0x1c] sm:$0xf] %vm322_vm2, %v386_v7  ;;  %338 = vst.msk [vmem:[%s614_s4 + $0x3c] sm:$0xf] %vm322_vm2, %v394_v8  ;;  %v384_v11 = vpack.c.bf16 %v247_v9, %v247_v9 }
  0xde   :  { %v392_v12 = vpack.c.bf16 %v255_v10, %v255_v10 }
  0xdf   :  { %328 = vst.msk [vmem:[%s614_s4 + $0x14] sm:$0xf] %vm322_vm2, %v384_v11 }
  0xe0   :  { %336 = vst.msk [vmem:[%s614_s4 + $0x34] sm:$0xf] %vm322_vm2, %v392_v12 }

// kernel: efficientnet_forward.16
= control target key start
LH: loop header
LB: loop body
LE: loop exit
PB: predicated region body
PF: predicated region fallthrough
CT: control target
= control target key end

     0   :  { %vm82_vm0 = vcmask 130048   ;;  %vm426_vm1 = vcmask 519168   ;;  %s846_s1 = inlined_call_operand.vmem [shape: bf16[16,64], index: 1, kind: input, shape index: {}]   ;;  %s847_s0 = inlined_call_operand.vmem [shape: bf16[1,128,16], index: 0, kind: input, shape index: {}]   ;;  %s848_s2 = inlined_call_operand.vmem [shape: f32[1,64], index: 2, kind: input, shape index: {}]   ;;  %s849_s3 = inlined_call_operand.vmem [shape: f32[1,64], index: 3, kind: input, shape index: {}]   ;;  %s850_s4 = inlined_call_operand.vmem [shape: bf16[1,128,64], index: 4, kind: output, shape index: {}]  }
   0x1   :  { %v543_v0 = vld [vmem:[%s846_s1] sm:$0xff]   ;;  %v546_v3 = vld [vmem:[%s847_s0 + $0x8] sm:$0xff]   ;;  %v548_v5 = vld [vmem:[%s847_s0 + $0x10] sm:$0xff]  }
   0x2   :  { %v544_v1 = vld [vmem:[%s847_s0] sm:$0xff]   ;;  %523 = vmatprep.subr.bf16.mxu0 %v543_v0  ;;  %541 = vmatprep.subr.bf16.mxu1 %v543_v0  ;;  %v547_v4 = vld [vmem:[%s847_s0 + $0x28] sm:$0xff]   ;;  %v549_v6 = vld [vmem:[%s847_s0 + $0x30] sm:$0xff]  }
   0x3   :  { %v545_v2 = vld [vmem:[%s847_s0 + $0x20] sm:$0xff]   ;;  %524 = vmatpush3.bf16.msra.mxu0 %v543_v0  ;;  %542 = vmatpush3.bf16.msra.mxu1 %v543_v0  ;;  %v550_v7 = vld [vmem:[%s847_s0 + $0x18] sm:$0xff]  }
   0x4   :  { %525 = vmatprep.mubr.msk.bf16.mxu0 %vm82_vm0, %v544_v1  ;;  %533 = vmatprep.mubr.msk.bf16.mxu1 %vm82_vm0, %v545_v2  ;;  %v551_v8 = vld [vmem:[%s847_s0 + $0x38] sm:$0xff]   ;;  %v679_v9 = vld [vmem:[%s848_s2] ss:$0 sm:$0xff] }
   0x5   :  { %v684_v11 = vld [vmem:[%s849_s3] ss:$0 sm:$0xff] }
   0x6   :  { %526 = vmatmul.mubr.msk.bf16.vlgmr.msra.gmra.mxu0 %vm82_vm0, %v546_v3  ;;  %534 = vmatmul.mubr.msk.bf16.vlgmr.msra.gmra.mxu1 %vm82_vm0, %v547_v4 }
   0x7   :  { %529 = vmatprep.mubr.msk.bf16.mxu0 %vm82_vm0, %v548_v5  ;;  %537 = vmatprep.mubr.msk.bf16.mxu1 %vm82_vm0, %v549_v6 }
   0xe   :  { %530 = vmatmul.mubr.msk.bf16.gmra.mxu0 %vm82_vm0, %v550_v7  ;;  %538 = vmatmul.mubr.msk.bf16.gmra.mxu1 %vm82_vm0, %v551_v8 }
  0xc6   :  { %v527_v10 = vpop.f32.mrf.mxu0  ;;  %v535_v12 = vpop.f32.mrf.mxu1 }
  0xc7   :  { %v213_v13 = vmul.f32 %v527_v10, %v679_v9  ;;  %v221_v14 = vmul.f32 %v535_v12, %v679_v9 }
  0xc8   :  { %v141_v15 = vpop.f32.mrf.mxu0  ;;  %v173_v16 = vpop.f32.mrf.mxu1 }
  0xc9   :  { %v689_v17 = vadd.f32 %v684_v11, %v213_v13  ;;  %v692_v18 = vadd.f32 %v684_v11, %v221_v14  ;;  %v211_v19 = vmul.f32 %v679_v9, %v141_v15  ;;  %v219_v20 = vmul.f32 %v679_v9, %v173_v16 }
  0xca   :  { %v528_v21 = vpop.f32.mrf.mxu0  ;;  %v536_v22 = vpop.f32.mrf.mxu1 }
  0xcb   :  { %v468_v23 = vmul.f32 -1.442695, %v689_v17  ;;  %v476_v24 = vmul.f32 -1.442695, %v692_v18  ;;  %v699_v25 = vadd.f32 %v684_v11, %v211_v19  ;;  %v702_v26 = vadd.f32 %v684_v11, %v219_v20 }
  0xcc   :  { %v214_v27 = vmul.f32 %v528_v21, %v679_v9  ;;  %v222_v28 = vmul.f32 %v536_v22, %v679_v9  ;;  %v144_v29 = vpop.f32.mrf.mxu0  ;;  %v176_v30 = vpop.f32.mrf.mxu1 }
  0xcd   :  { %552 = vpow2.f32 %v468_v23  ;;  %v466_v31 = vmul.f32 -1.442695, %v699_v25  ;;  %v474_v32 = vmul.f32 -1.442695, %v702_v26  ;;  %v212_v33 = vmul.f32 %v679_v9, %v144_v29 }
  0xce   :  { %554 = vpow2.f32 %v476_v24  ;;  %v710_v34 = vadd.f32 %v684_v11, %v214_v27  ;;  %v713_v35 = vadd.f32 %v684_v11, %v222_v28  ;;  %v220_v36 = vmul.f32 %v679_v9, %v176_v30  ;;  %v531_v37 = vpop.f32.mrf.mxu0  ;;  %v539_v38 = vpop.f32.mrf.mxu1 }
  0xcf   :  { %556 = vpow2.f32 %v466_v31  ;;  %v717_v39 = vadd.f32 %v684_v11, %v212_v33  ;;  %v217_v40 = vmul.f32 %v531_v37, %v679_v9  ;;  %v225_v41 = vmul.f32 %v539_v38, %v679_v9 }
  0xd0   :  { %558 = vpow2.f32 %v474_v32  ;;  %v469_v42 = vmul.f32 -1.442695, %v710_v34  ;;  %v477_v43 = vmul.f32 -1.442695, %v713_v35  ;;  %v724_v44 = vadd.f32 %v684_v11, %v220_v36  ;;  %v157_v45 = vpop.f32.mrf.mxu0  ;;  %v189_v46 = vpop.f32.mrf.mxu1 }
  0xd1   :  { %v467_v47 = vmul.f32 -1.442695, %v717_v39  ;;  %v728_v48 = vadd.f32 %v684_v11, %v217_v40  ;;  %v731_v49 = vadd.f32 %v684_v11, %v225_v41  ;;  %v215_v50 = vmul.f32 %v679_v9, %v157_v45 }
  0xd2   :  { %560 = vpow2.f32 %v469_v42  ;;  %v475_v51 = vmul.f32 -1.442695, %v724_v44  ;;  %v223_v52 = vmul.f32 %v679_v9, %v189_v46  ;;  %v532_v53 = vpop.f32.mrf.mxu0  ;;  %v540_v54 = vpop.f32.mrf.mxu1 }
  0xd3   :  { %562 = vpow2.f32 %v477_v43  ;;  %v472_v55 = vmul.f32 -1.442695, %v728_v48  ;;  %v480_v56 = vmul.f32 -1.442695, %v731_v49  ;;  %v739_v57 = vadd.f32 %v684_v11, %v215_v50 }
  0xd4   :  { %564 = vpow2.f32 %v467_v47  ;;  %v742_v58 = vadd.f32 %v684_v11, %v223_v52  ;;  %v218_v59 = vmul.f32 %v532_v53, %v679_v9  ;;  %v226_v60 = vmul.f32 %v540_v54, %v679_v9  ;;  %v160_v61 = vpop.f32.mrf.mxu0  ;;  %v192_v62 = vpop.f32.mrf.mxu1 }
  0xd5   :  { %566 = vpow2.f32 %v475_v51  ;;  %v470_v63 = vmul.f32 -1.442695, %v739_v57  ;;  %v216_v0 = vmul.f32 %v679_v9, %v160_v61  ;;  %v224_v1 = vmul.f32 %v679_v9, %v192_v62 }
  0xd6   :  { %568 = vpow2.f32 %v472_v55  ;;  %v478_v2 = vmul.f32 -1.442695, %v742_v58  ;;  %v751_v3 = vadd.f32 %v684_v11, %v218_v59  ;;  %v754_v4 = vadd.f32 %v684_v11, %v226_v60 }
  0xd7   :  { %570 = vpow2.f32 %v480_v56  ;;  %v757_v5 = vadd.f32 %v684_v11, %v216_v0  ;;  %v763_v9 = vadd.f32 %v684_v11, %v224_v1 }
  0xd8   :  { %572 = vpow2.f32 %v470_v63  ;;  %v473_v6 = vmul.f32 -1.442695, %v751_v3  ;;  %v481_v7 = vmul.f32 -1.442695, %v754_v4 }
  0xd9   :  { %574 = vpow2.f32 %v478_v2  ;;  %v471_v8 = vmul.f32 -1.442695, %v757_v5  ;;  %v479_v20 = vmul.f32 -1.442695, %v763_v9 }
  0xda   :  { %v553_v10 = vpop.eup %552  ;;  %576 = vpow2.f32 %v473_v6 }
  0xdb   :  { %v555_v12 = vpop.eup %554  ;;  %v300_v13 = vadd.f32 1.0, %v553_v10  ;;  %578 = vpow2.f32 %v481_v7 }
  0xdc   :  { %v557_v14 = vpop.eup %556  ;;  %v308_v15 = vadd.f32 1.0, %v555_v12  ;;  %580 = vpow2.f32 %v471_v8 }
  0xdd   :  { %v559_v16 = vpop.eup %558  ;;  %582 = vrcp.f32 %v300_v13  ;;  %v298_v19 = vadd.f32 1.0, %v557_v14 }
  0xde   :  { %584 = vrcp.f32 %v308_v15  ;;  %v306_v21 = vadd.f32 1.0, %v559_v16 }
  0xdf   :  { %v561_v22 = vpop.eup %560  ;;  %586 = vrcp.f32 %v298_v19 }
  0xe0   :  { %v563_v23 = vpop.eup %562  ;;  %588 = vrcp.f32 %v306_v21  ;;  %v301_v11 = vadd.f32 1.0, %v561_v22 }
  0xe1   :  { %v565_v24 = vpop.eup %564  ;;  %v309_v27 = vadd.f32 1.0, %v563_v23  ;;  %590 = vpow2.f32 %v479_v20 }
  0xe2   :  { %v567_v28 = vpop.eup %566  ;;  %592 = vrcp.f32 %v301_v11  ;;  %v299_v29 = vadd.f32 1.0, %v565_v24 }
  0xe3   :  { %v569_v30 = vpop.eup %568  ;;  %594 = vrcp.f32 %v309_v27  ;;  %v307_v31 = vadd.f32 1.0, %v567_v28 }
  0xe4   :  { %v571_v32 = vpop.eup %570  ;;  %596 = vrcp.f32 %v299_v29  ;;  %v304_v33 = vadd.f32 1.0, %v569_v30 }
  0xe5   :  { %v573_v36 = vpop.eup %572  ;;  %598 = vrcp.f32 %v307_v31  ;;  %v312_v37 = vadd.f32 1.0, %v571_v32 }
  0xe6   :  { %v575_v38 = vpop.eup %574  ;;  %600 = vrcp.f32 %v304_v33  ;;  %v302_v40 = vadd.f32 1.0, %v573_v36 }
  0xe7   :  { %v577_v41 = vpop.eup %576  ;;  %602 = vrcp.f32 %v312_v37  ;;  %v310_v42 = vadd.f32 1.0, %v575_v38 }
  0xe8   :  { %v579_v43 = vpop.eup %578  ;;  %604 = vrcp.f32 %v302_v40  ;;  %v305_v45 = vadd.f32 1.0, %v577_v41 }
  0xe9   :  { %v581_v46 = vpop.eup %580  ;;  %606 = vrcp.f32 %v310_v42  ;;  %v313_v47 = vadd.f32 1.0, %v579_v43 }
  0xea   :  { %v583_v50 = vpop.eup %582  ;;  %608 = vrcp.f32 %v305_v45  ;;  %v303_v51 = vadd.f32 1.0, %v581_v46 }
  0xeb   :  { %v585_v52 = vpop.eup %584  ;;  %v348_v53 = vmul.f32 %v583_v50, %v689_v17  ;;  %610 = vrcp.f32 %v313_v47 }
  0xec   :  { %v587_v54 = vpop.eup %586  ;;  %v356_v55 = vmul.f32 %v585_v52, %v692_v18  ;;  %612 = vrcp.f32 %v303_v51 }
  0xed   :  { %v589_v56 = vpop.eup %588  ;;  %v500_v59 = vpack.c.bf16 %v348_v53, %v348_v53  ;;  %v346_v60 = vmul.f32 %v587_v54, %v699_v25 }
  0xee   :  { %v591_v61 = vpop.eup %590  ;;  %v508_v62 = vpack.c.bf16 %v356_v55, %v356_v55  ;;  %v354_v63 = vmul.f32 %v589_v56, %v702_v26 }
  0xef   :  { %v593_v0 = vpop.eup %592  ;;  %429 = vst.msk [vmem:[%s850_s4 + $0x8] sm:$0xf] %vm426_vm1, %v500_v59  ;;  %v498_v17 = vpack.c.bf16 %v346_v60, %v346_v60  ;;  %v311_v1 = vadd.f32 1.0, %v591_v61 }
  0xf0   :  { %v595_v2 = vpop.eup %594  ;;  %437 = vst.msk [vmem:[%s850_s4 + $0x28] sm:$0xf] %vm426_vm1, %v508_v62  ;;  %v506_v18 = vpack.c.bf16 %v354_v63, %v354_v63  ;;  %v349_v25 = vmul.f32 %v593_v0, %v710_v34 }
  0xf1   :  { %v597_v6 = vpop.eup %596  ;;  %427 = vst.msk [vmem:[%s850_s4] sm:$0xf] %vm426_vm1, %v498_v17  ;;  %v357_v26 = vmul.f32 %v595_v2, %v713_v35  ;;  %614 = vrcp.f32 %v311_v1 }
  0xf2   :  { %v599_v7 = vpop.eup %598  ;;  %435 = vst.msk [vmem:[%s850_s4 + $0x20] sm:$0xf] %vm426_vm1, %v506_v18  ;;  %v501_v8 = vpack.c.bf16 %v349_v25, %v349_v25  ;;  %v347_v10 = vmul.f32 %v597_v6, %v717_v39 }
  0xf3   :  { %v601_v12 = vpop.eup %600  ;;  %v509_v34 = vpack.c.bf16 %v357_v26, %v357_v26  ;;  %v355_v13 = vmul.f32 %v599_v7, %v724_v44 }
  0xf4   :  { %v603_v14 = vpop.eup %602  ;;  %430 = vst.msk [vmem:[%s850_s4 + $0xc] sm:$0xf] %vm426_vm1, %v501_v8  ;;  %v499_v35 = vpack.c.bf16 %v347_v10, %v347_v10  ;;  %v352_v15 = vmul.f32 %v601_v12, %v728_v48 }
  0xf5   :  { %v605_v16 = vpop.eup %604  ;;  %438 = vst.msk [vmem:[%s850_s4 + $0x2c] sm:$0xf] %vm426_vm1, %v509_v34  ;;  %v507_v39 = vpack.c.bf16 %v355_v13, %v355_v13  ;;  %v360_v19 = vmul.f32 %v603_v14, %v731_v49 }
  0xf6   :  { %v607_v20 = vpop.eup %606  ;;  %428 = vst.msk [vmem:[%s850_s4 + $0x4] sm:$0xf] %vm426_vm1, %v499_v35  ;;  %v504_v44 = vpack.c.bf16 %v352_v15, %v352_v15  ;;  %v350_v21 = vmul.f32 %v605_v16, %v739_v57 }
  0xf7   :  { %v609_v22 = vpop.eup %608  ;;  %436 = vst.msk [vmem:[%s850_s4 + $0x24] sm:$0xf] %vm426_vm1, %v507_v39  ;;  %v512_v48 = vpack.c.bf16 %v360_v19, %v360_v19  ;;  %v358_v23 = vmul.f32 %v607_v20, %v742_v58 }
  0xf8   :  { %v611_v11 = vpop.eup %610  ;;  %433 = vst.msk [vmem:[%s850_s4 + $0x18] sm:$0xf] %vm426_vm1, %v504_v44  ;;  %v502_v49 = vpack.c.bf16 %v350_v21, %v350_v21  ;;  %v353_v24 = vmul.f32 %v609_v22, %v751_v3 }
  0xf9   :  { %v613_v27 = vpop.eup %612  ;;  %441 = vst.msk [vmem:[%s850_s4 + $0x38] sm:$0xf] %vm426_vm1, %v512_v48  ;;  %v510_v57 = vpack.c.bf16 %v358_v23, %v358_v23  ;;  %v361_v28 = vmul.f32 %v611_v11, %v754_v4 }
  0xfa   :  { %431 = vst.msk [vmem:[%s850_s4 + $0x10] sm:$0xf] %vm426_vm1, %v502_v49  ;;  %v505_v58 = vpack.c.bf16 %v353_v24, %v353_v24  ;;  %v351_v29 = vmul.f32 %v613_v27, %v757_v5 }
  0xfb   :  { %439 = vst.msk [vmem:[%s850_s4 + $0x30] sm:$0xf] %vm426_vm1, %v510_v57  ;;  %v513_v3 = vpack.c.bf16 %v361_v28, %v361_v28 }
  0xfc   :  { %434 = vst.msk [vmem:[%s850_s4 + $0x1c] sm:$0xf] %vm426_vm1, %v505_v58  ;;  %v503_v4 = vpack.c.bf16 %v351_v29, %v351_v29 }
  0xfd   :  { %442 = vst.msk [vmem:[%s850_s4 + $0x3c] sm:$0xf] %vm426_vm1, %v513_v3 }
  0xfe   :  { %v615_v30 = vpop.eup %614  ;;  %432 = vst.msk [vmem:[%s850_s4 + $0x14] sm:$0xf] %vm426_vm1, %v503_v4 }
  0xff   :  { %v359_v5 = vmul.f32 %v615_v30, %v763_v9 }
 0x101   :  { %v511_v31 = vpack.c.bf16 %v359_v5, %v359_v5 }
 0x103   :  { %440 = vst.msk [vmem:[%s850_s4 + $0x34] sm:$0xf] %vm426_vm1, %v511_v31 }

// kernel: efficientnet_forward.19
= control target key start
LH: loop header
LB: loop body
LE: loop exit
PB: predicated region body
PF: predicated region fallthrough
CT: control target
= control target key end

     0   :  { %s627_s18 = smov 0   ;;  %s629_s19 = smov 0   ;;  %s681_s0 = inlined_call_operand.vmem [shape: bf16[2,16,64], index: 0, kind: input, shape index: {}]   ;;  %s682_s1 = inlined_call_operand.vmem [shape: bf16[64,24], index: 1, kind: input, shape index: {}]   ;;  %s683_s2 = inlined_call_operand.vmem [shape: f32[1,24], index: 2, kind: input, shape index: {}]   ;;  %s684_s3 = inlined_call_operand.vmem [shape: f32[1,24], index: 3, kind: input, shape index: {}]   ;;  %s685_s4 = inlined_call_operand.vmem [shape: f32[2,1,64], index: 4, kind: input, shape index: {}]   ;;  %s686_s5 = inlined_call_operand.vmem [shape: bf16[2,16,24], index: 5, kind: output, shape index: {}]  }
   0x1   :  { %s631_s20 = smov 0  }
   0x2 LB: > { %s27_s21 = sadd.s32 1, %s589_s19  ;;  %p499_p0 = scmp.ge.s32.totalorder %s593_s20, 1  ;;  %s593_s20 = sphi %s631_s20, %s15_s20   ;;  %s589_s19 = sphi %s629_s19, %s688_s19   ;;  %s585_s18 = sphi %s627_s18, %s687_s18  }
   0x3   : > { %p29_p1 = scmp.ge.s32.totalorder %s27_s21, 2  ;;  %p216_p2 = scmp.lt.s32.totalorder %s593_s20, 3 }
   0x5   : > { %s690_s21 = smov (%p29_p1, %s27_s21), 0  ;;  %p217_p3 = pnand %p499_p0, %p216_p2 }
   0x6   : > { %p256_p4 = scmp.lt.s32.totalorder (!%p217_p3), %s585_s18, 1 }
   0x7   : > { %220 = sbr.rel (%p217_p3) target bundleno = 233 (0xe9), region = 40 }
   0xc   : > { %v567_v0 = vld [vmem:[%s682_s1 + $0x18] sm:$0xff]   ;;  %v595_v1 = vmov 0.0   ;;  %v568_v2 = vld [vmem:[%s682_s1 + $0x10] sm:$0xff]   ;;  %vm596_vm0 = vmmov 0   ;;  %s692_s18 = smov (!%p256_p4, %s585_s18), 1  ;;  %v569_v3 = vld [vmem:[%s682_s1 + $0x8] sm:$0xff]  }
   0xd   : > { %529 = vmatprep.subr.bf16.mxu0 %v595_v1  ;;  %537 = vmatprep.mubr.msk.bf16.mxu0 %vm596_vm0, %v595_v1  ;;  %s516_s28 = sshll.u32 %s692_s18, 3  ;;  %s267_s6 = scalar_lea.vmem %s685_s4, %s692_s18  ;;  %v570_v8 = vld [vmem:[%s682_s1] sm:$0xff]   ;;  %vm325_vm1 = vcmask 523264   ;;  %vm396_vm2 = vcmask 191488  }
   0xe   : > { %530 = vmatpush3.bf16.msra.mxu0 %v567_v0  ;;  %s263_s9 = scalar_lea.vmem %s681_s0, %s516_s28  ;;  %v504_v5 = vld [vmem:[%s267_s6] ss:$0 sm:$0xff]  ;;  %s276_s18 = scalar_lea.vmem %s686_s5, %s516_s28 }
   0xf   : > { %531 = vmatprep.subr.bf16.mxu0 %v595_v1  ;;  %v521_v4 = vld [vmem:[%s263_s9] sm:$0xff]  }
  0x10   : > { %v522_v6 = vunpack.c.l.bf16 %v521_v4  ;;  %v523_v7 = vunpack.c.h.bf16 %v521_v4  ;;  %v510_v12 = vld [vmem:[%s683_s2] ss:$0 sm:$0xff] }
  0x11   : > { %v511_v14 = vld [vmem:[%s684_s3] ss:$0 sm:$0xff] }
  0x12   : > { %532 = vmatpush3.bf16.msra.mxu0 %v568_v2  ;;  %v290_v9 = vmul.f32 %v522_v6, %v504_v5  ;;  %v291_v10 = vmul.f32 %v523_v7, %v504_v5 }
  0x13   : > { %533 = vmatprep.subr.bf16.mxu0 %v595_v1 }
  0x14   : > { %v292_v11 = vpack.c.bf16 %v291_v10, %v290_v9 }
  0x16   : > { %534 = vmatpush3.bf16.msra.mxu0 %v569_v3 }
  0x17   : > { %535 = vmatprep.subr.bf16.mxu0 %v595_v1 }
  0x1a   : > { %536 = vmatpush3.bf16.msra.mxu0 %v570_v8 }
  0x1d   : > { %538 = vmatmul.mubr.msk.bf16.vlgmr.msra.gmra.mxu0 %vm325_vm1, %v292_v11 }
  0xdd   : > { %v363_v13 = vpop.f32.mrf.mxu0 }
  0xde   : > { %v377_v15 = vmul.f32 %v510_v12, %v363_v13 }
  0xdf   : > { %v539_v16 = vpop.f32.mrf.mxu0 }
  0xe0   : > { %v386_v17 = vadd.f32 %v511_v14, %v377_v15 }
  0xe1   : > { %v366_v18 = vpop.f32.mrf.mxu0 }
  0xe2   : > { %v518_v19 = vpack.c.bf16 %v386_v17, %v386_v17  ;;  %v378_v20 = vmul.f32 %v510_v12, %v366_v18 }
  0xe3   : > { %v540_v21 = vpop.f32.mrf.mxu0 }
  0xe4   : > { %397 = vst.msk [vmem:[%s276_s18] sm:$0xf] %vm396_vm2, %v518_v19  ;;  %v387_v22 = vadd.f32 %v511_v14, %v378_v20 }
  0xe6   : > { %v519_v23 = vpack.c.bf16 %v387_v22, %v387_v22 }
  0xe8   : > { %398 = vst.msk [vmem:[%s276_s18 + $0x4] sm:$0xf] %vm396_vm2, %v519_v23 }
  0xe9 PF: > { %s15_s20 = sadd.s32 1, %s593_s20   ;;  %s687_s18 = smov %s589_s19 }
  0xea   : > { %p12_p5 = scmp.ge.s32.totalorder %s15_s20, 4   ;;  %s688_s19 = smov %s690_s21 }
  0xec   :  { %14 = sbr.rel (!%p12_p5) target bundleno = 2 (0x2), region = 73 }

// kernel: efficientnet_forward.18
= control target key start
LH: loop header
LB: loop body
LE: loop exit
PB: predicated region body
PF: predicated region fallthrough
CT: control target
= control target key end

     0   :  { %s536_s18 = smov 0   ;;  %s581_s0 = inlined_call_operand.vmem [shape: bf16[2,16,64], index: 0, kind: input, shape index: {}]   ;;  %s582_s1 = inlined_call_operand.vmem [shape: bf16[64,8], index: 1, kind: input, shape index: {}]   ;;  %s583_s2 = inlined_call_operand.vmem [shape: f32[1,8], index: 2, kind: input, shape index: {}]   ;;  %s584_s3 = inlined_call_operand.vmem [shape: bf16[8,64], index: 3, kind: input, shape index: {}]   ;;  %s585_s4 = inlined_call_operand.vmem [shape: f32[1,64], index: 4, kind: input, shape index: {}]   ;;  %s586_s5 = inlined_call_operand.vmem [shape: f32[2,1,64], index: 5, kind: output, shape index: {}]  }
   0x1 LB: > { %s427_s19 = sadd.s32 4294967295, %s502_s18   ;;  %p431_p0 = scmp.ge.s32.totalorder %s502_s18, 1  ;;  %s502_s18 = sphi %s536_s18, %s15_s18  }
   0x2   : > { %p187_p1 = scmp.lt.s32.totalorder %s502_s18, 3 }
   0x4   : > { %p188_p2 = pnand %p431_p0, %p187_p1 }
   0x5   : > { %p213_p3 = scmp.lt.s32.totalorder (!%p188_p2), %s427_s19, 1 }
   0x6   : > { %191 = sbr.rel (%p188_p2) target bundleno = 495 (0x1ef), region = 40 }
   0xb   : > { %v484_v0 = vld [vmem:[%s582_s1 + $0x18] sm:$0xff]   ;;  %v504_v1 = vmov 0.0   ;;  %v485_v2 = vld [vmem:[%s582_s1 + $0x10] sm:$0xff]   ;;  %vm505_vm0 = vmmov 0   ;;  %s588_s19 = smov (!%p213_p3, %s427_s19), 1  ;;  %v486_v3 = vld [vmem:[%s582_s1 + $0x8] sm:$0xff]  }
   0xc   : > { %456 = vmatprep.subr.bf16.mxu0 %v504_v1  ;;  %468 = vmatprep.subr.bf16.mxu1 %v504_v1  ;;  %s444_s26 = sshll.u32 %s588_s19, 3  ;;  %vm226_vm1 = vcmask 523264   ;;  %v487_v7 = vld [vmem:[%s582_s1] sm:$0xff]   ;;  %vm328_vm2 = vcmask 1043456   ;;  %vm324_vm3 = vcmask 64512   ;;  %s220_s15 = scalar_lea.vmem %s586_s5, %s588_s19  ;;  %vm378_vm4 = vcmask 516096  }
   0xd   : > { %457 = vmatpush3.bf16.msra.mxu0 %v484_v0  ;;  %464 = vmatprep.mubr.msk.bf16.mxu0 %vm505_vm0, %v504_v1  ;;  %s217_s29 = scalar_lea.vmem %s581_s0, %s444_s26  ;;  %v322_v19 = vld [vmem:[%s584_s3] sm:$0xf] }
   0xe   : > { %458 = vmatprep.subr.bf16.mxu0 %v504_v1  ;;  %470 = vmatprep.mubr.msk.bf16.mxu1 %vm505_vm0, %v504_v1  ;;  %v446_v4 = vld [vmem:[%s217_s29] sm:$0xff]   ;;  %v330_v20 = vsel %vm328_vm2, %v322_v19, 0 }
   0xf   : > { %v447_v5 = vunpack.c.l.bf16 %v446_v4  ;;  %v448_v6 = vunpack.c.h.bf16 %v446_v4  ;;  %469 = vmatpush3.bf16.msra.mxu1 %v330_v20  ;;  %v246_v21 = vld [vmem:[%s583_s2] sm:$0x1] }
  0x10   : > { %v323_v33 = vld [vmem:[%s585_s4] sm:$0x1] }
  0x11   : > { %459 = vmatpush3.bf16.msra.mxu0 %v485_v2  ;;  %v227_v8 = vsel %vm226_vm1, %v447_v5, 0.0  ;;  %v228_v9 = vsel %vm226_vm1, %v448_v6, 0.0 }
  0x12   : > { %460 = vmatprep.subr.bf16.mxu0 %v504_v1  ;;  %v229_v10 = vadd.f32 %v228_v9, %v227_v8 }
  0x14   : > { %v230_v11 = vrot.slane %v229_v10, 4 }
  0x15   : > { %461 = vmatpush3.bf16.msra.mxu0 %v486_v3 }
  0x16   : > { %462 = vmatprep.subr.bf16.mxu0 %v504_v1  ;;  %v231_v12 = vadd.f32 %v230_v11, %v229_v10 }
  0x18   : > { %v232_v13 = vrot.slane %v231_v12, 2 }
  0x19   : > { %463 = vmatpush3.bf16.msra.mxu0 %v487_v7 }
  0x1a   : > { %v233_v14 = vadd.f32 %v232_v13, %v231_v12 }
  0x1c   : > { %v234_v15 = vrot.slane %v233_v14, 1 }
  0x1e   : > { %v235_v16 = vadd.f32 %v234_v15, %v233_v14 }
  0x20   : > { %v236_v17 = vmul.f32 0.0625, %v235_v16 }
  0x22   : > { %v237_v18 = vpack.c.bf16 %v236_v17, %v236_v17 }
  0x24   : > { %465 = vmatmul.mubr.msk.bf16.vlgmr.msra.gmra.mxu0 %vm226_vm1, %v237_v18 }
  0xe4   : > { %v308_v22 = vpop.f32.mrf.mxu0 }
  0xe5   : > { %v309_v23 = vadd.f32 %v308_v22, %v246_v21 }
  0xe6   : > { %v466_v24 = vpop.f32.mrf.mxu0 }
  0xe7   : > { %v439_v25 = vmul.f32 -1.442695, %v309_v23 }
  0xe8   : > { %v311_v26 = vpop.f32.mrf.mxu0 }
  0xe9   : > { %488 = vpow2.f32 %v439_v25 }
  0xea   : > { %v467_v27 = vpop.f32.mrf.mxu0 }
  0xf6   : > { %v489_v28 = vpop.eup %488 }
  0xf7   : > { %v317_v29 = vadd.f32 1.0, %v489_v28 }
  0xf9   : > { %490 = vrcp.f32 %v317_v29 }
 0x106   : > { %v491_v30 = vpop.eup %490 }
 0x107   : > { %v320_v31 = vmul.f32 %v491_v30, %v309_v23 }
 0x109   : > { %v321_v32 = vpack.c.bf16 %v320_v31, %v320_v31 }
 0x10b   : > { %471 = vmatmul.mubr.msk.bf16.vlgmr.msra.gmra.mxu1 %vm324_vm3, %v321_v32 }
 0x1cb   : > { %v366_v34 = vpop.f32.mrf.mxu1 }
 0x1cc   : > { %v367_v35 = vadd.f32 %v366_v34, %v323_v33 }
 0x1cd   : > { %v472_v36 = vpop.f32.mrf.mxu1 }
 0x1ce   : > { %v441_v37 = vmul.f32 -1.442695, %v367_v35 }
 0x1cf   : > { %v369_v38 = vpop.f32.mrf.mxu1 }
 0x1d0   : > { %492 = vpow2.f32 %v441_v37 }
 0x1d1   : > { %v473_v39 = vpop.f32.mrf.mxu1 }
 0x1dd   : > { %v493_v40 = vpop.eup %492 }
 0x1de   : > { %v375_v41 = vadd.f32 1.0, %v493_v40 }
 0x1e0   : > { %494 = vrcp.f32 %v375_v41 }
 0x1ed   : > { %v495_v42 = vpop.eup %494 }
 0x1ee   : > { %379 = vst.msk [vmem:[%s220_s15] sm:$0x1] %vm378_vm4, %v495_v42 }
 0x1ef PF: > { %s15_s18 = sadd.s32 1, %s502_s18  }
 0x1f0   : > { %p12_p4 = scmp.ge.s32.totalorder %s15_s18, 4  }
 0x1f2   :  { %14 = sbr.rel (!%p12_p4) target bundleno = 1 (0x1), region = 70 }

// kernel: efficientnet_forward.17
= control target key start
LH: loop header
LB: loop body
LE: loop exit
PB: predicated region body
PF: predicated region fallthrough
CT: control target
= control target key end

     0   :  { %s857_s15 = smov 0   ;;  %s859_s16 = smov 0   ;;  %s1042_s0 = inlined_call_operand.vmem [shape: bf16[2,4,5,5,64], index: 0, kind: input, shape index: {}]   ;;  %s1043_s1 = inlined_call_operand.vmem [shape: f32[9,1,1,64], index: 1, kind: input, shape index: {}]   ;;  %s1044_s2 = inlined_call_operand.vmem [shape: f32[1,1,64], index: 2, kind: input, shape index: {}]   ;;  %s1045_s3 = inlined_call_operand.vmem [shape: f32[1,1,64], index: 3, kind: input, shape index: {}]   ;;  %s1046_s4 = inlined_call_operand.vmem [shape: bf16[2,4,4,64], index: 4, kind: output, shape index: {}]  }
   0x1   :  { %s861_s17 = smov 0  }
   0x2 LB: > { %s26_s18 = sadd.s32 1, %s826_s16  ;;  %p709_p0 = scmp.ge.s32.totalorder %s830_s17, 1  ;;  %s830_s17 = sphi %s861_s17, %s14_s17   ;;  %s826_s16 = sphi %s859_s16, %s1048_s16   ;;  %s822_s15 = sphi %s857_s15, %s1047_s15  }
   0x3   : > { %p28_p1 = scmp.ge.s32.totalorder %s26_s18, 2  ;;  %p205_p2 = scmp.lt.s32.totalorder %s830_s17, 3 }
   0x5   : > { %s1050_s18 = smov (%p28_p1, %s26_s18), 0  ;;  %p206_p3 = pnand %p709_p0, %p205_p2 }
   0x6   : > { %p246_p4 = scmp.lt.s32.totalorder (!%p206_p3), %s822_s15, 1 }
   0x7   : > { %209 = sbr.rel (%p206_p3) target bundleno = 98 (0x62), region = 36 }
   0xc   : > { %s1052_s15 = smov (!%p246_p4, %s822_s15), 1  ;;  %v881_v0 = vld [vmem:[%s1043_s1] ss:$0 sm:$0xff]  ;;  %v891_v1 = vld [vmem:[%s1043_s1 + $0x1] ss:$0 sm:$0xff]  ;;  %vm577_vm0 = vcmask 517120  }
   0xd   : > { %s767_s19 = smul.u32 80, %s1052_s15  ;;  %v896_v2 = vld [vmem:[%s1043_s1 + $0x2] ss:$0 sm:$0xff]  ;;  %v901_v3 = vld [vmem:[%s1043_s1 + $0x3] ss:$0 sm:$0xff]  ;;  %s766_s23 = sshll.u32 %s1052_s15, 3 }
   0xe   : > { %v911_v12 = vld [vmem:[%s1043_s1 + $0x4] ss:$0 sm:$0xff]  ;;  %v917_v16 = vld [vmem:[%s1043_s1 + $0x5] ss:$0 sm:$0xff]  ;;  %v931_v28 = vld [vmem:[%s1043_s1 + $0x8] ss:$0 sm:$0xff]  ;;  %s270_s26 = scalar_lea.vmem %s1046_s4, %s766_s23 }
   0xf   : > { %s886_s24 = scalar_lea.vmem %s1042_s0, %s767_s19  ;;  %v942_v38 = vld [vmem:[%s1043_s1 + $0x6] ss:$0 sm:$0xff]  ;;  %v947_v43 = vld [vmem:[%s1043_s1 + $0x7] ss:$0 sm:$0xff] }
  0x10   : > { %v271_v4 = vld [vmem:[%s886_s24] sm:$0x3]  ;;  %v714_v5 = vld [vmem:[%s886_s24 + $0x14] sm:$0x3]  ;;  %v722_v10 = vld [vmem:[%s886_s24 + $0x28] sm:$0x3] }
  0x11   : > { %v315_v6 = vld [vmem:[%s886_s24] sm:$0x7]  ;;  %v276_v7 = vunpack.c.l.bf16 %v271_v4  ;;  %v297_v8 = vunpack.c.l.bf16 %v714_v5  ;;  %v728_v11 = vld [vmem:[%s886_s24 + $0x3c] sm:$0x3]  ;;  %v734_v13 = vld [vmem:[%s886_s24 + $0x28] sm:$0x7]  ;;  %v358_v14 = vunpack.c.l.bf16 %v722_v10 }
  0x12   : > { %v321_v9 = vunpack.c.l.bf16 %v315_v6  ;;  %v383_v15 = vunpack.c.l.bf16 %v728_v11  ;;  %v407_v17 = vunpack.c.l.bf16 %v734_v13  ;;  %v740_v18 = vld [vmem:[%s886_s24 + $0x4] sm:$0x3]  ;;  %v746_v23 = vld [vmem:[%s886_s24 + $0x18] sm:$0x3]  ;;  %v723_v30 = vld [vmem:[%s886_s24 + $0x2c] sm:$0x3] }
  0x13   : > { %v752_v19 = vld [vmem:[%s886_s24 + $0x4] sm:$0x7]  ;;  %v286_v20 = vmul.f32 %v881_v0, %v276_v7  ;;  %v307_v21 = vmul.f32 %v891_v1, %v297_v8  ;;  %v715_v25 = vld [vmem:[%s886_s24 + $0x18] sm:$0x3]  ;;  %v368_v26 = vmul.f32 %v901_v3, %v358_v14  ;;  %v444_v27 = vunpack.c.l.bf16 %v740_v18  ;;  %v729_v35 = vld [vmem:[%s886_s24 + $0x40] sm:$0x3] }
  0x14   : > { %v331_v22 = vmul.f32 %v896_v2, %v321_v9  ;;  %v272_v24 = vld [vmem:[%s886_s24 + $0x4] sm:$0x3]  ;;  %v417_v33 = vmul.f32 %v917_v16, %v407_v17  ;;  %v493_v34 = vunpack.c.l.bf16 %v752_v19  ;;  %v735_v36 = vld [vmem:[%s886_s24 + $0x2c] sm:$0x7]  ;;  %v393_v37 = vmul.f32 %v911_v12, %v383_v15  ;;  %v741_v51 = vld [vmem:[%s886_s24 + $0x8] sm:$0x3] }
  0x15   : > { %v316_v29 = vld [vmem:[%s886_s24 + $0x4] sm:$0x7]  ;;  %v311_v31 = vadd.f32 %v307_v21, %v286_v20  ;;  %v469_v39 = vunpack.c.l.bf16 %v746_v23  ;;  %v277_v40 = vunpack.c.l.bf16 %v272_v24  ;;  %v298_v41 = vunpack.c.l.bf16 %v715_v25  ;;  %v753_v52 = vld [vmem:[%s886_s24 + $0x8] sm:$0x7]  ;;  %v716_v58 = vld [vmem:[%s886_s24 + $0x1c] sm:$0x3] }
  0x16   : > { %v339_v32 = vrot.slane %v331_v22, 1  ;;  %v950_v44 = vmul.f32 %v931_v28, %v493_v34  ;;  %v322_v45 = vunpack.c.l.bf16 %v316_v29  ;;  %v359_v46 = vunpack.c.l.bf16 %v723_v30  ;;  %v273_v57 = vld [vmem:[%s886_s24 + $0x8] sm:$0x3]  ;;  %v747_v63 = vld [vmem:[%s886_s24 + $0x1c] sm:$0x3] }
  0x17   : > { %v287_v47 = vmul.f32 %v881_v0, %v277_v40  ;;  %v308_v48 = vmul.f32 %v891_v1, %v298_v41  ;;  %v384_v49 = vunpack.c.l.bf16 %v729_v35  ;;  %v408_v50 = vunpack.c.l.bf16 %v735_v36  ;;  %v317_v8 = vld [vmem:[%s886_s24 + $0x8] sm:$0x7]  ;;  %v724_v9 = vld [vmem:[%s886_s24 + $0x30] sm:$0x3]  ;;  %v730_v15 = vld [vmem:[%s886_s24 + $0x44] sm:$0x3] }
  0x18   : > { %v347_v42 = vadd.f32 %v339_v32, %v311_v31  ;;  %v425_v54 = vrot.slane %v417_v33, 1  ;;  %v454_v55 = vmul.f32 %v942_v38, %v444_v27  ;;  %v332_v56 = vmul.f32 %v896_v2, %v322_v45  ;;  %v736_v21 = vld [vmem:[%s886_s24 + $0x30] sm:$0x7]  ;;  %v754_v31 = vld [vmem:[%s886_s24 + $0xc] sm:$0x7] }
  0x19   : > { %v479_v59 = vmul.f32 %v947_v43, %v469_v39  ;;  %v511_v60 = vrot.slane %v950_v44, 1  ;;  %v312_v61 = vadd.f32 %v308_v48, %v287_v47  ;;  %v369_v62 = vmul.f32 %v901_v3, %v359_v46  ;;  %v274_v36 = vld [vmem:[%s886_s24 + $0xc] sm:$0x3]  ;;  %v748_v44 = vld [vmem:[%s886_s24 + $0x20] sm:$0x3] }
  0x1a   : > { %v372_v53 = vadd.f32 %v368_v26, %v347_v42  ;;  %v340_v5 = vrot.slane %v332_v56, 1  ;;  %v418_v6 = vmul.f32 %v917_v16, %v408_v50  ;;  %v494_v7 = vunpack.c.l.bf16 %v753_v52  ;;  %v742_v42 = vld [vmem:[%s886_s24 + $0xc] sm:$0x3]  ;;  %v983_v45 = vld [vmem:[%s1044_s2] ss:$0 sm:$0xff] }
  0x1b   : > { %v394_v10 = vmul.f32 %v911_v12, %v384_v49  ;;  %v445_v11 = vunpack.c.l.bf16 %v741_v51  ;;  %v278_v13 = vunpack.c.l.bf16 %v273_v57  ;;  %v299_v14 = vunpack.c.l.bf16 %v716_v58  ;;  %v717_v50 = vld [vmem:[%s886_s24 + $0x20] sm:$0x3]  ;;  %v725_v56 = vld [vmem:[%s886_s24 + $0x34] sm:$0x3] }
  0x1c   : > { %v397_v4 = vadd.f32 %v393_v37, %v372_v53  ;;  %v348_v18 = vadd.f32 %v340_v5, %v312_v61  ;;  %v470_v19 = vunpack.c.l.bf16 %v747_v63  ;;  %v504_v20 = vmul.f32 %v931_v28, %v494_v7  ;;  %v994_v57 = vld [vmem:[%s1045_s3] ss:$0 sm:$0xff]  ;;  %v731_v63 = vld [vmem:[%s886_s24 + $0x48] sm:$0x3]  ;;  %v737_v7 = vld [vmem:[%s886_s24 + $0x34] sm:$0x7] }
  0x1d   : > { %v288_v22 = vmul.f32 %v881_v0, %v278_v13  ;;  %v309_v23 = vmul.f32 %v891_v1, %v299_v14  ;;  %v323_v24 = vunpack.c.l.bf16 %v317_v8  ;;  %v360_v25 = vunpack.c.l.bf16 %v724_v9 }
  0x1e   : > { %v433_v17 = vadd.f32 %v425_v54, %v397_v4  ;;  %v373_v27 = vadd.f32 %v369_v62, %v348_v18  ;;  %v426_v29 = vrot.slane %v418_v6, 1  ;;  %v385_v30 = vunpack.c.l.bf16 %v730_v15 }
  0x1f   : > { %v455_v32 = vmul.f32 %v942_v38, %v445_v11  ;;  %v313_v33 = vadd.f32 %v309_v23, %v288_v22  ;;  %v333_v34 = vmul.f32 %v896_v2, %v323_v24  ;;  %v409_v35 = vunpack.c.l.bf16 %v736_v21 }
  0x20   : > { %v458_v26 = vadd.f32 %v454_v55, %v433_v17  ;;  %v398_v39 = vadd.f32 %v394_v10, %v373_v27  ;;  %v480_v40 = vmul.f32 %v947_v43, %v470_v19  ;;  %v512_v41 = vrot.slane %v504_v20, 1  ;;  %v318_v55 = vld [vmem:[%s886_s24 + $0xc] sm:$0x7] }
  0x21   : > { %v341_v46 = vrot.slane %v333_v34, 1  ;;  %v370_v47 = vmul.f32 %v901_v3, %v360_v25  ;;  %v419_v48 = vmul.f32 %v917_v16, %v409_v35  ;;  %v495_v49 = vunpack.c.l.bf16 %v754_v31  ;;  %v743_v25 = vld [vmem:[%s886_s24 + $0x10] sm:$0x3] }
  0x22   : > { %v483_v37 = vadd.f32 %v479_v59, %v458_v26  ;;  %v434_v52 = vadd.f32 %v426_v29, %v398_v39  ;;  %v395_v53 = vmul.f32 %v911_v12, %v385_v30  ;;  %v279_v54 = vunpack.c.l.bf16 %v274_v36  ;;  %v755_v26 = vld [vmem:[%s886_s24 + $0x10] sm:$0x7] }
  0x23   : > { %v349_v58 = vadd.f32 %v341_v46, %v313_v33  ;;  %v427_v59 = vrot.slane %v419_v48, 1  ;;  %v446_v61 = vunpack.c.l.bf16 %v742_v42  ;;  %v471_v62 = vunpack.c.l.bf16 %v748_v44  ;;  %v749_v33 = vld [vmem:[%s886_s24 + $0x24] sm:$0x3] }
  0x24   : > { %v519_v51 = vadd.f32 %v511_v60, %v483_v37  ;;  %v459_v60 = vadd.f32 %v455_v32, %v434_v52  ;;  %v289_v5 = vmul.f32 %v881_v0, %v279_v54  ;;  %v300_v6 = vunpack.c.l.bf16 %v717_v50 }
  0x25   : > { %v374_v8 = vadd.f32 %v370_v47, %v349_v58  ;;  %v505_v9 = vmul.f32 %v931_v28, %v495_v49  ;;  %v324_v10 = vunpack.c.l.bf16 %v318_v55  ;;  %v361_v11 = vunpack.c.l.bf16 %v725_v56 }
  0x26   : > { %v530_v4 = vmul.f32 %v983_v45, %v519_v51  ;;  %v484_v14 = vadd.f32 %v480_v40, %v459_v60  ;;  %v310_v15 = vmul.f32 %v891_v1, %v300_v6  ;;  %v386_v17 = vunpack.c.l.bf16 %v731_v63 }
  0x27   : > { %v399_v18 = vadd.f32 %v395_v53, %v374_v8  ;;  %v456_v19 = vmul.f32 %v942_v38, %v446_v61  ;;  %v334_v0 = vmul.f32 %v896_v2, %v324_v10  ;;  %v410_v20 = vunpack.c.l.bf16 %v737_v7 }
  0x28   : > { %v1002_v13 = vadd.f32 %v994_v57, %v530_v4  ;;  %v520_v22 = vadd.f32 %v512_v41, %v484_v14  ;;  %v481_v23 = vmul.f32 %v947_v43, %v471_v62  ;;  %v314_v24 = vadd.f32 %v310_v15, %v289_v5 }
  0x29   : > { %v435_v27 = vadd.f32 %v427_v59, %v399_v18  ;;  %v342_v29 = vrot.slane %v334_v0, 1  ;;  %v371_v1 = vmul.f32 %v901_v3, %v361_v11  ;;  %v420_v30 = vmul.f32 %v917_v16, %v410_v20 }
  0x2a   : > { %v760_v21 = vmul.f32 -1.442695, %v1002_v13  ;;  %v531_v31 = vmul.f32 %v983_v45, %v520_v22  ;;  %v513_v2 = vrot.slane %v505_v9, 1  ;;  %v396_v32 = vmul.f32 %v911_v12, %v386_v17 }
  0x2b   : > { %v460_v34 = vadd.f32 %v456_v19, %v435_v27  ;;  %v350_v35 = vadd.f32 %v342_v29, %v314_v24  ;;  %v447_v36 = vunpack.c.l.bf16 %v743_v25  ;;  %v496_v37 = vunpack.c.l.bf16 %v755_v26 }
  0x2c   : > { %792 = vpow2.f32 %v760_v21  ;;  %v542_v39 = vadd.f32 %v994_v57, %v531_v31  ;;  %v428_v42 = vrot.slane %v420_v30, 1  ;;  %v472_v44 = vunpack.c.l.bf16 %v749_v33 }
  0x2d   : > { %v485_v40 = vadd.f32 %v481_v23, %v460_v34  ;;  %v375_v41 = vadd.f32 %v371_v1, %v350_v35  ;;  %v457_v47 = vmul.f32 %v942_v38, %v447_v36  ;;  %v506_v48 = vmul.f32 %v931_v28, %v496_v37 }
  0x2e   : > { %v761_v3 = vmul.f32 -1.442695, %v542_v39  ;;  %v482_v50 = vmul.f32 %v947_v43, %v472_v44 }
  0x2f   : > { %v521_v46 = vadd.f32 %v513_v2, %v485_v40  ;;  %v400_v16 = vadd.f32 %v396_v32, %v375_v41  ;;  %v514_v53 = vrot.slane %v506_v48, 1 }
  0x30   : > { %794 = vpow2.f32 %v761_v3 }
  0x31   : > { %v532_v12 = vmul.f32 %v983_v45, %v521_v46  ;;  %v436_v49 = vadd.f32 %v428_v42, %v400_v16 }
  0x33   : > { %v543_v51 = vadd.f32 %v994_v57, %v532_v12  ;;  %v461_v52 = vadd.f32 %v457_v47, %v436_v49 }
  0x35   : > { %v762_v54 = vmul.f32 -1.442695, %v543_v51  ;;  %v486_v55 = vadd.f32 %v482_v50, %v461_v52 }
  0x37   : > { %796 = vpow2.f32 %v762_v54  ;;  %v522_v58 = vadd.f32 %v514_v53, %v486_v55 }
  0x39   : > { %v793_v56 = vpop.eup %792  ;;  %v533_v38 = vmul.f32 %v983_v45, %v522_v58 }
  0x3a   : > { %v557_v59 = vadd.f32 1.0, %v793_v56 }
  0x3b   : > { %v544_v28 = vadd.f32 %v994_v57, %v533_v38 }
  0x3c   : > { %798 = vrcp.f32 %v557_v59 }
  0x3d   : > { %v795_v61 = vpop.eup %794  ;;  %v763_v62 = vmul.f32 -1.442695, %v544_v28 }
  0x3e   : > { %v558_v63 = vadd.f32 1.0, %v795_v61 }
  0x3f   : > { %800 = vpow2.f32 %v763_v62 }
  0x40   : > { %802 = vrcp.f32 %v558_v63 }
  0x44   : > { %v797_v43 = vpop.eup %796 }
  0x45   : > { %v559_v4 = vadd.f32 1.0, %v797_v43 }
  0x47   : > { %804 = vrcp.f32 %v559_v4 }
  0x49   : > { %v799_v60 = vpop.eup %798 }
  0x4a   : > { %v569_v5 = vmul.f32 %v799_v60, %v1002_v13 }
  0x4c   : > { %v573_v45 = vpack.c.bf16 %v569_v5, %v569_v5  ;;  %v801_v6 = vpop.eup %800 }
  0x4d   : > { %v803_v57 = vpop.eup %802  ;;  %v560_v7 = vadd.f32 1.0, %v801_v6 }
  0x4e   : > { %578 = vst.msk [vmem:[%s270_s26] sm:$0x3] %vm577_vm0, %v573_v45  ;;  %v570_v8 = vmul.f32 %v803_v57, %v542_v39 }
  0x4f   : > { %806 = vrcp.f32 %v560_v7 }
  0x50   : > { %v574_v9 = vpack.c.bf16 %v570_v8, %v570_v8 }
  0x52   : > { %579 = vst.msk [vmem:[%s270_s26 + $0x2] sm:$0x3] %vm577_vm0, %v574_v9 }
  0x54   : > { %v805_v10 = vpop.eup %804 }
  0x55   : > { %v571_v11 = vmul.f32 %v805_v10, %v543_v51 }
  0x57   : > { %v575_v14 = vpack.c.bf16 %v571_v11, %v571_v11 }
  0x59   : > { %580 = vst.msk [vmem:[%s270_s26 + $0x4] sm:$0x3] %vm577_vm0, %v575_v14 }
  0x5c   : > { %v807_v13 = vpop.eup %806 }
  0x5d   : > { %v572_v15 = vmul.f32 %v807_v13, %v544_v28 }
  0x5f   : > { %v576_v17 = vpack.c.bf16 %v572_v15, %v572_v15 }
  0x61   : > { %581 = vst.msk [vmem:[%s270_s26 + $0x6] sm:$0x3] %vm577_vm0, %v576_v17 }
  0x62 PF: > { %s14_s17 = sadd.s32 1, %s830_s17   ;;  %s1047_s15 = smov %s826_s16 }
  0x63   : > { %p11_p5 = scmp.ge.s32.totalorder %s14_s17, 4   ;;  %s1048_s16 = smov %s1050_s18 }
  0x65   :  { %13 = sbr.rel (!%p11_p5) target bundleno = 2 (0x2), region = 88 }

// kernel: efficientnet_forward.20
= control target key start
LH: loop header
LB: loop body
LE: loop exit
PB: predicated region body
PF: predicated region fallthrough
CT: control target
= control target key end

     0   :  { %vm51_vm0 = vcmask 1043456   ;;  %vm44_vm1 = vcmask 195584   ;;  %vm170_vm2 = vcmask 781312   ;;  %s287_s1 = inlined_call_operand.vmem [shape: bf16[24,96], index: 1, kind: input, shape index: {}]   ;;  %s288_s0 = inlined_call_operand.vmem [shape: bf16[1,32,24], index: 0, kind: input, shape index: {}]   ;;  %s289_s2 = inlined_call_operand.vmem [shape: f32[1,96], index: 2, kind: input, shape index: {}]   ;;  %s290_s3 = inlined_call_operand.vmem [shape: f32[1,96], index: 3, kind: input, shape index: {}]   ;;  %s291_s4 = inlined_call_operand.vmem [shape: bf16[1,32,96], index: 4, kind: output, shape index: {}]  }
   0x1   :  { %v212_v0 = vld [vmem:[%s287_s1 + $0x8] ss:$0 sps:$4 sm:$0xff]   ;;  %v213_v1 = vld [vmem:[%s287_s1] sm:$0xff]  }
   0x2   :  { %211 = vmatprep.subr.msk.bf16.mxu0 %vm51_vm0, %v212_v0  ;;  %v53_v2 = vsel %vm51_vm0, %v212_v0, 0  ;;  %v214_v3 = vld [vmem:[%s288_s0] sm:$0xff]   ;;  %v215_v4 = vld [vmem:[%s288_s0 + $0x8] sm:$0xff]  }
   0x3   :  { %204 = vmatpush3.bf16.msra.mxu0 %v53_v2  ;;  %207 = vmatprep.mubr.msk.bf16.mxu0 %vm44_vm1, %v214_v3  ;;  %v185_v5 = vld [vmem:[%s289_s2] ss:$0 sm:$0xff] }
   0x4   :  { %205 = vmatprep.subr.bf16.mxu0 %v213_v1  ;;  %v186_v7 = vld [vmem:[%s290_s3] ss:$0 sm:$0xff] }
   0x7   :  { %206 = vmatpush3.bf16.msra.mxu0 %v213_v1 }
   0xa   :  { %208 = vmatmul.mubr.msk.bf16.vlgmr.msra.gmra.mxu0 %vm44_vm1, %v215_v4 }
  0xca   :  { %v209_v6 = vpop.f32.mrf.mxu0 }
  0xcb   :  { %v113_v8 = vmul.f32 %v209_v6, %v185_v5 }
  0xcc   :  { %v89_v9 = vpop.f32.mrf.mxu0 }
  0xcd   :  { %v124_v10 = vadd.f32 %v186_v7, %v113_v8  ;;  %v111_v11 = vmul.f32 %v185_v5, %v89_v9 }
  0xce   :  { %v210_v12 = vpop.f32.mrf.mxu0 }
  0xcf   :  { %v189_v13 = vmul.f32 -1.442695, %v124_v10  ;;  %v122_v14 = vadd.f32 %v186_v7, %v111_v11  ;;  %v114_v15 = vmul.f32 %v210_v12, %v185_v5 }
  0xd0   :  { %v92_v16 = vpop.f32.mrf.mxu0 }
  0xd1   :  { %216 = vpow2.f32 %v189_v13  ;;  %v187_v17 = vmul.f32 -1.442695, %v122_v14  ;;  %v125_v18 = vadd.f32 %v186_v7, %v114_v15  ;;  %v112_v19 = vmul.f32 %v185_v5, %v92_v16 }
  0xd3   :  { %218 = vpow2.f32 %v187_v17  ;;  %v190_v20 = vmul.f32 -1.442695, %v125_v18  ;;  %v123_v21 = vadd.f32 %v186_v7, %v112_v19 }
  0xd5   :  { %220 = vpow2.f32 %v190_v20  ;;  %v188_v22 = vmul.f32 -1.442695, %v123_v21 }
  0xd7   :  { %222 = vpow2.f32 %v188_v22 }
  0xde   :  { %v217_v23 = vpop.eup %216 }
  0xdf   :  { %v140_v24 = vadd.f32 1.0, %v217_v23 }
  0xe0   :  { %v219_v25 = vpop.eup %218 }
  0xe1   :  { %224 = vrcp.f32 %v140_v24  ;;  %v138_v26 = vadd.f32 1.0, %v219_v25 }
  0xe2   :  { %v221_v27 = vpop.eup %220 }
  0xe3   :  { %226 = vrcp.f32 %v138_v26  ;;  %v141_v28 = vadd.f32 1.0, %v221_v27 }
  0xe4   :  { %v223_v29 = vpop.eup %222 }
  0xe5   :  { %228 = vrcp.f32 %v141_v28  ;;  %v139_v30 = vadd.f32 1.0, %v223_v29 }
  0xe7   :  { %230 = vrcp.f32 %v139_v30 }
  0xee   :  { %v225_v31 = vpop.eup %224 }
  0xef   :  { %v152_v32 = vmul.f32 %v225_v31, %v124_v10 }
  0xf0   :  { %v227_v33 = vpop.eup %226 }
  0xf1   :  { %v197_v34 = vpack.c.bf16 %v152_v32, %v152_v32  ;;  %v150_v35 = vmul.f32 %v227_v33, %v122_v14 }
  0xf2   :  { %v229_v36 = vpop.eup %228 }
  0xf3   :  { %173 = vst.msk [vmem:[%s291_s4 + $0x8] sm:$0xf] %vm170_vm2, %v197_v34  ;;  %v195_v37 = vpack.c.bf16 %v150_v35, %v150_v35  ;;  %v153_v38 = vmul.f32 %v229_v36, %v125_v18 }
  0xf4   :  { %v231_v39 = vpop.eup %230 }
  0xf5   :  { %171 = vst.msk [vmem:[%s291_s4] sm:$0xf] %vm170_vm2, %v195_v37  ;;  %v198_v40 = vpack.c.bf16 %v153_v38, %v153_v38  ;;  %v151_v41 = vmul.f32 %v231_v39, %v123_v21 }
  0xf7   :  { %174 = vst.msk [vmem:[%s291_s4 + $0xc] sm:$0xf] %vm170_vm2, %v198_v40  ;;  %v196_v42 = vpack.c.bf16 %v151_v41, %v151_v41 }
  0xf9   :  { %172 = vst.msk [vmem:[%s291_s4 + $0x4] sm:$0xf] %vm170_vm2, %v196_v42 }

// kernel: efficientnet_forward.22
= control target key start
LH: loop header
LB: loop body
LE: loop exit
PB: predicated region body
PF: predicated region fallthrough
CT: control target
= control target key end

     0   :  { %s562_s18 = smov 0   ;;  %s613_s0 = inlined_call_operand.vmem [shape: bf16[2,16,96], index: 0, kind: input, shape index: {}]   ;;  %s614_s1 = inlined_call_operand.vmem [shape: bf16[96,8], index: 1, kind: input, shape index: {}]   ;;  %s615_s2 = inlined_call_operand.vmem [shape: f32[1,8], index: 2, kind: input, shape index: {}]   ;;  %s616_s3 = inlined_call_operand.vmem [shape: bf16[8,96], index: 3, kind: input, shape index: {}]   ;;  %s617_s4 = inlined_call_operand.vmem [shape: f32[1,96], index: 4, kind: input, shape index: {}]   ;;  %s618_s5 = inlined_call_operand.vmem [shape: f32[2,1,96], index: 5, kind: output, shape index: {}]  }
   0x1 LB: > { %s443_s19 = sadd.s32 4294967295, %s528_s18   ;;  %p447_p0 = scmp.ge.s32.totalorder %s528_s18, 1  ;;  %s528_s18 = sphi %s562_s18, %s15_s18  }
   0x2   : > { %p187_p1 = scmp.lt.s32.totalorder %s528_s18, 3 }
   0x4   : > { %p188_p2 = pnand %p447_p0, %p187_p1 }
   0x5   : > { %p213_p3 = scmp.lt.s32.totalorder (!%p188_p2), %s443_s19, 1 }
   0x6   : > { %191 = sbr.rel (%p188_p2) target bundleno = 495 (0x1ef), region = 40 }
   0xb   : > { %v508_v0 = vld [vmem:[%s614_s1 + $0x28] sm:$0xff]   ;;  %v530_v1 = vmov 0.0   ;;  %v509_v2 = vld [vmem:[%s614_s1 + $0x20] sm:$0xff]   ;;  %vm531_vm0 = vmmov 0   ;;  %s620_s19 = smov (!%p213_p3, %s443_s19), 1  ;;  %v510_v3 = vld [vmem:[%s614_s1 + $0x18] sm:$0xff]  }
   0xc   : > { %476 = vmatprep.subr.bf16.mxu0 %v530_v1  ;;  %492 = vmatprep.subr.bf16.mxu1 %v530_v1  ;;  %s462_s26 = sshll.u32 %s620_s19, 3  ;;  %vm226_vm1 = vcmask 785408   ;;  %v511_v7 = vld [vmem:[%s614_s1 + $0x10] sm:$0xff]   ;;  %v512_v11 = vld [vmem:[%s614_s1 + $0x8] sm:$0xff]   ;;  %v513_v14 = vld [vmem:[%s614_s1] sm:$0xff]   ;;  %vm344_vm2 = vcmask 1043456   ;;  %s220_s21 = scalar_lea.vmem %s618_s5, %s620_s19 }
   0xd   : > { %477 = vmatpush3.bf16.msra.mxu0 %v508_v0  ;;  %488 = vmatprep.mubr.msk.bf16.mxu0 %vm531_vm0, %v530_v1  ;;  %s217_s29 = scalar_lea.vmem %s613_s0, %s462_s26  ;;  %v338_v21 = vld [vmem:[%s616_s3] sm:$0xf]  ;;  %vm340_vm3 = vcmask 64512   ;;  %vm394_vm4 = vcmask 778240  }
   0xe   : > { %478 = vmatprep.subr.bf16.mxu0 %v530_v1  ;;  %494 = vmatprep.mubr.msk.bf16.mxu1 %vm531_vm0, %v530_v1  ;;  %v464_v4 = vld [vmem:[%s217_s29] sm:$0xff]   ;;  %v346_v22 = vsel %vm344_vm2, %v338_v21, 0 }
   0xf   : > { %v465_v5 = vunpack.c.l.bf16 %v464_v4  ;;  %v466_v6 = vunpack.c.h.bf16 %v464_v4  ;;  %493 = vmatpush3.bf16.msra.mxu1 %v346_v22  ;;  %v250_v23 = vld [vmem:[%s615_s2] sm:$0x1] }
  0x10   : > { %v339_v35 = vld [vmem:[%s617_s4] sm:$0x1] }
  0x11   : > { %479 = vmatpush3.bf16.msra.mxu0 %v509_v2  ;;  %v227_v8 = vsel %vm226_vm1, %v465_v5, 0.0  ;;  %v228_v9 = vsel %vm226_vm1, %v466_v6, 0.0 }
  0x12   : > { %480 = vmatprep.subr.bf16.mxu0 %v530_v1  ;;  %v229_v10 = vadd.f32 %v228_v9, %v227_v8 }
  0x14   : > { %v230_v12 = vrot.slane %v229_v10, 4 }
  0x15   : > { %481 = vmatpush3.bf16.msra.mxu0 %v510_v3 }
  0x16   : > { %482 = vmatprep.subr.bf16.mxu0 %v530_v1  ;;  %v231_v13 = vadd.f32 %v230_v12, %v229_v10 }
  0x18   : > { %v232_v15 = vrot.slane %v231_v13, 2 }
  0x19   : > { %483 = vmatpush3.bf16.msra.mxu0 %v511_v7 }
  0x1a   : > { %484 = vmatprep.subr.bf16.mxu0 %v530_v1  ;;  %v233_v16 = vadd.f32 %v232_v15, %v231_v13 }
  0x1c   : > { %v234_v17 = vrot.slane %v233_v16, 1 }
  0x1d   : > { %485 = vmatpush3.bf16.msra.mxu0 %v512_v11 }
  0x1e   : > { %486 = vmatprep.subr.bf16.mxu0 %v530_v1  ;;  %v235_v18 = vadd.f32 %v234_v17, %v233_v16 }
  0x20   : > { %v236_v19 = vmul.f32 0.0625, %v235_v18 }
  0x21   : > { %487 = vmatpush3.bf16.msra.mxu0 %v513_v14 }
  0x22   : > { %v237_v20 = vpack.c.bf16 %v236_v19, %v236_v19 }
  0x24   : > { %489 = vmatmul.mubr.msk.bf16.vlgmr.msra.gmra.mxu0 %vm226_vm1, %v237_v20 }
  0xe4   : > { %v324_v24 = vpop.f32.mrf.mxu0 }
  0xe5   : > { %v325_v25 = vadd.f32 %v324_v24, %v250_v23 }
  0xe6   : > { %v490_v26 = vpop.f32.mrf.mxu0 }
  0xe7   : > { %v457_v27 = vmul.f32 -1.442695, %v325_v25 }
  0xe8   : > { %v327_v28 = vpop.f32.mrf.mxu0 }
  0xe9   : > { %514 = vpow2.f32 %v457_v27 }
  0xea   : > { %v491_v29 = vpop.f32.mrf.mxu0 }
  0xf6   : > { %v515_v30 = vpop.eup %514 }
  0xf7   : > { %v333_v31 = vadd.f32 1.0, %v515_v30 }
  0xf9   : > { %516 = vrcp.f32 %v333_v31 }
 0x106   : > { %v517_v32 = vpop.eup %516 }
 0x107   : > { %v336_v33 = vmul.f32 %v517_v32, %v325_v25 }
 0x109   : > { %v337_v34 = vpack.c.bf16 %v336_v33, %v336_v33 }
 0x10b   : > { %495 = vmatmul.mubr.msk.bf16.vlgmr.msra.gmra.mxu1 %vm340_vm3, %v337_v34 }
 0x1cb   : > { %v382_v36 = vpop.f32.mrf.mxu1 }
 0x1cc   : > { %v383_v37 = vadd.f32 %v382_v36, %v339_v35 }
 0x1cd   : > { %v496_v38 = vpop.f32.mrf.mxu1 }
 0x1ce   : > { %v459_v39 = vmul.f32 -1.442695, %v383_v37 }
 0x1cf   : > { %v385_v40 = vpop.f32.mrf.mxu1 }
 0x1d0   : > { %518 = vpow2.f32 %v459_v39 }
 0x1d1   : > { %v497_v41 = vpop.f32.mrf.mxu1 }
 0x1dd   : > { %v519_v42 = vpop.eup %518 }
 0x1de   : > { %v391_v43 = vadd.f32 1.0, %v519_v42 }
 0x1e0   : > { %520 = vrcp.f32 %v391_v43 }
 0x1ed   : > { %v521_v44 = vpop.eup %520 }
 0x1ee   : > { %395 = vst.msk [vmem:[%s220_s21] sm:$0x1] %vm394_vm4, %v521_v44 }
 0x1ef PF: > { %s15_s18 = sadd.s32 1, %s528_s18  }
 0x1f0   : > { %p12_p4 = scmp.ge.s32.totalorder %s15_s18, 4  }
 0x1f2   :  { %14 = sbr.rel (!%p12_p4) target bundleno = 1 (0x1), region = 70 }

// kernel: efficientnet_forward.21
= control target key start
LH: loop header
LB: loop body
LE: loop exit
PB: predicated region body
PF: predicated region fallthrough
CT: control target
= control target key end

     0   :  { %s886_s15 = smov 0   ;;  %s888_s16 = smov 0   ;;  %s1074_s0 = inlined_call_operand.vmem [shape: bf16[2,1,6,6,96], index: 0, kind: input, shape index: {}]   ;;  %s1075_s1 = inlined_call_operand.vmem [shape: f32[9,1,1,96], index: 1, kind: input, shape index: {}]   ;;  %s1076_s2 = inlined_call_operand.vmem [shape: f32[1,1,96], index: 2, kind: input, shape index: {}]   ;;  %s1077_s3 = inlined_call_operand.vmem [shape: f32[1,1,96], index: 3, kind: input, shape index: {}]   ;;  %s1078_s4 = inlined_call_operand.vmem [shape: bf16[2,4,4,96], index: 4, kind: output, shape index: {}]  }
   0x1   :  { %s890_s17 = smov 0  }
   0x2 LB: > { %s26_s18 = sadd.s32 1, %s855_s16  ;;  %p742_p0 = scmp.ge.s32.totalorder %s859_s17, 1  ;;  %s859_s17 = sphi %s890_s17, %s14_s17   ;;  %s855_s16 = sphi %s888_s16, %s1080_s16   ;;  %s851_s15 = sphi %s886_s15, %s1079_s15  }
   0x3   : > { %p28_p1 = scmp.ge.s32.totalorder %s26_s18, 2  ;;  %p205_p2 = scmp.lt.s32.totalorder %s859_s17, 3 }
   0x5   : > { %s1082_s18 = smov (%p28_p1, %s26_s18), 0  ;;  %p206_p3 = pnand %p742_p0, %p205_p2 }
   0x6   : > { %p246_p4 = scmp.lt.s32.totalorder (!%p206_p3), %s851_s15, 1 }
   0x7   : > { %209 = sbr.rel (%p206_p3) target bundleno = 102 (0x66), region = 36 }
   0xc   : > { %s1084_s15 = smov (!%p246_p4, %s851_s15), 1  ;;  %v910_v0 = vld [vmem:[%s1075_s1] ss:$0 sm:$0xff]  ;;  %v915_v1 = vld [vmem:[%s1075_s1 + $0x1] ss:$0 sm:$0xff]  ;;  %vm610_vm0 = vcmask 779264  }
   0xd   : > { %s796_s19 = smul.u32 24, %s1084_s15  ;;  %v925_v2 = vld [vmem:[%s1075_s1 + $0x2] ss:$0 sm:$0xff]  ;;  %v930_v3 = vld [vmem:[%s1075_s1 + $0x4] ss:$0 sm:$0xff]  ;;  %s795_s23 = sshll.u32 %s1084_s15, 3 }
   0xe   : > { %v935_v4 = vld [vmem:[%s1075_s1 + $0x5] ss:$0 sm:$0xff]  ;;  %v944_v12 = vld [vmem:[%s1075_s1 + $0x3] ss:$0 sm:$0xff]  ;;  %v957_v24 = vld [vmem:[%s1075_s1 + $0x6] ss:$0 sm:$0xff] }
   0xf   : > { %s920_s26 = scalar_lea.vmem %s1074_s0, %s796_s19  ;;  %v962_v26 = vld [vmem:[%s1075_s1 + $0x7] ss:$0 sm:$0xff]  ;;  %v970_v31 = vld [vmem:[%s1075_s1 + $0x8] ss:$0 sm:$0xff] }
  0x10   : > { %v271_v5 = vld [vmem:[%s920_s26] sm:$0x3]  ;;  %v751_v11 = vld [vmem:[%s920_s26 + $0x4] sm:$0x3]  ;;  %v769_v18 = vld [vmem:[%s920_s26 + $0x8] sm:$0x3] }
  0x11   : > { %v290_v6 = vld [vmem:[%s920_s26] sm:$0x7]  ;;  %v276_v8 = vunpack.c.l.bf16 %v271_v5  ;;  %v757_v13 = vld [vmem:[%s920_s26 + $0x4] sm:$0x7]  ;;  %v369_v15 = vunpack.c.l.bf16 %v751_v11  ;;  %v775_v19 = vld [vmem:[%s920_s26 + $0x8] sm:$0x7]  ;;  %v466_v25 = vunpack.c.l.bf16 %v769_v18 }
  0x12   : > { %v326_v7 = vld [vmem:[%s920_s26] sm:$0x6]  ;;  %v296_v9 = vunpack.c.l.bf16 %v290_v6  ;;  %v763_v14 = vld [vmem:[%s920_s26 + $0x4] sm:$0x6]  ;;  %v393_v16 = vunpack.c.l.bf16 %v757_v13  ;;  %v781_v20 = vld [vmem:[%s920_s26 + $0x8] sm:$0x6]  ;;  %v490_v30 = vunpack.c.l.bf16 %v775_v19 }
  0x13   : > { %v332_v10 = vunpack.c.l.bf16 %v326_v7  ;;  %v429_v17 = vunpack.c.l.bf16 %v763_v14  ;;  %v286_v21 = vmul.f32 %v910_v0, %v276_v8  ;;  %v272_v27 = vld [vmem:[%s920_s26 + $0x4] sm:$0x3]  ;;  %v526_v36 = vunpack.c.l.bf16 %v781_v20  ;;  %v752_v37 = vld [vmem:[%s920_s26 + $0x8] sm:$0x3]  ;;  %v770_v48 = vld [vmem:[%s920_s26 + $0xc] sm:$0x3] }
  0x14   : > { %v306_v22 = vmul.f32 %v915_v1, %v296_v9  ;;  %v403_v28 = vmul.f32 %v930_v3, %v393_v16  ;;  %v291_v32 = vld [vmem:[%s920_s26 + $0x4] sm:$0x7]  ;;  %v758_v38 = vld [vmem:[%s920_s26 + $0x8] sm:$0x7]  ;;  %v379_v39 = vmul.f32 %v944_v12, %v369_v15  ;;  %v476_v40 = vmul.f32 %v957_v24, %v466_v25  ;;  %v776_v53 = vld [vmem:[%s920_s26 + $0xc] sm:$0x7] }
  0x15   : > { %v342_v23 = vmul.f32 %v925_v2, %v332_v10  ;;  %v439_v29 = vmul.f32 %v935_v4, %v429_v17  ;;  %v327_v33 = vld [vmem:[%s920_s26 + $0x4] sm:$0x6]  ;;  %v979_v41 = vmul.f32 %v962_v26, %v490_v30  ;;  %v277_v42 = vunpack.c.l.bf16 %v272_v27  ;;  %v764_v47 = vld [vmem:[%s920_s26 + $0x8] sm:$0x6]  ;;  %v782_v58 = vld [vmem:[%s920_s26 + $0xc] sm:$0x6] }
  0x16   : > { %v314_v34 = vrot.slane %v306_v22, 1  ;;  %v411_v44 = vrot.slane %v403_v28, 1  ;;  %v297_v45 = vunpack.c.l.bf16 %v291_v32  ;;  %v333_v46 = vunpack.c.l.bf16 %v327_v33  ;;  %v273_v63 = vld [vmem:[%s920_s26 + $0x8] sm:$0x3]  ;;  %v753_v20 = vld [vmem:[%s920_s26 + $0xc] sm:$0x3] }
  0x17   : > { %v350_v35 = vrot.slane %v342_v23, 2  ;;  %v447_v49 = vrot.slane %v439_v29, 2  ;;  %v984_v50 = vmul.f32 %v970_v31, %v526_v36  ;;  %v370_v51 = vunpack.c.l.bf16 %v752_v37  ;;  %v292_v9 = vld [vmem:[%s920_s26 + $0x8] sm:$0x7]  ;;  %v759_v27 = vld [vmem:[%s920_s26 + $0xc] sm:$0x7] }
  0x18   : > { %v322_v43 = vadd.f32 %v314_v34, %v286_v21  ;;  %v394_v52 = vunpack.c.l.bf16 %v758_v38  ;;  %v287_v55 = vmul.f32 %v910_v0, %v277_v42  ;;  %v307_v56 = vmul.f32 %v915_v1, %v297_v45  ;;  %v328_v10 = vld [vmem:[%s920_s26 + $0x8] sm:$0x6]  ;;  %v765_v28 = vld [vmem:[%s920_s26 + $0xc] sm:$0x6]  ;;  %v771_v34 = vld [vmem:[%s920_s26 + $0x10] sm:$0x3] }
  0x19   : > { %v343_v57 = vmul.f32 %v925_v2, %v333_v46  ;;  %v508_v59 = vrot.slane %v979_v41, 1  ;;  %v430_v61 = vunpack.c.l.bf16 %v764_v47  ;;  %v467_v62 = vunpack.c.l.bf16 %v770_v48  ;;  %v783_v45 = vld [vmem:[%s920_s26 + $0x10] sm:$0x6] }
  0x1a   : > { %v358_v54 = vadd.f32 %v350_v35, %v322_v43  ;;  %v404_v60 = vmul.f32 %v930_v3, %v394_v52  ;;  %v315_v6 = vrot.slane %v307_v56, 1  ;;  %v491_v8 = vunpack.c.l.bf16 %v776_v53 }
  0x1b   : > { %v351_v7 = vrot.slane %v343_v57, 2  ;;  %v544_v11 = vrot.slane %v984_v50, 2  ;;  %v380_v13 = vmul.f32 %v944_v12, %v370_v51  ;;  %v440_v14 = vmul.f32 %v935_v4, %v430_v61 }
  0x1c   : > { %v383_v5 = vadd.f32 %v379_v39, %v358_v54  ;;  %v527_v15 = vunpack.c.l.bf16 %v782_v58  ;;  %v323_v17 = vadd.f32 %v315_v6, %v287_v55  ;;  %v412_v18 = vrot.slane %v404_v60, 1  ;;  %v274_v54 = vld [vmem:[%s920_s26 + $0xc] sm:$0x3]  ;;  %v1026_v6 = vld [vmem:[%s1077_s3] ss:$0 sm:$0xff] }
  0x1d   : > { %v278_v19 = vunpack.c.l.bf16 %v273_v63  ;;  %v477_v21 = vmul.f32 %v957_v24, %v467_v62  ;;  %v501_v22 = vmul.f32 %v962_v26, %v491_v8  ;;  %v298_v23 = vunpack.c.l.bf16 %v292_v9  ;;  %v293_v60 = vld [vmem:[%s920_s26 + $0xc] sm:$0x7] }
  0x1e   : > { %v419_v16 = vadd.f32 %v411_v44, %v383_v5  ;;  %v334_v25 = vunpack.c.l.bf16 %v328_v10  ;;  %v359_v30 = vadd.f32 %v351_v7, %v323_v17  ;;  %v448_v32 = vrot.slane %v440_v14, 2  ;;  %v777_v44 = vld [vmem:[%s920_s26 + $0x10] sm:$0x7] }
  0x1f   : > { %v537_v33 = vmul.f32 %v970_v31, %v527_v15  ;;  %v288_v35 = vmul.f32 %v910_v0, %v278_v19  ;;  %v308_v36 = vmul.f32 %v915_v1, %v298_v23  ;;  %v371_v38 = vunpack.c.l.bf16 %v753_v20  ;;  %v760_v17 = vld [vmem:[%s920_s26 + $0x10] sm:$0x7] }
  0x20   : > { %v455_v29 = vadd.f32 %v447_v49, %v419_v16  ;;  %v344_v37 = vmul.f32 %v925_v2, %v334_v25  ;;  %v384_v41 = vadd.f32 %v380_v13, %v359_v30  ;;  %v395_v42 = vunpack.c.l.bf16 %v759_v27 }
  0x21   : > { %v431_v43 = vunpack.c.l.bf16 %v765_v28  ;;  %v509_v46 = vrot.slane %v501_v22, 1  ;;  %v316_v47 = vrot.slane %v308_v36, 1  ;;  %v468_v49 = vunpack.c.l.bf16 %v771_v34  ;;  %v772_v34 = vld [vmem:[%s920_s26 + $0x14] sm:$0x3] }
  0x22   : > { %v480_v39 = vadd.f32 %v476_v40, %v455_v29  ;;  %v352_v48 = vrot.slane %v344_v37, 2  ;;  %v420_v51 = vadd.f32 %v412_v18, %v384_v41  ;;  %v405_v52 = vmul.f32 %v930_v3, %v395_v42  ;;  %v1017_v40 = vld [vmem:[%s1076_s2] ss:$0 sm:$0xff]  ;;  %v766_v18 = vld [vmem:[%s920_s26 + $0x10] sm:$0x6] }
  0x23   : > { %v441_v53 = vmul.f32 %v935_v4, %v431_v43  ;;  %v324_v55 = vadd.f32 %v316_v47, %v288_v35  ;;  %v381_v56 = vmul.f32 %v944_v12, %v371_v38  ;;  %v492_v57 = vunpack.c.l.bf16 %v777_v44  ;;  %v784_v43 = vld [vmem:[%s920_s26 + $0x14] sm:$0x6] }
  0x24   : > { %v516_v50 = vadd.f32 %v508_v59, %v480_v39  ;;  %v528_v58 = vunpack.c.l.bf16 %v783_v45  ;;  %v329_v59 = vld [vmem:[%s920_s26 + $0xc] sm:$0x6]  ;;  %v456_v62 = vadd.f32 %v448_v32, %v420_v51  ;;  %v545_v63 = vrot.slane %v537_v33, 2 }
  0x25   : > { %v478_v5 = vmul.f32 %v957_v24, %v468_v49  ;;  %v360_v7 = vadd.f32 %v352_v48, %v324_v55  ;;  %v413_v8 = vrot.slane %v405_v52, 1  ;;  %v449_v9 = vrot.slane %v441_v53, 2 }
  0x26   : > { %v552_v61 = vadd.f32 %v544_v11, %v516_v50  ;;  %v279_v10 = vunpack.c.l.bf16 %v274_v54  ;;  %v481_v14 = vadd.f32 %v477_v21, %v456_v62  ;;  %v299_v15 = vunpack.c.l.bf16 %v293_v60  ;;  %v754_v11 = vld [vmem:[%s920_s26 + $0x10] sm:$0x3] }
  0x27   : > { %v335_v16 = vunpack.c.l.bf16 %v329_v59  ;;  %v385_v19 = vadd.f32 %v381_v56, %v360_v7  ;;  %v502_v20 = vmul.f32 %v962_v26, %v492_v57  ;;  %v538_v22 = vmul.f32 %v970_v31, %v528_v58 }
  0x28   : > { %v563_v13 = vmul.f32 %v1017_v40, %v552_v61  ;;  %v289_v23 = vmul.f32 %v910_v0, %v279_v10  ;;  %v517_v27 = vadd.f32 %v509_v46, %v481_v14  ;;  %v309_v21 = vmul.f32 %v915_v1, %v299_v15  ;;  %v778_v0 = vld [vmem:[%s920_s26 + $0x14] sm:$0x7]  ;;  %s270_s26 = scalar_lea.vmem %s1078_s4, %s795_s23 }
  0x29   : > { %v345_v28 = vmul.f32 %v925_v2, %v335_v16  ;;  %v421_v29 = vadd.f32 %v413_v8, %v385_v19  ;;  %v372_v30 = vunpack.c.l.bf16 %v754_v11  ;;  %v396_v32 = vunpack.c.l.bf16 %v760_v17 }
  0x2a   : > { %v1036_v25 = vadd.f32 %v1026_v6, %v563_v13  ;;  %v432_v33 = vunpack.c.l.bf16 %v766_v18  ;;  %v553_v36 = vadd.f32 %v545_v63, %v517_v27  ;;  %v317_v37 = vrot.slane %v309_v21, 1 }
  0x2b   : > { %v353_v38 = vrot.slane %v345_v28, 2  ;;  %v457_v39 = vadd.f32 %v449_v9, %v421_v29  ;;  %v510_v41 = vrot.slane %v502_v20, 1  ;;  %v382_v42 = vmul.f32 %v944_v12, %v372_v30 }
  0x2c   : > { %v789_v35 = vmul.f32 -1.442695, %v1036_v25  ;;  %v406_v1 = vmul.f32 %v930_v3, %v396_v32  ;;  %v564_v2 = vmul.f32 %v1017_v40, %v553_v36  ;;  %v325_v44 = vadd.f32 %v317_v37, %v289_v23 }
  0x2d   : > { %v442_v45 = vmul.f32 %v935_v4, %v432_v33  ;;  %v482_v46 = vadd.f32 %v478_v5, %v457_v39  ;;  %v546_v47 = vrot.slane %v538_v22, 2  ;;  %v469_v48 = vunpack.c.l.bf16 %v772_v34 }
  0x2e   : > { %821 = vpow2.f32 %v789_v35  ;;  %v493_v49 = vunpack.c.l.bf16 %v778_v0  ;;  %v575_v50 = vadd.f32 %v1026_v6, %v564_v2  ;;  %v361_v51 = vadd.f32 %v353_v38, %v325_v44 }
  0x2f   : > { %v414_v52 = vrot.slane %v406_v1, 1  ;;  %v529_v53 = vunpack.c.l.bf16 %v784_v43  ;;  %v518_v54 = vadd.f32 %v510_v41, %v482_v46  ;;  %v450_v3 = vrot.slane %v442_v45, 2 }
  0x30   : > { %v790_v12 = vmul.f32 -1.442695, %v575_v50  ;;  %v386_v55 = vadd.f32 %v382_v42, %v361_v51  ;;  %v503_v56 = vmul.f32 %v962_v26, %v493_v49  ;;  %v479_v4 = vmul.f32 %v957_v24, %v469_v48 }
  0x31   : > { %v554_v57 = vadd.f32 %v546_v47, %v518_v54  ;;  %v539_v60 = vmul.f32 %v970_v31, %v529_v53 }
  0x32   : > { %823 = vpow2.f32 %v790_v12  ;;  %v422_v58 = vadd.f32 %v414_v52, %v386_v55  ;;  %v511_v62 = vrot.slane %v503_v56, 1 }
  0x33   : > { %v565_v59 = vmul.f32 %v1017_v40, %v554_v57  ;;  %v547_v7 = vrot.slane %v539_v60, 2 }
  0x34   : > { %v458_v61 = vadd.f32 %v450_v3, %v422_v58 }
  0x35   : > { %v576_v63 = vadd.f32 %v1026_v6, %v565_v59 }
  0x36   : > { %v483_v5 = vadd.f32 %v479_v4, %v458_v61 }
  0x37   : > { %v791_v8 = vmul.f32 -1.442695, %v576_v63 }
  0x38   : > { %v519_v9 = vadd.f32 %v511_v62, %v483_v5 }
  0x39   : > { %825 = vpow2.f32 %v791_v8 }
  0x3a   : > { %v555_v13 = vadd.f32 %v547_v7, %v519_v9 }
  0x3b   : > { %v822_v10 = vpop.eup %821 }
  0x3c   : > { %v590_v26 = vadd.f32 1.0, %v822_v10  ;;  %v566_v24 = vmul.f32 %v1017_v40, %v555_v13 }
  0x3e   : > { %827 = vrcp.f32 %v590_v26  ;;  %v577_v31 = vadd.f32 %v1026_v6, %v566_v24 }
  0x3f   : > { %v824_v14 = vpop.eup %823 }
  0x40   : > { %v591_v15 = vadd.f32 1.0, %v824_v14  ;;  %v792_v16 = vmul.f32 -1.442695, %v577_v31 }
  0x42   : > { %829 = vrcp.f32 %v591_v15 }
  0x43   : > { %831 = vpow2.f32 %v792_v16 }
  0x46   : > { %v826_v11 = vpop.eup %825 }
  0x47   : > { %v592_v17 = vadd.f32 1.0, %v826_v11 }
  0x49   : > { %833 = vrcp.f32 %v592_v17 }
  0x4b   : > { %v828_v18 = vpop.eup %827 }
  0x4c   : > { %v602_v19 = vmul.f32 %v828_v18, %v1036_v25 }
  0x4e   : > { %v606_v40 = vpack.c.bf16 %v602_v19, %v602_v19 }
  0x4f   : > { %v830_v6 = vpop.eup %829 }
  0x50   : > { %611 = vst.msk [vmem:[%s270_s26] sm:$0x3] %vm610_vm0, %v606_v40  ;;  %v832_v20 = vpop.eup %831  ;;  %v603_v22 = vmul.f32 %v830_v6, %v575_v50 }
  0x51   : > { %v593_v23 = vadd.f32 1.0, %v832_v20 }
  0x52   : > { %v607_v27 = vpack.c.bf16 %v603_v22, %v603_v22 }
  0x53   : > { %835 = vrcp.f32 %v593_v23 }
  0x54   : > { %612 = vst.msk [vmem:[%s270_s26 + $0x2] sm:$0x3] %vm610_vm0, %v607_v27 }
  0x56   : > { %v834_v21 = vpop.eup %833 }
  0x57   : > { %v604_v28 = vmul.f32 %v834_v21, %v576_v63 }
  0x59   : > { %v608_v29 = vpack.c.bf16 %v604_v28, %v604_v28 }
  0x5b   : > { %613 = vst.msk [vmem:[%s270_s26 + $0x4] sm:$0x3] %vm610_vm0, %v608_v29 }
  0x60   : > { %v836_v25 = vpop.eup %835 }
  0x61   : > { %v605_v30 = vmul.f32 %v836_v25, %v577_v31 }
  0x63   : > { %v609_v32 = vpack.c.bf16 %v605_v30, %v605_v30 }
  0x65   : > { %614 = vst.msk [vmem:[%s270_s26 + $0x6] sm:$0x3] %vm610_vm0, %v609_v32 }
  0x66 PF: > { %s14_s17 = sadd.s32 1, %s859_s17   ;;  %s1079_s15 = smov %s855_s16 }
  0x67   : > { %p11_p5 = scmp.ge.s32.totalorder %s14_s17, 4   ;;  %s1080_s16 = smov %s1082_s18 }
  0x69   :  { %13 = sbr.rel (!%p11_p5) target bundleno = 2 (0x2), region = 85 }

// kernel: efficientnet_forward.25
= control target key start
LH: loop header
LB: loop body
LE: loop exit
PB: predicated region body
PF: predicated region fallthrough
CT: control target
= control target key end

     0   :  { %s419_s6 = smov 0   ;;  %s421_s7 = smov 0   ;;  %s510_s0 = inlined_call_operand.vmem [shape: bf16[2,16,1792], index: 0, kind: input, shape index: {}]   ;;  %s511_s1 = inlined_call_operand.vmem [shape: f32[2,1,1792], index: 1, kind: output, shape index: {}]  }
   0x1   :  { %s423_s8 = smov 0   ;;  %s425_s9 = smov 0  }
   0x2   :  { %s427_s10 = smov 0   ;;  %s429_s11 = smov 0  }
   0x3   :  { %s431_s12 = smov 0  }
   0x4 LB: > { %s20_s13 = sadd.s32 1, %s399_s10  ;;  %s23_s14 = sadd.s32 1, %s403_s11  ;;  %s407_s12 = sphi %s431_s12, %s11_s12   ;;  %s403_s11 = sphi %s429_s11, %s517_s11   ;;  %s399_s10 = sphi %s427_s10, %s516_s10   ;;  %s395_s9 = sphi %s425_s9, %s515_s9   ;;  %s391_s8 = sphi %s423_s8, %s514_s8   ;;  %s387_s7 = sphi %s421_s7, %s513_s7   ;;  %s383_s6 = sphi %s419_s6, %s512_s6  }
   0x5   : > { %p21_p0 = scmp.ge.s32.totalorder %s20_s13, 14  ;;  %p39_p1 = scmp.ne.s32.totalorder %s387_s7, %s383_s6 }
   0x6   : > { %p40_p2 = scmp.eq.s32.totalorder %s407_s12, 0  ;;  %s32_s18 = sadd.s32 1, %s387_s7 }
   0x7   : > { %s519_s13 = smov (%p21_p0, %s20_s13), 0  ;;  %s521_s14 = smov (!%p21_p0, %s23_s14), %s403_s11 }
   0x8   : > { %p41_p3 = por %p40_p2, %p39_p1  ;;  %p25_p4 = scmp.ge.s32.totalorder %s521_s14, 2 }
   0x9   : > { %s28_s15 = ssub.s32 %s399_s10, %s519_s13  ;;  %p284_p6 = scmp.ge.s32.totalorder %s407_s12, 28 }
   0xa   : > { %s523_s14 = smov (%p25_p4, %s521_s14), 0 }
   0xb   : > { %s27_s16 = ssub.s32 %s403_s11, %s523_s14  ;;  %93 = sbr.rel (%p284_p6) target bundleno = 24 (0x18), region = 16 }
   0xc   : > { %s29_s17 = sor.u32 %s28_s15, %s27_s16 }
   0xd   : > { %p30_p5 = scmp.eq.s32.totalorder %s29_s17, 0 }
   0xf   : > { %s470_s19 = scalar_select %p30_p5, %s387_s7, %s32_s18  }
  0x10   : > { %96 = sbr.rel (!%p41_p3) target bundleno = 24 (0x18), region = 20  ;;  %s98_s20 = sand.u32 (%p41_p3), 1, %s387_s7  }
  0x11   : > { %s295_s21 = smul.u32 (%p41_p3), 28, %s403_s11  ;;  %s285_s22 = sshll.u32 (%p41_p3), %s98_s20, 3 }
  0x12   : > { %s100_s28 = scalar_lea.vmem (%p41_p3), [#allocation2], %s285_s22 }
  0x13   : > { %s102_s23 = sadd.s32 (%p41_p3), %s399_s10, %s295_s21 }
  0x14   : > { %s286_s24 = sshll.u32 (%p41_p3), %s102_s23, 2 }
  0x15   : > { %s104_s27 = scalar_lea.vmem %s510_s0, %s286_s24 }
  0x16   : > { %v121_v0 = vld [vmem:[%s104_s27] sm:$0xf]  ;;  %v123_v1 = vld [vmem:[%s104_s27 + $0x38] sm:$0xf] }
  0x17   : > { %122 = vst [vmem:[%s100_s28] sm:$0xf] %v121_v0  ;;  %124 = vst [vmem:[%s100_s28 + $0x4] sm:$0xf] %v123_v1 }
  0x18 PF: > { %p287_p7 = scmp.ge.s32.totalorder %s407_s12, 1  ;;  %p151_p8 = scmp.lt.s32.totalorder %s407_s12, 29 }
  0x1a   : > { %p152_p9 = pnand %p287_p7, %p151_p8 }
  0x1b   : > { %s158_s29 = sand.u32 (!%p152_p9), 1, %s383_s6   ;;  %p179_p10 = scmp.lt.s32.totalorder (!%p152_p9), %s395_s9, 1 }
  0x1c   : > { %155 = sbr.rel (%p152_p9) target bundleno = 53 (0x35), region = 61  ;;  %s288_s30 = sshll.u32 (!%p152_p9), %s158_s29, 3 }
  0x1d   : > { %s160_s2 = scalar_lea.vmem (!%p152_p9), [#allocation2], %s288_s30  ;;  %p181_p11 = scmp.lt.s32.totalorder (!%p152_p9), %s391_s8, 13 }
  0x21   : > { %v292_v2 = vld [vmem:[%s160_s2] sm:$0xff]   ;;  %s525_s9 = smov (!%p179_p10, %s395_s9), 1  ;;  %s527_s8 = smov (!%p181_p11, %s391_s8), 13 }
  0x22   : > { %v293_v3 = vunpack.c.l.bf16 %v292_v2  ;;  %v294_v4 = vunpack.c.h.bf16 %v292_v2  ;;  %s296_s3 = smul.u32 14, %s525_s9 }
  0x24   : > { %v190_v5 = vadd.f32 %v294_v4, %v293_v3  ;;  %s184_s4 = sadd.s32 %s296_s3, %s527_s8 }
  0x25   : > { %s185_s15 = scalar_lea.vmem %s511_s1, %s184_s4 }
  0x26   : > { %v191_v6 = vrot.slane %v190_v5, 4 }
  0x28   : > { %v192_v7 = vadd.f32 %v191_v6, %v190_v5 }
  0x2a   : > { %v193_v8 = vrot.slane %v192_v7, 2 }
  0x2c   : > { %v194_v9 = vadd.f32 %v193_v8, %v192_v7 }
  0x2e   : > { %v195_v10 = vrot.slane %v194_v9, 1 }
  0x30   : > { %v196_v11 = vadd.f32 %v195_v10, %v194_v9 }
  0x32   : > { %v197_v12 = vmul.f32 0.0625, %v196_v11 }
  0x34   : > { %198 = vst [vmem:[%s185_s15] sm:$0x1] %v197_v12 }
  0x35 PF: > { %s11_s12 = sadd.s32 1, %s407_s12   ;;  %s512_s6 = smov %s387_s7 }
  0x36   : > { %p8_p12 = scmp.ge.s32.totalorder %s11_s12, 30   ;;  %s513_s7 = smov %s470_s19 }
  0x37   : > { %s514_s8 = smov %s399_s10  ;;  %s515_s9 = smov %s403_s11 }
  0x38   : > { %s516_s10 = smov %s519_s13  ;;  %s517_s11 = smov %s523_s14 }
  0x39   :  { %10 = sbr.rel (!%p8_p12) target bundleno = 4 (0x4), region = 100 }

// kernel: efficientnet_forward.23
= control target key start
LH: loop header
LB: loop body
LE: loop exit
PB: predicated region body
PF: predicated region fallthrough
CT: control target
= control target key end

     0   :  { %s752_s21 = smov 0   ;;  %s754_s22 = smov 0   ;;  %s820_s0 = inlined_call_operand.vmem [shape: bf16[2,16,96], index: 0, kind: input, shape index: {}]   ;;  %s821_s1 = inlined_call_operand.vmem [shape: bf16[96,24], index: 1, kind: input, shape index: {}]   ;;  %s822_s2 = inlined_call_operand.vmem [shape: f32[1,24], index: 2, kind: input, shape index: {}]   ;;  %s823_s3 = inlined_call_operand.vmem [shape: f32[1,24], index: 3, kind: input, shape index: {}]   ;;  %s824_s4 = inlined_call_operand.vmem [shape: f32[2,1,96], index: 4, kind: input, shape index: {}]   ;;  %s825_s5 = inlined_call_operand.vmem [shape: bf16[2,16,24], index: 5, kind: input, shape index: {}]   ;;  %s826_s6 = inlined_call_operand.vmem [shape: bf16[2,16,24], index: 6, kind: output, shape index: {}]  }
   0x1   :  { %s756_s23 = smov 0  }
   0x2 LB: > { %s28_s24 = sadd.s32 1, %s709_s22  ;;  %p602_p0 = scmp.ge.s32.totalorder %s713_s23, 1  ;;  %s713_s23 = sphi %s756_s23, %s16_s23   ;;  %s709_s22 = sphi %s754_s22, %s828_s22   ;;  %s705_s21 = sphi %s752_s21, %s827_s21  }
   0x3   : > { %p30_p1 = scmp.ge.s32.totalorder %s28_s24, 2  ;;  %p258_p2 = scmp.lt.s32.totalorder %s713_s23, 3 }
   0x5   : > { %s830_s24 = smov (%p30_p1, %s28_s24), 0  ;;  %p259_p3 = pnand %p602_p0, %p258_p2 }
   0x6   : > { %p309_p4 = scmp.lt.s32.totalorder (!%p259_p3), %s705_s21, 1 }
   0x7   : > { %262 = sbr.rel (%p259_p3) target bundleno = 243 (0xf3), region = 44 }
   0xc   : > { %v685_v0 = vld [vmem:[%s821_s1 + $0x28] sm:$0xff]   ;;  %v715_v1 = vmov 0.0   ;;  %v686_v2 = vld [vmem:[%s821_s1 + $0x20] sm:$0xff]   ;;  %vm716_vm0 = vmmov 0   ;;  %s832_s21 = smov (!%p309_p4, %s705_s21), 1  ;;  %v687_v3 = vld [vmem:[%s821_s1 + $0x18] sm:$0xff]  }
   0xd   : > { %643 = vmatprep.subr.bf16.mxu0 %v715_v1  ;;  %655 = vmatprep.mubr.msk.bf16.mxu0 %vm716_vm0, %v715_v1  ;;  %s779_s7 = sshll.u32 %s832_s21, 3  ;;  %v688_v4 = vld [vmem:[%s821_s1 + $0x10] sm:$0xff]   ;;  %s320_s15 = scalar_lea.vmem %s824_s4, %s832_s21  ;;  %v689_v8 = vld [vmem:[%s821_s1 + $0x8] sm:$0xff]   ;;  %v690_v12 = vld [vmem:[%s821_s1] sm:$0xff]   ;;  %vm404_vm1 = vcmask 785408   ;;  %vm481_vm2 = vcmask 191488  }
   0xe   : > { %644 = vmatpush3.bf16.msra.mxu0 %v685_v0  ;;  %s316_s10 = scalar_lea.vmem %s820_s0, %s779_s7  ;;  %v609_v9 = vld [vmem:[%s320_s15] ss:$0 sm:$0xff]  ;;  %s329_s25 = scalar_lea.vmem %s825_s5, %s779_s7 }
   0xf   : > { %645 = vmatprep.subr.bf16.mxu0 %v715_v1  ;;  %v629_v5 = vld [vmem:[%s316_s10] sm:$0xff]   ;;  %s339_s9 = scalar_lea.vmem %s826_s6, %s779_s7 }
  0x10   : > { %v630_v6 = vunpack.c.l.bf16 %v629_v5  ;;  %v631_v7 = vunpack.c.h.bf16 %v629_v5  ;;  %v617_v14 = vld [vmem:[%s822_s2] ss:$0 sm:$0xff] }
  0x11   : > { %v633_v15 = vld [vmem:[%s329_s25] sm:$0xff]  }
  0x12   : > { %646 = vmatpush3.bf16.msra.mxu0 %v686_v2  ;;  %v353_v10 = vmul.f32 %v630_v6, %v609_v9  ;;  %v354_v11 = vmul.f32 %v631_v7, %v609_v9  ;;  %v618_v17 = vld [vmem:[%s823_s3] ss:$0 sm:$0xff]  ;;  %v634_v19 = vunpack.c.l.bf16 %v633_v15  ;;  %v635_v25 = vunpack.c.h.bf16 %v633_v15 }
  0x13   : > { %647 = vmatprep.subr.bf16.mxu0 %v715_v1 }
  0x14   : > { %v355_v13 = vpack.c.bf16 %v354_v11, %v353_v10 }
  0x16   : > { %648 = vmatpush3.bf16.msra.mxu0 %v687_v3 }
  0x17   : > { %649 = vmatprep.subr.bf16.mxu0 %v715_v1 }
  0x1a   : > { %650 = vmatpush3.bf16.msra.mxu0 %v688_v4 }
  0x1b   : > { %651 = vmatprep.subr.bf16.mxu0 %v715_v1 }
  0x1e   : > { %652 = vmatpush3.bf16.msra.mxu0 %v689_v8 }
  0x1f   : > { %653 = vmatprep.subr.bf16.mxu0 %v715_v1 }
  0x22   : > { %654 = vmatpush3.bf16.msra.mxu0 %v690_v12 }
  0x25   : > { %656 = vmatmul.mubr.msk.bf16.vlgmr.msra.gmra.mxu0 %vm404_vm1, %v355_v13 }
  0xe5   : > { %v442_v16 = vpop.f32.mrf.mxu0 }
  0xe6   : > { %v456_v18 = vmul.f32 %v617_v14, %v442_v16 }
  0xe7   : > { %v657_v20 = vpop.f32.mrf.mxu0 }
  0xe8   : > { %v465_v21 = vadd.f32 %v618_v17, %v456_v18 }
  0xe9   : > { %v445_v22 = vpop.f32.mrf.mxu0 }
  0xea   : > { %v471_v23 = vadd.f32 %v634_v19, %v465_v21  ;;  %v457_v24 = vmul.f32 %v617_v14, %v445_v22 }
  0xeb   : > { %v658_v26 = vpop.f32.mrf.mxu0 }
  0xec   : > { %v626_v27 = vpack.c.bf16 %v471_v23, %v471_v23  ;;  %v466_v28 = vadd.f32 %v618_v17, %v457_v24 }
  0xee   : > { %482 = vst.msk [vmem:[%s339_s9] sm:$0xf] %vm481_vm2, %v626_v27  ;;  %v472_v29 = vadd.f32 %v635_v25, %v466_v28 }
  0xf0   : > { %v627_v30 = vpack.c.bf16 %v472_v29, %v472_v29 }
  0xf2   : > { %483 = vst.msk [vmem:[%s339_s9 + $0x4] sm:$0xf] %vm481_vm2, %v627_v30 }
  0xf3 PF: > { %s16_s23 = sadd.s32 1, %s713_s23   ;;  %s827_s21 = smov %s709_s22 }
  0xf4   : > { %p13_p5 = scmp.ge.s32.totalorder %s16_s23, 4   ;;  %s828_s22 = smov %s830_s24 }
  0xf6   :  { %15 = sbr.rel (!%p13_p5) target bundleno = 2 (0x2), region = 80 }

// kernel: efficientnet_forward.24
= control target key start
LH: loop header
LB: loop body
LE: loop exit
PB: predicated region body
PF: predicated region fallthrough
CT: control target
= control target key end

     0   :  { %vm165_vm0 = vcmask 1043456   ;;  %v1860_v1 = vmov 0   ;;  %vm158_vm1 = vcmask 195584   ;;  %v583_v45 = vlaneseq  ;;  %s2568_s1 = inlined_call_operand.vmem [shape: bf16[24,1792], index: 1, kind: input, shape index: {}]   ;;  %s2569_s0 = inlined_call_operand.vmem [shape: bf16[1,32,24], index: 0, kind: input, shape index: {}]   ;;  %s2570_s2 = inlined_call_operand.vmem [shape: f32[1,1792], index: 2, kind: input, shape index: {}]   ;;  %s2571_s3 = inlined_call_operand.vmem [shape: f32[1,1792], index: 3, kind: input, shape index: {}]   ;;  %s2572_s4 = inlined_call_operand.vmem [shape: bf16[1,32,1792], index: 4, kind: output, shape index: {}]  }
   0x1   :  { %v36_v0 = vld [vmem:[%s2568_s1 + $0x70] sm:$0xff]  ;;  %240 = vmatprep.mubr.bf16.mxu0 %v1860_v1  ;;  %250 = vmatprep.mubr.bf16.mxu1 %v1860_v1  ;;  %v1601_v4 = vld [vmem:[%s2568_s1 + $0x4] ss:$56 sps:$4 sm:$0xff]   ;;  %v1603_v6 = vld [vmem:[%s2568_s1] ss:$56 sps:$4 sm:$0xff]  }
   0x2   :  { %v1448_v2 = vcombine.high %v36_v0, %v36_v0  ;;  %v1447_v3 = vcombine.low %v36_v0, %v36_v0  ;;  %v37_v7 = vld [vmem:[%s2568_s1 + $0x78] sm:$0xff]  ;;  %v38_v9 = vld [vmem:[%s2568_s1 + $0x80] sm:$0xff]  ;;  %v1914_v14 = vld [vmem:[%s2569_s0 + $0x8] sm:$0xff]   ;;  %v2016_v46 = vshrl.u32 %v583_v45, 7 }
   0x3   :  { %v1450_v8 = vcombine.high %v37_v7, %v37_v7  ;;  %v1452_v10 = vcombine.high %v38_v9, %v38_v9  ;;  %v1449_v11 = vcombine.low %v37_v7, %v37_v7  ;;  %v1451_v12 = vcombine.low %v38_v9, %v38_v9  ;;  %v1909_v13 = vld [vmem:[%s2569_s0] sm:$0xff]   ;;  %v1615_v16 = vld [vmem:[%s2568_s1 + $0x14] ss:$56 sps:$4 sm:$0xff]   ;;  %v1613_v22 = vld [vmem:[%s2568_s1 + $0x10] ss:$56 sps:$4 sm:$0xff]  }
   0x4   :  { %1461 = vmatprep.subr.msk.bf16.mxu0 %vm165_vm0, %v1448_v2  ;;  %1594 = vmatprep.subr.msk.bf16.mxu1 %vm165_vm0, %v1448_v2  ;;  %v167_v5 = vsel %vm165_vm0, %v1447_v3, 0  ;;  %v1612_v15 = vld [vmem:[%s2568_s1 + $0xc] ss:$56 sps:$4 sm:$0xff]   ;;  %v40_v20 = vld [vmem:[%s2568_s1 + $0x90] sm:$0xff]  ;;  %v1610_v21 = vld [vmem:[%s2568_s1 + $0x8] ss:$56 sps:$4 sm:$0xff]  }
   0x5   :  { %221 = vmatpush1.bf16.msra.mxu0 %v167_v5  ;;  %1596 = vmatpush1.bf16.msra.mxu1 %v167_v5  ;;  %v173_v17 = vsel %vm165_vm0, %v1449_v11, 0  ;;  %v179_v18 = vsel %vm165_vm0, %v1451_v12, 0  ;;  %v39_v19 = vld [vmem:[%s2568_s1 + $0x88] sm:$0xff]  ;;  %v1456_v24 = vcombine.high %v40_v20, %v40_v20  ;;  %v1455_v26 = vcombine.low %v40_v20, %v40_v20  ;;  %v1622_v29 = vld [vmem:[%s2568_s1 + $0x1c] ss:$56 sps:$4 sm:$0xff]   ;;  %v42_v32 = vld [vmem:[%s2568_s1 + $0xa0] sm:$0xff] }
   0x6   :  { %222 = vmatprep.subr.bf16.mxu0 %v1601_v4  ;;  %1595 = vmatprep.subr.bf16.mxu1 %v1601_v4  ;;  %v1454_v23 = vcombine.high %v39_v19, %v39_v19  ;;  %v1453_v25 = vcombine.low %v39_v19, %v39_v19  ;;  %v1625_v30 = vld [vmem:[%s2568_s1 + $0x24] ss:$56 sps:$4 sm:$0xff]   ;;  %v1620_v33 = vld [vmem:[%s2568_s1 + $0x18] ss:$56 sps:$4 sm:$0xff]   ;;  %v1460_v36 = vcombine.high %v42_v32, %v42_v32  ;;  %v1635_v42 = vld [vmem:[%s2568_s1 + $0x34] ss:$56 sps:$4 sm:$0xff]  }
   0x7   :  { %v191_v28 = vsel %vm165_vm0, %v1455_v26, 0  ;;  %v41_v31 = vld [vmem:[%s2568_s1 + $0x98] sm:$0xff]  ;;  %v1459_v38 = vcombine.low %v42_v32, %v42_v32  ;;  %v1632_v41 = vld [vmem:[%s2568_s1 + $0x2c] ss:$56 sps:$4 sm:$0xff]   ;;  %v1630_v43 = vld [vmem:[%s2568_s1 + $0x28] ss:$56 sps:$4 sm:$0xff]  }
   0x8   :  { %v185_v27 = vsel %vm165_vm0, %v1453_v25, 0  ;;  %v1623_v34 = vld [vmem:[%s2568_s1 + $0x20] ss:$56 sps:$4 sm:$0xff]   ;;  %v1458_v35 = vcombine.high %v41_v31, %v41_v31  ;;  %v1457_v37 = vcombine.low %v41_v31, %v41_v31  ;;  %v1633_v44 = vld [vmem:[%s2568_s1 + $0x30] ss:$56 sps:$4 sm:$0xff]   ;;  %v2019_v47 = vsub.s32 0, %v2016_v46 }
   0x9   :  { %223 = vmatpush1.bf16.msra.mxu0 %v1603_v6  ;;  %1597 = vmatpush1.bf16.msra.mxu1 %v1603_v6  ;;  %v203_v40 = vsel %vm165_vm0, %v1459_v38, 0  ;;  %v2024_v48 = vld [vmem:[%s2570_s2] sm:$0xff]  ;;  %v2027_v49 = vsub.s32 1, %v2016_v46  ;;  %v2037_v52 = vsub.s32 2, %v2016_v46  ;;  %v2040_v53 = vsub.s32 4, %v2016_v46 }
   0xa   :  { %1464 = vmatprep.subr.msk.bf16.mxu1 %vm165_vm0, %v1450_v8  ;;  %1467 = vmatprep.subr.msk.bf16.mxu0 %vm165_vm0, %v1452_v10  ;;  %v197_v39 = vsel %vm165_vm0, %v1457_v37, 0  ;;  %v2032_v50 = vld [vmem:[%s2571_s3] sm:$0xff]  ;;  %v586_v51 = vrot.slane %v2024_v48, %v2019_v47  ;;  %v2047_v58 = vsub.s32 3, %v2016_v46  ;;  %v2050_v59 = vsub.s32 5, %v2016_v46 }
   0xb   :  { %v716_v54 = vrot.slane %v2032_v50, %v2019_v47  ;;  %v590_v55 = vrot.slane %v2024_v48, %v2027_v49  ;;  %v720_v62 = vrot.slane %v2032_v50, %v2027_v49  ;;  %v2060_v2 = vrot.slane %v2024_v48, %v2040_v53 }
   0xc   :  { %1462 = vmatmul.mubr.msk.bf16.vlgmr.msra.gmra.mxu0 %vm158_vm1, %v1909_v13  ;;  %1463 = vmatmul.mubr.msk.bf16.vlgmr.msra.gmra.mxu1 %vm158_vm1, %v1914_v14  ;;  %v2068_v9 = vrot.slane %v2032_v50, %v2037_v52  ;;  %v2072_v10 = vrot.slane %v2032_v50, %v2040_v53  ;;  %v2076_v11 = vrot.slane %v2024_v48, %v2047_v58 }
   0xd   :  { %274 = vmatpush1.bf16.msra.mxu1 %v173_v17  ;;  %327 = vmatpush1.bf16.msra.mxu0 %v179_v18  ;;  %v2080_v12 = vrot.slane %v2024_v48, %v2050_v59 }
   0xe   :  { %275 = vmatprep.subr.bf16.mxu1 %v1612_v15  ;;  %328 = vmatprep.subr.bf16.mxu0 %v1615_v16 }
   0xf   :  { %293 = vmatprep.mubr.bf16.mxu1 %v1860_v1  ;;  %346 = vmatprep.mubr.bf16.mxu0 %v1860_v1 }
  0x11   :  { %276 = vmatpush1.bf16.msra.mxu1 %v1610_v21  ;;  %329 = vmatpush1.bf16.msra.mxu0 %v1613_v22  ;;  %v2090_v21 = vrot.slane %v2032_v50, %v2047_v58  ;;  %v2094_v22 = vrot.slane %v2032_v50, %v2050_v59 }
  0x12   :  { %1470 = vmatprep.subr.msk.bf16.mxu1 %vm165_vm0, %v1454_v23  ;;  %1473 = vmatprep.subr.msk.bf16.mxu0 %vm165_vm0, %v1456_v24 }
  0x14   :  { %1465 = vmatmul.mubr.msk.bf16.vlgmr.msra.gmra.mxu1 %vm158_vm1, %v1909_v13  ;;  %1468 = vmatmul.mubr.msk.bf16.vlgmr.msra.gmra.mxu0 %vm158_vm1, %v1909_v13 }
  0x15   :  { %380 = vmatpush1.bf16.msra.mxu1 %v185_v27  ;;  %433 = vmatpush1.bf16.msra.mxu0 %v191_v28 }
  0x16   :  { %303 = vmatprep.mubr.bf16.mxu1 %v1860_v1  ;;  %356 = vmatprep.mubr.bf16.mxu0 %v1860_v1 }
  0x17   :  { %381 = vmatprep.subr.bf16.mxu1 %v1622_v29  ;;  %434 = vmatprep.subr.bf16.mxu0 %v1625_v30 }
  0x19   :  { %382 = vmatpush1.bf16.msra.mxu1 %v1620_v33  ;;  %435 = vmatpush1.bf16.msra.mxu0 %v1623_v34 }
  0x1a   :  { %1476 = vmatprep.subr.msk.bf16.mxu1 %vm165_vm0, %v1458_v35  ;;  %1479 = vmatprep.subr.msk.bf16.mxu0 %vm165_vm0, %v1460_v36 }
  0x1c   :  { %1466 = vmatmul.mubr.msk.bf16.gmra.mxu1 %vm158_vm1, %v1914_v14  ;;  %1469 = vmatmul.mubr.msk.bf16.gmra.mxu0 %vm158_vm1, %v1914_v14 }
  0x1d   :  { %399 = vmatprep.mubr.bf16.mxu1 %v1860_v1  ;;  %452 = vmatprep.mubr.bf16.mxu0 %v1860_v1 }
  0x24   :  { %1471 = vmatmul.mubr.msk.bf16.vlgmr.msra.gmra.mxu1 %vm158_vm1, %v1909_v13  ;;  %1474 = vmatmul.mubr.msk.bf16.vlgmr.msra.gmra.mxu0 %vm158_vm1, %v1909_v13 }
  0x25   :  { %486 = vmatpush1.bf16.msra.mxu1 %v197_v39  ;;  %539 = vmatpush1.bf16.msra.mxu0 %v203_v40 }
  0x26   :  { %409 = vmatprep.mubr.bf16.mxu1 %v1860_v1  ;;  %462 = vmatprep.mubr.bf16.mxu0 %v1860_v1 }
  0x27   :  { %487 = vmatprep.subr.bf16.mxu1 %v1632_v41  ;;  %540 = vmatprep.subr.bf16.mxu0 %v1635_v42 }
  0x29   :  { %488 = vmatpush1.bf16.msra.mxu1 %v1630_v43  ;;  %541 = vmatpush1.bf16.msra.mxu0 %v1633_v44 }
  0x2c   :  { %1472 = vmatmul.mubr.msk.bf16.gmra.mxu1 %vm158_vm1, %v1914_v14  ;;  %1475 = vmatmul.mubr.msk.bf16.gmra.mxu0 %vm158_vm1, %v1914_v14 }
  0x2d   :  { %505 = vmatprep.mubr.bf16.mxu1 %v1860_v1  ;;  %558 = vmatprep.mubr.bf16.mxu0 %v1860_v1 }
  0x34   :  { %1477 = vmatmul.mubr.msk.bf16.vlgmr.msra.gmra.mxu1 %vm158_vm1, %v1909_v13  ;;  %1480 = vmatmul.mubr.msk.bf16.vlgmr.msra.gmra.mxu0 %vm158_vm1, %v1909_v13 }
  0x35   :  { %515 = vmatprep.mubr.bf16.mxu1 %v1860_v1  ;;  %568 = vmatprep.mubr.bf16.mxu0 %v1860_v1  ;;  %v2056_v1 = vrot.slane %v2024_v48, %v2037_v52 }
  0x3c   :  { %1478 = vmatmul.mubr.msk.bf16.gmra.mxu1 %vm158_vm1, %v1914_v14  ;;  %1481 = vmatmul.mubr.msk.bf16.gmra.mxu0 %vm158_vm1, %v1914_v14 }
  0xcc   :  { %v242_v56 = vpop.f32.mrf.mxu0  ;;  %v252_v57 = vpop.f32.mrf.mxu1 }
  0xcd   :  { %v653_v60 = vmul.f32 %v586_v51, %v242_v56  ;;  %v681_v61 = vmul.f32 %v586_v51, %v252_v57 }
  0xce   :  { %v244_v63 = vpop.f32.mrf.mxu0  ;;  %v254_v0 = vpop.f32.mrf.mxu1 }
  0xcf   :  { %v2062_v3 = vadd.f32 %v716_v54, %v653_v60  ;;  %v2064_v4 = vadd.f32 %v716_v54, %v681_v61  ;;  %v654_v5 = vmul.f32 %v590_v55, %v244_v63  ;;  %v682_v6 = vmul.f32 %v590_v55, %v254_v0 }
  0xd0   :  { %v246_v7 = vpop.f32.mrf.mxu0  ;;  %v256_v8 = vpop.f32.mrf.mxu1 }
  0xd1   :  { %v1482_v13 = vmul.f32 -1.442695, %v2062_v3  ;;  %v1510_v14 = vmul.f32 -1.442695, %v2064_v4  ;;  %v2084_v15 = vadd.f32 %v720_v62, %v654_v5  ;;  %v2086_v16 = vadd.f32 %v720_v62, %v682_v6 }
  0xd2   :  { %v667_v17 = vmul.f32 %v586_v51, %v246_v7  ;;  %v695_v18 = vmul.f32 %v586_v51, %v256_v8  ;;  %v248_v19 = vpop.f32.mrf.mxu0  ;;  %v258_v20 = vpop.f32.mrf.mxu1 }
  0xd3   :  { %1636 = vpow2.f32 %v1482_v13  ;;  %v1483_v23 = vmul.f32 -1.442695, %v2084_v15  ;;  %v1511_v24 = vmul.f32 -1.442695, %v2086_v16  ;;  %v668_v25 = vmul.f32 %v590_v55, %v248_v19 }
  0xd4   :  { %1638 = vpow2.f32 %v1510_v14  ;;  %v2098_v26 = vadd.f32 %v716_v54, %v667_v17  ;;  %v2100_v27 = vadd.f32 %v716_v54, %v695_v18  ;;  %v696_v28 = vmul.f32 %v590_v55, %v258_v20  ;;  %v295_v29 = vpop.f32.mrf.mxu1  ;;  %v348_v30 = vpop.f32.mrf.mxu0 }
  0xd5   :  { %1640 = vpow2.f32 %v1483_v23  ;;  %v2102_v31 = vadd.f32 %v720_v62, %v668_v25  ;;  %v655_v32 = vmul.f32 %v2056_v1, %v295_v29  ;;  %v657_v33 = vmul.f32 %v2060_v2, %v348_v30  ;;  %v2153_v30 = vld [vmem:[%s2570_s2 + $0x8] sm:$0x3f] }
  0xd6   :  { %1642 = vpow2.f32 %v1511_v24  ;;  %v1496_v34 = vmul.f32 -1.442695, %v2098_v26  ;;  %v1524_v35 = vmul.f32 -1.442695, %v2100_v27  ;;  %v2108_v36 = vadd.f32 %v720_v62, %v696_v28  ;;  %v297_v37 = vpop.f32.mrf.mxu1  ;;  %v350_v38 = vpop.f32.mrf.mxu0 }
  0xd7   :  { %v1497_v39 = vmul.f32 -1.442695, %v2102_v31  ;;  %v2112_v40 = vadd.f32 %v2068_v9, %v655_v32  ;;  %v2115_v41 = vadd.f32 %v2072_v10, %v657_v33  ;;  %v656_v42 = vmul.f32 %v2076_v11, %v297_v37 }
  0xd8   :  { %1644 = vpow2.f32 %v1496_v34  ;;  %v1525_v43 = vmul.f32 -1.442695, %v2108_v36  ;;  %v658_v44 = vmul.f32 %v2080_v12, %v350_v38  ;;  %v299_v45 = vpop.f32.mrf.mxu1  ;;  %v352_v51 = vpop.f32.mrf.mxu0  ;;  %v609_v19 = vsub.s32 6, %v2016_v46 }
  0xd9   :  { %1646 = vpow2.f32 %v1524_v35  ;;  %v1484_v54 = vmul.f32 -1.442695, %v2112_v40  ;;  %v1486_v55 = vmul.f32 -1.442695, %v2115_v41  ;;  %v2123_v56 = vadd.f32 %v2090_v21, %v656_v42 }
  0xda   :  { %1648 = vpow2.f32 %v1497_v39  ;;  %v2126_v57 = vadd.f32 %v2094_v22, %v658_v44  ;;  %v669_v60 = vmul.f32 %v2056_v1, %v299_v45  ;;  %v671_v61 = vmul.f32 %v2060_v2, %v352_v51  ;;  %v301_v62 = vpop.f32.mrf.mxu1  ;;  %v354_v63 = vpop.f32.mrf.mxu0  ;;  %v2162_v39 = vld [vmem:[%s2571_s3 + $0x8] sm:$0x3f] }
  0xdb   :  { %1650 = vpow2.f32 %v1525_v43  ;;  %v1485_v0 = vmul.f32 -1.442695, %v2123_v56  ;;  %v670_v5 = vmul.f32 %v2076_v11, %v301_v62  ;;  %v672_v6 = vmul.f32 %v2080_v12, %v354_v63 }
  0xdc   :  { %1652 = vpow2.f32 %v1484_v54  ;;  %v1487_v7 = vmul.f32 -1.442695, %v2126_v57  ;;  %v2135_v8 = vadd.f32 %v2068_v9, %v669_v60  ;;  %v2138_v13 = vadd.f32 %v2072_v10, %v671_v61  ;;  %v305_v14 = vpop.f32.mrf.mxu1  ;;  %v358_v17 = vpop.f32.mrf.mxu0 }
  0xdd   :  { %1654 = vpow2.f32 %v1486_v55  ;;  %v2141_v18 = vadd.f32 %v2090_v21, %v670_v5  ;;  %v2148_v29 = vadd.f32 %v2094_v22, %v672_v6  ;;  %v613_v34 = vsub.s32 7, %v2016_v46 }
  0xde   :  { %1656 = vpow2.f32 %v1485_v0  ;;  %v1498_v20 = vmul.f32 -1.442695, %v2135_v8  ;;  %v1500_v23 = vmul.f32 -1.442695, %v2138_v13  ;;  %v307_v24 = vpop.f32.mrf.mxu1  ;;  %v360_v25 = vpop.f32.mrf.mxu0  ;;  %v2157_v38 = vrot.slane %v2024_v48, %v609_v19 }
  0xdf   :  { %1658 = vpow2.f32 %v1487_v7  ;;  %v1499_v28 = vmul.f32 -1.442695, %v2141_v18  ;;  %v683_v44 = vmul.f32 %v2056_v1, %v305_v14  ;;  %v2167_v46 = vrot.slane %v2153_v30, %v2019_v47 }
  0xe0   :  { %v1637_v32 = vpop.eup %1636  ;;  %1660 = vpow2.f32 %v1498_v20  ;;  %v309_v33 = vpop.f32.mrf.mxu1  ;;  %v1501_v55 = vmul.f32 -1.442695, %v2148_v29  ;;  %v2171_v61 = vrot.slane %v2032_v50, %v609_v19  ;;  %v2175_v63 = vrot.slane %v2162_v39, %v2019_v47 }
  0xe1   :  { %v1639_v35 = vpop.eup %1638  ;;  %v1007_v37 = vadd.f32 1.0, %v1637_v32  ;;  %1662 = vpow2.f32 %v1500_v23  ;;  %v362_v45 = vpop.f32.mrf.mxu0  ;;  %v2178_v0 = vrot.slane %v2024_v48, %v613_v34  ;;  %v685_v6 = vmul.f32 %v2060_v2, %v358_v17 }
  0xe2   :  { %v1641_v42 = vpop.eup %1640  ;;  %v1035_v43 = vadd.f32 1.0, %v1639_v35  ;;  %1664 = vpow2.f32 %v1499_v28  ;;  %v311_v60 = vpop.f32.mrf.mxu1  ;;  %v2182_v7 = vrot.slane %v2032_v50, %v613_v34  ;;  %v2186_v14 = vrot.slane %v2153_v30, %v2027_v49 }
  0xe3   :  { %v1643_v51 = vpop.eup %1642  ;;  %1666 = vrcp.f32 %v1007_v37  ;;  %v1008_v54 = vadd.f32 1.0, %v1641_v42  ;;  %v2189_v47 = vadd.f32 %v2068_v9, %v683_v44  ;;  %v364_v23 = vpop.f32.mrf.mxu0  ;;  %v2193_v48 = vrot.slane %v2162_v39, %v2027_v49 }
  0xe4   :  { %1668 = vrcp.f32 %v1035_v43  ;;  %v1036_v62 = vadd.f32 1.0, %v1643_v51  ;;  %v684_v50 = vmul.f32 %v2076_v11, %v307_v24  ;;  %v686_v32 = vmul.f32 %v2080_v12, %v360_v25  ;;  %v401_v34 = vpop.f32.mrf.mxu1 }
  0xe5   :  { %v1645_v5 = vpop.eup %1644  ;;  %1670 = vrcp.f32 %v1008_v54  ;;  %v697_v42 = vmul.f32 %v2056_v1, %v309_v33  ;;  %v699_v43 = vmul.f32 %v2060_v2, %v362_v45  ;;  %v2200_v49 = vadd.f32 %v2072_v10, %v685_v6 }
  0xe6   :  { %v1647_v19 = vpop.eup %1646  ;;  %1672 = vrcp.f32 %v1036_v62  ;;  %v1021_v20 = vadd.f32 1.0, %v1645_v5  ;;  %v698_v54 = vmul.f32 %v2076_v11, %v311_v60  ;;  %v1512_v25 = vmul.f32 -1.442695, %v2189_v47  ;;  %v454_v5 = vpop.f32.mrf.mxu0 }
  0xe7   :  { %v1649_v28 = vpop.eup %1648  ;;  %v1049_v17 = vadd.f32 1.0, %v1647_v19  ;;  %1674 = vpow2.f32 %v1501_v55  ;;  %v700_v62 = vmul.f32 %v2080_v12, %v364_v23  ;;  %v2206_v2 = vadd.f32 %v2090_v21, %v684_v50  ;;  %v403_v45 = vpop.f32.mrf.mxu1 }
  0xe8   :  { %v1651_v35 = vpop.eup %1650  ;;  %1676 = vrcp.f32 %v1021_v20  ;;  %v1022_v37 = vadd.f32 1.0, %v1649_v28  ;;  %v2209_v33 = vadd.f32 %v2094_v22, %v686_v32  ;;  %v2212_v60 = vadd.f32 %v2068_v9, %v697_v42 }
  0xe9   :  { %v1653_v44 = vpop.eup %1652  ;;  %1678 = vrcp.f32 %v1049_v17  ;;  %v1050_v51 = vadd.f32 1.0, %v1651_v35  ;;  %v2215_v20 = vadd.f32 %v2072_v10, %v699_v43  ;;  %v2218_v28 = vadd.f32 %v2090_v21, %v698_v54  ;;  %v405_v21 = vpop.f32.mrf.mxu1 }
  0xea   :  { %v1655_v55 = vpop.eup %1654  ;;  %1680 = vrcp.f32 %v1022_v37  ;;  %v1009_v24 = vadd.f32 1.0, %v1653_v44  ;;  %v659_v17 = vmul.f32 %v2157_v38, %v401_v34  ;;  %v2222_v35 = vadd.f32 %v2094_v22, %v700_v62  ;;  %v456_v37 = vpop.f32.mrf.mxu0 }
  0xeb   :  { %v1657_v19 = vpop.eup %1656  ;;  %1682 = vrcp.f32 %v1050_v51  ;;  %v1011_v1 = vadd.f32 1.0, %v1655_v55  ;;  %2576 = vst [vmem:[#allocation2_spill] sm:$0xff] %v2215_v20  ;;  %2577 = vst [vmem:[#allocation3_spill] sm:$0xff] %v2218_v28  ;;  %v661_v9 = vmul.f32 %v2167_v46, %v454_v5  ;;  %v1514_v43 = vmul.f32 -1.442695, %v2200_v49 }
  0xec   :  { %v1659_v6 = vpop.eup %1658  ;;  %1684 = vrcp.f32 %v1009_v24  ;;  %v1010_v11 = vadd.f32 1.0, %v1657_v19  ;;  %2578 = vst [vmem:[#allocation4_spill] sm:$0xff] %v2222_v35  ;;  %v1513_v44 = vmul.f32 -1.442695, %v2206_v2  ;;  %v1515_v54 = vmul.f32 -1.442695, %v2209_v33 }
  0xed   :  { %v1661_v12 = vpop.eup %1660  ;;  %1686 = vrcp.f32 %v1011_v1  ;;  %v1012_v23 = vadd.f32 1.0, %v1659_v6  ;;  %v1526_v55 = vmul.f32 -1.442695, %v2212_v60  ;;  %v1528_v24 = vmul.f32 -1.442695, %v2215_v20 }
  0xee   :  { %v1663_v50 = vpop.eup %1662  ;;  %1688 = vrcp.f32 %v1010_v11  ;;  %v1023_v32 = vadd.f32 1.0, %v1661_v12  ;;  %v1527_v62 = vmul.f32 -1.442695, %v2218_v28  ;;  %v2232_v5 = vadd.f32 %v2171_v61, %v659_v17  ;;  %v458_v12 = vpop.f32.mrf.mxu0 }
  0xef   :  { %v1665_v42 = vpop.eup %1664  ;;  %1690 = vrcp.f32 %v1012_v23  ;;  %v1025_v10 = vadd.f32 1.0, %v1663_v50  ;;  %v1529_v1 = vmul.f32 -1.442695, %v2222_v35  ;;  %v2236_v6 = vadd.f32 %v2175_v63, %v661_v9  ;;  %v407_v17 = vpop.f32.mrf.mxu1 }
  0xf0   :  { %v1667_v51 = vpop.eup %1666  ;;  %1692 = vrcp.f32 %v1023_v32  ;;  %v1024_v34 = vadd.f32 1.0, %v1665_v42  ;;  %v660_v11 = vmul.f32 %v2178_v0, %v403_v45  ;;  %v662_v42 = vmul.f32 %v2186_v14, %v456_v37 }
  0xf1   :  { %v1669_v22 = vpop.eup %1668  ;;  %1694 = vrcp.f32 %v1025_v10  ;;  %v1175_v50 = vmul.f32 %v1667_v51, %v2062_v3  ;;  %v673_v9 = vmul.f32 %v2157_v38, %v405_v21  ;;  %v675_v3 = vmul.f32 %v2167_v46, %v458_v12 }
  0xf2   :  { %v1671_v19 = vpop.eup %1670  ;;  %1696 = vrcp.f32 %v1024_v34  ;;  %v1203_v34 = vmul.f32 %v1669_v22, %v2064_v4  ;;  %v674_v37 = vmul.f32 %v2178_v0, %v407_v17  ;;  %v460_v4 = vpop.f32.mrf.mxu0 }
  0xf3   :  { %v1673_v23 = vpop.eup %1672  ;;  %v1176_v32 = vmul.f32 %v1671_v19, %v2084_v15  ;;  %1698 = vpow2.f32 %v1512_v25  ;;  %v2247_v25 = vadd.f32 %v2182_v7, %v660_v11 }
  0xf4   :  { %v1675_v10 = vpop.eup %1674  ;;  %v1204_v35 = vmul.f32 %v1673_v23, %v2086_v16  ;;  %1700 = vpow2.f32 %v1514_v43  ;;  %v1488_v16 = vmul.f32 -1.442695, %v2232_v5  ;;  %v1490_v43 = vmul.f32 -1.442695, %v2236_v6 }
  0xf5   :  { %v1677_v20 = vpop.eup %1676  ;;  %v1566_v45 = vpack.c.bf16 %v1176_v32, %v1175_v50  ;;  %v1026_v28 = vadd.f32 1.0, %v1675_v10  ;;  %1702 = vpow2.f32 %v1513_v44  ;;  %v2256_v44 = vadd.f32 %v2193_v48, %v662_v42 }
  0xf6   :  { %v1679_v51 = vpop.eup %1678  ;;  %v1580_v15 = vpack.c.bf16 %v1204_v35, %v1203_v34  ;;  %1704 = vpow2.f32 %v1515_v54  ;;  %v411_v35 = vpop.f32.mrf.mxu1  ;;  %v1189_v54 = vmul.f32 %v1677_v20, %v2098_v26  ;;  %v2269_v50 = vadd.f32 %v2175_v63, %v675_v3 }
  0xf7   :  { %v1681_v22 = vpop.eup %1680  ;;  %1399 = vst [vmem:[%s2572_s4] sm:$0xff] %v1566_v45  ;;  %1706 = vrcp.f32 %v1026_v28  ;;  %v2264_v28 = vadd.f32 %v2171_v61, %v673_v9  ;;  %v1217_v12 = vmul.f32 %v1679_v51, %v2100_v27  ;;  %v1489_v26 = vmul.f32 -1.442695, %v2247_v25  ;;  %v2275_v20 = vpop.f32.mrf.mxu0 }
  0xf8   :  { %v1683_v21 = vpop.eup %1682  ;;  %1413 = vst [vmem:[%s2572_s4 + $0x70] sm:$0xff] %v1580_v15  ;;  %v1190_v19 = vmul.f32 %v1681_v22, %v2102_v31  ;;  %1708 = vpow2.f32 %v1526_v55  ;;  %v2273_v31 = vadd.f32 %v2182_v7, %v674_v37  ;;  %v1491_v27 = vmul.f32 -1.442695, %v2256_v44 }
  0xf9   :  { %v1685_v11 = vpop.eup %1684  ;;  %v1218_v23 = vmul.f32 %v1683_v21, %v2108_v36  ;;  %1710 = vpow2.f32 %v1528_v24  ;;  %v676_v36 = vmul.f32 %v2186_v14, %v460_v4  ;;  %v2279_v24 = vpop.f32.mrf.mxu1  ;;  %v1502_v9 = vmul.f32 -1.442695, %v2264_v28 }
  0xfa   :  { %v1687_v32 = vpop.eup %1686  ;;  %v1573_v42 = vpack.c.bf16 %v1190_v19, %v1189_v54  ;;  %1712 = vpow2.f32 %v1527_v62  ;;  %v1177_v62 = vmul.f32 %v1685_v11, %v2112_v40  ;;  %v1504_v51 = vmul.f32 -1.442695, %v2269_v50 }
  0xfb   :  { %v1689_v55 = vpop.eup %1688  ;;  %v1587_v17 = vpack.c.bf16 %v1218_v23, %v1217_v12  ;;  %1714 = vpow2.f32 %v1529_v1  ;;  %v1179_v1 = vmul.f32 %v1687_v32, %v2115_v41  ;;  %v1503_v40 = vmul.f32 -1.442695, %v2273_v31 }
  0xfc   :  { %v1691_v10 = vpop.eup %1690  ;;  %1406 = vst [vmem:[%s2572_s4 + $0x38] sm:$0xff] %v1573_v42  ;;  %v1178_v34 = vmul.f32 %v1689_v55, %v2123_v56  ;;  %1716 = vpow2.f32 %v1488_v16  ;;  %v466_v56 = vpop.f32.mrf.mxu0  ;;  %v2296_v4 = vrot.slane %v2153_v30, %v2037_v52  ;;  %v2299_v41 = vadd.f32 %v2193_v48, %v676_v36 }
  0xfd   :  { %v1693_v45 = vpop.eup %1692  ;;  %1420 = vst [vmem:[%s2572_s4 + $0xa8] sm:$0xff] %v1587_v17  ;;  %v1180_v3 = vmul.f32 %v1691_v10, %v2126_v57  ;;  %1718 = vpow2.f32 %v1490_v43  ;;  %v415_v57 = vpop.f32.mrf.mxu1  ;;  %v2303_v43 = vrot.slane %v2153_v30, %v2040_v53  ;;  %v2312_v11 = vrot.slane %v2162_v39, %v2037_v52 }
  0xfe   :  { %v1695_v15 = vpop.eup %1694  ;;  %v1567_v37 = vpack.c.bf16 %v1178_v34, %v1177_v62  ;;  %1720 = vpow2.f32 %v1489_v26  ;;  %v1191_v54 = vmul.f32 %v1693_v45, %v2135_v8  ;;  %v687_v32 = vmul.f32 %v2157_v38, %v411_v35  ;;  %v468_v55 = vpop.f32.mrf.mxu0 }
  0xff   :  { %v1697_v22 = vpop.eup %1696  ;;  %v1568_v16 = vpack.c.bf16 %v1180_v3, %v1179_v1  ;;  %1722 = vpow2.f32 %v1491_v27  ;;  %v2320_v42 = vrot.slane %v2162_v39, %v2040_v53  ;;  %v2324_v52 = vrot.slane %v2153_v30, %v2047_v58  ;;  %v417_v10 = vpop.f32.mrf.mxu1 }
 0x100   :  { %v1699_v21 = vpop.eup %1698  ;;  %1400 = vst [vmem:[%s2572_s4 + $0x8] sm:$0xff] %v1567_v37  ;;  %v1192_v19 = vmul.f32 %v1697_v22, %v2141_v18  ;;  %1724 = vpow2.f32 %v1502_v9  ;;  %v1505_v36 = vmul.f32 -1.442695, %v2299_v41  ;;  %v2329_v35 = vrot.slane %v2153_v30, %v2050_v59 }
 0x101   :  { %v1701_v12 = vpop.eup %1700  ;;  %1401 = vst [vmem:[%s2572_s4 + $0x10] sm:$0xff] %v1568_v16  ;;  %v1037_v23 = vadd.f32 1.0, %v1699_v21  ;;  %1726 = vpow2.f32 %v1504_v51  ;;  %v2336_v34 = vrot.slane %v2162_v39, %v2047_v58  ;;  %v2340_v9 = vrot.slane %v2162_v39, %v2050_v59  ;;  %v470_v59 = vpop.f32.mrf.mxu0 }
 0x102   :  { %v1703_v8 = vpop.eup %1702  ;;  %v1574_v18 = vpack.c.bf16 %v1192_v19, %v1191_v54  ;;  %v1039_v26 = vadd.f32 1.0, %v1701_v12  ;;  %1728 = vpow2.f32 %v1503_v40  ;;  %v1193_v1 = vmul.f32 %v1695_v15, %v2138_v13 }
 0x103   :  { %v1705_v17 = vpop.eup %1704  ;;  %1730 = vrcp.f32 %v1037_v23  ;;  %v1038_v27 = vadd.f32 1.0, %v1703_v8  ;;  %v2345_v3 = vadd.f32 %v2171_v61, %v687_v32  ;;  %v689_v58 = vmul.f32 %v2167_v46, %v2275_v20 }
 0x104   :  { %v1707_v53 = vpop.eup %1706  ;;  %1407 = vst [vmem:[%s2572_s4 + $0x40] sm:$0xff] %v1574_v18  ;;  %1732 = vrcp.f32 %v1039_v26  ;;  %v1040_v62 = vadd.f32 1.0, %v1705_v17  ;;  %v688_v40 = vmul.f32 %v2178_v0, %v2279_v24  ;;  %v690_v13 = vmul.f32 %v2186_v14, %v466_v56 }
 0x105   :  { %v1709_v45 = vpop.eup %1708  ;;  %v1194_v30 = vmul.f32 %v1707_v53, %v2148_v29  ;;  %1734 = vrcp.f32 %v1038_v27  ;;  %v507_v29 = vpop.f32.mrf.mxu1  ;;  %v701_v54 = vmul.f32 %v2157_v38, %v415_v57  ;;  %v703_v19 = vmul.f32 %v2167_v46, %v468_v55 }
 0x106   :  { %v1711_v51 = vpop.eup %1710  ;;  %1736 = vrcp.f32 %v1040_v62  ;;  %v1051_v37 = vadd.f32 1.0, %v1709_v45  ;;  %v702_v24 = vmul.f32 %v2178_v0, %v417_v10  ;;  %v704_v23 = vmul.f32 %v2186_v14, %v470_v59  ;;  %v560_v46 = vpop.f32.mrf.mxu0 }
 0x107   :  { %v1713_v39 = vpop.eup %1712  ;;  %v1575_v22 = vpack.c.bf16 %v1194_v30, %v1193_v1  ;;  %v1053_v16 = vadd.f32 1.0, %v1711_v51  ;;  %1738 = vpow2.f32 %v1505_v36  ;;  %v1516_v8 = vmul.f32 -1.442695, %v2345_v3  ;;  %v509_v0 = vpop.f32.mrf.mxu1 }
 0x108   :  { %v1715_v15 = vpop.eup %1714  ;;  %1740 = vrcp.f32 %v1051_v37  ;;  %v1052_v21 = vadd.f32 1.0, %v1713_v39  ;;  %v2361_v38 = vadd.f32 %v2175_v63, %v689_v58  ;;  %v2364_v26 = vadd.f32 %v2182_v7, %v688_v40  ;;  %v562_v37 = vpop.f32.mrf.mxu0 }
 0x109   :  { %v1717_v12 = vpop.eup %1716  ;;  %1408 = vst [vmem:[%s2572_s4 + $0x48] sm:$0xff] %v1575_v22  ;;  %1742 = vrcp.f32 %v1053_v16  ;;  %v1054_v20 = vadd.f32 1.0, %v1715_v15  ;;  %v2367_v55 = vadd.f32 %v2193_v48, %v690_v13  ;;  %v2370_v27 = vadd.f32 %v2171_v61, %v701_v54 }
 0x10a   :  { %v1719_v56 = vpop.eup %1718  ;;  %1744 = vrcp.f32 %v1052_v21  ;;  %v1013_v32 = vadd.f32 1.0, %v1717_v12  ;;  %v2373_v36 = vadd.f32 %v2175_v63, %v703_v19  ;;  %v2376_v62 = vadd.f32 %v2182_v7, %v702_v24  ;;  %v511_v7 = vpop.f32.mrf.mxu1 }
 0x10b   :  { %v1721_v57 = vpop.eup %1720  ;;  %1746 = vrcp.f32 %v1054_v20  ;;  %v1015_v18 = vadd.f32 1.0, %v1719_v56  ;;  %v2379_v45 = vadd.f32 %v2193_v48, %v704_v23  ;;  %v663_v51 = vmul.f32 %v2296_v4, %v507_v29  ;;  %v564_v24 = vpop.f32.mrf.mxu0 }
 0x10c   :  { %v1723_v14 = vpop.eup %1722  ;;  %1748 = vrcp.f32 %v1013_v32  ;;  %v1014_v17 = vadd.f32 1.0, %v1721_v57  ;;  %v665_v61 = vmul.f32 %v2303_v43, %v560_v46  ;;  %v1518_v40 = vmul.f32 -1.442695, %v2361_v38  ;;  %v513_v57 = vpop.f32.mrf.mxu1 }
 0x10d   :  { %v1725_v10 = vpop.eup %1724  ;;  %1750 = vrcp.f32 %v1015_v18  ;;  %v1016_v53 = vadd.f32 1.0, %v1723_v14  ;;  %v1517_v59 = vmul.f32 -1.442695, %v2364_v26  ;;  %v1519_v22 = vmul.f32 -1.442695, %v2367_v55 }
 0x10e   :  { %v1727_v1 = vpop.eup %1726  ;;  %1752 = vrcp.f32 %v1014_v17  ;;  %v1027_v30 = vadd.f32 1.0, %v1725_v10  ;;  %v1530_v16 = vmul.f32 -1.442695, %v2370_v27  ;;  %v1532_v29 = vmul.f32 -1.442695, %v2373_v36 }
 0x10f   :  { %v1729_v58 = vpop.eup %1728  ;;  %1754 = vrcp.f32 %v1016_v53  ;;  %v1029_v63 = vadd.f32 1.0, %v1727_v1  ;;  %v1531_v15 = vmul.f32 -1.442695, %v2376_v62  ;;  %v1533_v21 = vmul.f32 -1.442695, %v2379_v45 }
 0x110   :  { %v1731_v39 = vpop.eup %1730  ;;  %1756 = vrcp.f32 %v1027_v30  ;;  %v1028_v48 = vadd.f32 1.0, %v1729_v58  ;;  %v2391_v19 = vadd.f32 %v2312_v11, %v663_v51  ;;  %v2394_v12 = vadd.f32 %v2320_v42, %v665_v61 }
 0x111   :  { %v1733_v13 = vpop.eup %1732  ;;  %1758 = vrcp.f32 %v1029_v63  ;;  %v664_v20 = vmul.f32 %v2324_v52, %v509_v0  ;;  %v1205_v56 = vmul.f32 %v1731_v39, %v2189_v47  ;;  %v666_v46 = vmul.f32 %v2329_v35, %v562_v37  ;;  %v566_v39 = vpop.f32.mrf.mxu0 }
 0x112   :  { %v1735_v54 = vpop.eup %1734  ;;  %1760 = vrcp.f32 %v1028_v48  ;;  %v1207_v14 = vmul.f32 %v1733_v13, %v2200_v49  ;;  %v677_v10 = vmul.f32 %v2296_v4, %v511_v7  ;;  %v679_v47 = vmul.f32 %v2303_v43, %v564_v24 }
 0x113   :  { %v1737_v23 = vpop.eup %1736  ;;  %v1206_v32 = vmul.f32 %v1735_v54, %v2206_v2  ;;  %1762 = vpow2.f32 %v1516_v8  ;;  %v2405_v8 = vadd.f32 %v2336_v34, %v664_v20  ;;  %v678_v51 = vmul.f32 %v2324_v52, %v513_v57  ;;  %v2581_v54 = vld [vmem:[#allocation4_spill] sm:$0xff] }
 0x114   :  { %v1739_v18 = vpop.eup %1738  ;;  %v1208_v17 = vmul.f32 %v1737_v23, %v2209_v33  ;;  %1764 = vpow2.f32 %v1518_v40  ;;  %v1492_v33 = vmul.f32 -1.442695, %v2391_v19  ;;  %v1494_v61 = vmul.f32 -1.442695, %v2394_v12  ;;  %v2579_v40 = vld [vmem:[#allocation3_spill] sm:$0xff] }
 0x115   :  { %v1741_v53 = vpop.eup %1740  ;;  %v1581_v0 = vpack.c.bf16 %v1206_v32, %v1205_v56  ;;  %v1030_v1 = vadd.f32 1.0, %v1739_v18  ;;  %1766 = vpow2.f32 %v1517_v59  ;;  %v2414_v37 = vadd.f32 %v2340_v9, %v666_v46 }
 0x116   :  { %v1743_v30 = vpop.eup %1742  ;;  %v1582_v2 = vpack.c.bf16 %v1208_v17, %v1207_v14  ;;  %1768 = vpow2.f32 %v1519_v22  ;;  %v1219_v63 = vmul.f32 %v1741_v53, %v2212_v60  ;;  %v2422_v7 = vadd.f32 %v2312_v11, %v677_v10  ;;  %v2580_v22 = vld [vmem:[#allocation2_spill] sm:$0xff] }
 0x117   :  { %v1745_v49 = vpop.eup %1744  ;;  %1414 = vst [vmem:[%s2572_s4 + $0x78] sm:$0xff] %v1581_v0  ;;  %1770 = vrcp.f32 %v1030_v1  ;;  %v1221_v13 = vmul.f32 %v1743_v30, %v2580_v22  ;;  %v2427_v24 = vadd.f32 %v2320_v42, %v679_v47  ;;  %v1493_v60 = vmul.f32 -1.442695, %v2405_v8 }
 0x118   :  { %v1747_v58 = vpop.eup %1746  ;;  %1415 = vst [vmem:[%s2572_s4 + $0x80] sm:$0xff] %v1582_v2  ;;  %v1220_v59 = vmul.f32 %v1745_v49, %v2579_v40  ;;  %1772 = vpow2.f32 %v1530_v16  ;;  %v2431_v16 = vadd.f32 %v2336_v34, %v678_v51  ;;  %v1495_v57 = vmul.f32 -1.442695, %v2414_v37  ;;  %v517_v51 = vpop.f32.mrf.mxu1 }
 0x119   :  { %v1749_v48 = vpop.eup %1748  ;;  %v1222_v20 = vmul.f32 %v1747_v58, %v2581_v54  ;;  %1774 = vpow2.f32 %v1532_v29  ;;  %v680_v18 = vmul.f32 %v2329_v35, %v566_v39  ;;  %v1506_v17 = vmul.f32 -1.442695, %v2422_v7 }
 0x11a   :  { %v1751_v23 = vpop.eup %1750  ;;  %v1588_v56 = vpack.c.bf16 %v1220_v59, %v1219_v63  ;;  %1776 = vpow2.f32 %v1531_v15  ;;  %v1181_v29 = vmul.f32 %v1749_v48, %v2232_v5  ;;  %v1508_v0 = vmul.f32 -1.442695, %v2427_v24  ;;  %v519_v22 = vpop.f32.mrf.mxu1 }
 0x11b   :  { %v1753_v32 = vpop.eup %1752  ;;  %v1589_v46 = vpack.c.bf16 %v1222_v20, %v1221_v13  ;;  %1778 = vpow2.f32 %v1533_v21  ;;  %v1183_v21 = vmul.f32 %v1751_v23, %v2236_v6  ;;  %v1507_v5 = vmul.f32 -1.442695, %v2431_v16 }
 0x11c   :  { %v1755_v14 = vpop.eup %1754  ;;  %1421 = vst [vmem:[%s2572_s4 + $0xb0] sm:$0xff] %v1588_v56  ;;  %v1182_v15 = vmul.f32 %v1753_v32, %v2247_v25  ;;  %1780 = vpow2.f32 %v1492_v33  ;;  %v2449_v2 = vadd.f32 %v2340_v9, %v680_v18  ;;  %v570_v33 = vpop.f32.mrf.mxu0 }
 0x11d   :  { %v1757_v10 = vpop.eup %1756  ;;  %1422 = vst [vmem:[%s2572_s4 + $0xb8] sm:$0xff] %v1589_v46  ;;  %v1184_v53 = vmul.f32 %v1755_v14, %v2256_v44  ;;  %1782 = vpow2.f32 %v1494_v61  ;;  %v691_v14 = vmul.f32 %v2296_v4, %v517_v51 }
 0x11e   :  { %v1759_v1 = vpop.eup %1758  ;;  %v1569_v47 = vpack.c.bf16 %v1182_v15, %v1181_v29  ;;  %1784 = vpow2.f32 %v1493_v60  ;;  %v1195_v6 = vmul.f32 %v1757_v10, %v2264_v28  ;;  %v1509_v28 = vmul.f32 -1.442695, %v2449_v2  ;;  %v572_v54 = vpop.f32.mrf.mxu0 }
 0x11f   :  { %v1761_v25 = vpop.eup %1760  ;;  %v1570_v30 = vpack.c.bf16 %v1184_v53, %v1183_v21  ;;  %1786 = vpow2.f32 %v1495_v57  ;;  %v1197_v23 = vmul.f32 %v1759_v1, %v2269_v50  ;;  %v521_v29 = vpop.f32.mrf.mxu1  ;;  %v693_v10 = vmul.f32 %v2303_v43, %v570_v33 }
 0x120   :  { %v1763_v49 = vpop.eup %1762  ;;  %1402 = vst [vmem:[%s2572_s4 + $0x18] sm:$0xff] %v1569_v47  ;;  %v1196_v44 = vmul.f32 %v1761_v25, %v2273_v31  ;;  %1788 = vpow2.f32 %v1506_v17  ;;  %v574_v21 = vpop.f32.mrf.mxu0  ;;  %v692_v53 = vmul.f32 %v2324_v52, %v519_v22  ;;  %v694_v47 = vmul.f32 %v2329_v35, %v572_v54 }
 0x121   :  { %v1765_v61 = vpop.eup %1764  ;;  %1403 = vst [vmem:[%s2572_s4 + $0x20] sm:$0xff] %v1570_v30  ;;  %v1041_v58 = vadd.f32 1.0, %v1763_v49  ;;  %1790 = vpow2.f32 %v1508_v0  ;;  %v2473_v30 = vadd.f32 %v2312_v11, %v691_v14  ;;  %v523_v51 = vpop.f32.mrf.mxu1  ;;  %v705_v33 = vmul.f32 %v2296_v4, %v521_v29 }
 0x122   :  { %v1767_v63 = vpop.eup %1766  ;;  %v1576_v40 = vpack.c.bf16 %v1196_v44, %v1195_v6  ;;  %v1043_v59 = vadd.f32 1.0, %v1765_v61  ;;  %1792 = vpow2.f32 %v1507_v5  ;;  %v2476_v44 = vadd.f32 %v2320_v42, %v693_v10  ;;  %v576_v61 = vpop.f32.mrf.mxu0 }
 0x123   :  { %v1769_v39 = vpop.eup %1768  ;;  %1794 = vrcp.f32 %v1041_v58  ;;  %v1042_v48 = vadd.f32 1.0, %v1767_v63  ;;  %v706_v22 = vmul.f32 %v2324_v52, %v523_v51  ;;  %v708_v54 = vmul.f32 %v2329_v35, %v576_v61 }
 0x124   :  { %v1771_v31 = vpop.eup %1770  ;;  %1409 = vst [vmem:[%s2572_s4 + $0x50] sm:$0xff] %v1576_v40  ;;  %1796 = vrcp.f32 %v1043_v59  ;;  %v1044_v13 = vadd.f32 1.0, %v1769_v39  ;;  %v2480_v40 = vadd.f32 %v2336_v34, %v692_v53  ;;  %v707_v59 = vmul.f32 %v2303_v43, %v574_v21 }
 0x125   :  { %v1773_v20 = vpop.eup %1772  ;;  %v1198_v56 = vmul.f32 %v1771_v31, %v2299_v41  ;;  %1798 = vrcp.f32 %v1042_v48  ;;  %v1522_v43 = vmul.f32 -1.442695, %v2476_v44  ;;  %v2499_v35 = vadd.f32 %v2336_v34, %v706_v22 }
 0x126   :  { %v1775_v60 = vpop.eup %1774  ;;  %1800 = vrcp.f32 %v1044_v13  ;;  %v1055_v32 = vadd.f32 1.0, %v1773_v20  ;;  %v1520_v13 = vmul.f32 -1.442695, %v2473_v30  ;;  %v2495_v52 = vadd.f32 %v2320_v42, %v707_v59 }
 0x127   :  { %v1777_v46 = vpop.eup %1776  ;;  %v1577_v57 = vpack.c.bf16 %v1198_v56, %v1197_v23  ;;  %v1057_v18 = vadd.f32 1.0, %v1775_v60  ;;  %1802 = vpow2.f32 %v1509_v28  ;;  %v2484_v28 = vadd.f32 %v2340_v9, %v694_v47 }
 0x128   :  { %v1779_v15 = vpop.eup %1778  ;;  %1804 = vrcp.f32 %v1055_v32  ;;  %v1056_v17 = vadd.f32 1.0, %v1777_v46  ;;  %v2491_v56 = vadd.f32 %v2312_v11, %v705_v33  ;;  %v1521_v32 = vmul.f32 -1.442695, %v2480_v40 }
 0x129   :  { %v1781_v50 = vpop.eup %1780  ;;  %1410 = vst [vmem:[%s2572_s4 + $0x58] sm:$0xff] %v1577_v57  ;;  %1806 = vrcp.f32 %v1057_v18  ;;  %v1058_v41 = vadd.f32 1.0, %v1779_v15  ;;  %v1523_v57 = vmul.f32 -1.442695, %v2484_v28  ;;  %v2504_v29 = vadd.f32 %v2340_v9, %v708_v54 }
 0x12a   :  { %v1783_v0 = vpop.eup %1782  ;;  %1808 = vrcp.f32 %v1056_v17  ;;  %v1017_v1 = vadd.f32 1.0, %v1781_v50  ;;  %v1534_v10 = vmul.f32 -1.442695, %v2491_v56  ;;  %v1535_v9 = vmul.f32 -1.442695, %v2499_v35 }
 0x12b   :  { %v1785_v5 = vpop.eup %1784  ;;  %1810 = vrcp.f32 %v1058_v41  ;;  %v1019_v25 = vadd.f32 1.0, %v1783_v0 }
 0x12c   :  { %v1787_v49 = vpop.eup %1786  ;;  %1812 = vrcp.f32 %v1017_v1  ;;  %v1018_v6 = vadd.f32 1.0, %v1785_v5 }
 0x12d   :  { %v1789_v58 = vpop.eup %1788  ;;  %1814 = vrcp.f32 %v1019_v25  ;;  %v1020_v63 = vadd.f32 1.0, %v1787_v49 }
 0x12e   :  { %v1791_v39 = vpop.eup %1790  ;;  %1816 = vrcp.f32 %v1018_v6  ;;  %v1031_v48 = vadd.f32 1.0, %v1789_v58 }
 0x12f   :  { %v1793_v31 = vpop.eup %1792  ;;  %1818 = vrcp.f32 %v1020_v63  ;;  %v1033_v4 = vadd.f32 1.0, %v1791_v39 }
 0x130   :  { %v1795_v20 = vpop.eup %1794  ;;  %1820 = vrcp.f32 %v1031_v48  ;;  %v1032_v23 = vadd.f32 1.0, %v1793_v31 }
 0x131   :  { %v1797_v60 = vpop.eup %1796  ;;  %1822 = vrcp.f32 %v1033_v4  ;;  %v1209_v14 = vmul.f32 %v1795_v20, %v2345_v3  ;;  %v1536_v3 = vmul.f32 -1.442695, %v2495_v52 }
 0x132   :  { %v1799_v46 = vpop.eup %1798  ;;  %1824 = vrcp.f32 %v1032_v23  ;;  %v1211_v42 = vmul.f32 %v1797_v60, %v2361_v38  ;;  %v1537_v38 = vmul.f32 -1.442695, %v2504_v29 }
 0x133   :  { %v1801_v18 = vpop.eup %1800  ;;  %v1210_v11 = vmul.f32 %v1799_v46, %v2364_v26  ;;  %1826 = vpow2.f32 %v1520_v13 }
 0x134   :  { %v1803_v15 = vpop.eup %1802  ;;  %v1212_v17 = vmul.f32 %v1801_v18, %v2367_v55  ;;  %1828 = vpow2.f32 %v1522_v43 }
 0x135   :  { %v1805_v21 = vpop.eup %1804  ;;  %v1583_v34 = vpack.c.bf16 %v1210_v11, %v1209_v14  ;;  %v1034_v50 = vadd.f32 1.0, %v1803_v15  ;;  %1830 = vpow2.f32 %v1521_v32 }
 0x136   :  { %v1807_v41 = vpop.eup %1806  ;;  %v1584_v26 = vpack.c.bf16 %v1212_v17, %v1211_v42  ;;  %1832 = vpow2.f32 %v1523_v57  ;;  %v1223_v0 = vmul.f32 %v1805_v21, %v2370_v27 }
 0x137   :  { %v1809_v53 = vpop.eup %1808  ;;  %1416 = vst [vmem:[%s2572_s4 + $0x88] sm:$0xff] %v1583_v34  ;;  %1834 = vrcp.f32 %v1034_v50  ;;  %v1225_v5 = vmul.f32 %v1807_v41, %v2373_v36 }
 0x138   :  { %v1811_v55 = vpop.eup %1810  ;;  %1417 = vst [vmem:[%s2572_s4 + $0x90] sm:$0xff] %v1584_v26  ;;  %v1224_v1 = vmul.f32 %v1809_v53, %v2376_v62  ;;  %1836 = vpow2.f32 %v1534_v10 }
 0x139   :  { %v1813_v47 = vpop.eup %1812  ;;  %v1226_v25 = vmul.f32 %v1811_v55, %v2379_v45  ;;  %1838 = vpow2.f32 %v1536_v3 }
 0x13a   :  { %v1815_v51 = vpop.eup %1814  ;;  %v1590_v49 = vpack.c.bf16 %v1224_v1, %v1223_v0  ;;  %1840 = vpow2.f32 %v1535_v9  ;;  %v1185_v27 = vmul.f32 %v1813_v47, %v2391_v19 }
 0x13b   :  { %v1817_v6 = vpop.eup %1816  ;;  %v1591_v33 = vpack.c.bf16 %v1226_v25, %v1225_v5  ;;  %1842 = vpow2.f32 %v1537_v38  ;;  %v1187_v36 = vmul.f32 %v1815_v51, %v2394_v12 }
 0x13c   :  { %v1819_v61 = vpop.eup %1818  ;;  %1423 = vst [vmem:[%s2572_s4 + $0xc0] sm:$0xff] %v1590_v49  ;;  %v1186_v62 = vmul.f32 %v1817_v6, %v2405_v8 }
 0x13d   :  { %v1821_v58 = vpop.eup %1820  ;;  %1424 = vst [vmem:[%s2572_s4 + $0xc8] sm:$0xff] %v1591_v33  ;;  %v1188_v45 = vmul.f32 %v1819_v61, %v2414_v37 }
 0x13e   :  { %v1823_v63 = vpop.eup %1822  ;;  %v1571_v59 = vpack.c.bf16 %v1186_v62, %v1185_v27  ;;  %v1199_v19 = vmul.f32 %v1821_v58, %v2422_v7 }
 0x13f   :  { %v1825_v39 = vpop.eup %1824  ;;  %v1572_v48 = vpack.c.bf16 %v1188_v45, %v1187_v36  ;;  %v1201_v43 = vmul.f32 %v1823_v63, %v2427_v24 }
 0x140   :  { %v1827_v22 = vpop.eup %1826  ;;  %1404 = vst [vmem:[%s2572_s4 + $0x28] sm:$0xff] %v1571_v59  ;;  %v1200_v8 = vmul.f32 %v1825_v39, %v2431_v16 }
 0x141   :  { %v1829_v31 = vpop.eup %1828  ;;  %1405 = vst [vmem:[%s2572_s4 + $0x30] sm:$0xff] %v1572_v48  ;;  %v1045_v12 = vadd.f32 1.0, %v1827_v22 }
 0x142   :  { %v1831_v37 = vpop.eup %1830  ;;  %v1578_v4 = vpack.c.bf16 %v1200_v8, %v1199_v19  ;;  %v1047_v13 = vadd.f32 1.0, %v1829_v31 }
 0x143   :  { %v1833_v54 = vpop.eup %1832  ;;  %1844 = vrcp.f32 %v1045_v12  ;;  %v1046_v20 = vadd.f32 1.0, %v1831_v37 }
 0x144   :  { %v1835_v23 = vpop.eup %1834  ;;  %1411 = vst [vmem:[%s2572_s4 + $0x60] sm:$0xff] %v1578_v4  ;;  %1846 = vrcp.f32 %v1047_v13  ;;  %v1048_v7 = vadd.f32 1.0, %v1833_v54 }
 0x145   :  { %v1837_v16 = vpop.eup %1836  ;;  %v1202_v60 = vmul.f32 %v1835_v23, %v2449_v2  ;;  %1848 = vrcp.f32 %v1046_v20 }
 0x146   :  { %v1839_v32 = vpop.eup %1838  ;;  %1850 = vrcp.f32 %v1048_v7  ;;  %v1059_v46 = vadd.f32 1.0, %v1837_v16 }
 0x147   :  { %v1841_v57 = vpop.eup %1840  ;;  %v1579_v18 = vpack.c.bf16 %v1202_v60, %v1201_v43  ;;  %v1061_v14 = vadd.f32 1.0, %v1839_v32 }
 0x148   :  { %v1843_v11 = vpop.eup %1842  ;;  %1852 = vrcp.f32 %v1059_v46  ;;  %v1060_v15 = vadd.f32 1.0, %v1841_v57 }
 0x149   :  { %1412 = vst [vmem:[%s2572_s4 + $0x68] sm:$0xff] %v1579_v18  ;;  %1854 = vrcp.f32 %v1061_v14  ;;  %v1062_v42 = vadd.f32 1.0, %v1843_v11 }
 0x14a   :  { %1856 = vrcp.f32 %v1060_v15 }
 0x14b   :  { %1858 = vrcp.f32 %v1062_v42 }
 0x150   :  { %v1845_v24 = vpop.eup %1844 }
 0x151   :  { %v1847_v2 = vpop.eup %1846  ;;  %v1213_v21 = vmul.f32 %v1845_v24, %v2473_v30 }
 0x152   :  { %v1849_v17 = vpop.eup %1848  ;;  %v1215_v50 = vmul.f32 %v1847_v2, %v2476_v44 }
 0x153   :  { %v1851_v10 = vpop.eup %1850  ;;  %v1214_v34 = vmul.f32 %v1849_v17, %v2480_v40 }
 0x154   :  { %v1216_v3 = vmul.f32 %v1851_v10, %v2484_v28 }
 0x155   :  { %v1853_v41 = vpop.eup %1852  ;;  %v1585_v26 = vpack.c.bf16 %v1214_v34, %v1213_v21 }
 0x156   :  { %v1855_v9 = vpop.eup %1854  ;;  %v1586_v53 = vpack.c.bf16 %v1216_v3, %v1215_v50  ;;  %v1227_v30 = vmul.f32 %v1853_v41, %v2491_v56 }
 0x157   :  { %v1857_v38 = vpop.eup %1856  ;;  %1418 = vst [vmem:[%s2572_s4 + $0x98] sm:$0xff] %v1585_v26  ;;  %v1229_v40 = vmul.f32 %v1855_v9, %v2495_v52 }
 0x158   :  { %v1859_v55 = vpop.eup %1858  ;;  %1419 = vst [vmem:[%s2572_s4 + $0xa0] sm:$0xff] %v1586_v53  ;;  %v1228_v44 = vmul.f32 %v1857_v38, %v2499_v35 }
 0x159   :  { %v1230_v28 = vmul.f32 %v1859_v55, %v2504_v29 }
 0x15a   :  { %v1592_v0 = vpack.c.bf16 %v1228_v44, %v1227_v30 }
 0x15b   :  { %v1593_v1 = vpack.c.bf16 %v1230_v28, %v1229_v40 }
 0x15c   :  { %1425 = vst [vmem:[%s2572_s4 + $0xd0] sm:$0xff] %v1592_v0 }
 0x15d   :  { %1426 = vst [vmem:[%s2572_s4 + $0xd8] sm:$0xff] %v1593_v1 }

</bundles_post_ra>
